<compile_context>
chip_gen: v5e
topology: v5e:2x2
jax: 0.10.0
libtpu: 0.0.40
codegen_flags: <defaults>
</compile_context>

<pallas_src>
import jax
import jax.numpy as jnp
from jax import lax
from jax.experimental import pallas as pl
from jax.experimental.pallas import tpu as pltpu

EPS = 1e-5


def _round_up(a, b):
    return (a + b - 1) // b * b


def _pick_tile_h(H, W, cin, cpad):
    """Largest even divisor of H whose kernel-1 working set fits a VMEM budget."""
    divs = sorted((d for d in range(2, H + 1, 2) if H % d == 0), reverse=True)
    budget = 24 * 1024 * 1024          # headroom inside the 32 MiB vmem limit below
    for th in divs:
        L = th * (W + 2)
        if L > 4096:
            continue
        bpad = _round_up((th + 2) * (W + 2) + 2, 8)
        est = (2 * bpad * cin * 2          # double-buffered input block (bf16)
               + 9 * cin * cpad * 2        # resident per-tap weights (bf16, 1 buffer)
               + 2 * L * cpad * 2          # double-buffered conv-out block (bf16)
               + L * cpad * 4              # f32 accumulator
               + L * 512)                  # (L,1) stats mask (lane-padded)
        if est <= budget:
            return th
    return divs[-1]


def down_block2d(x, weight, bias, gamma, beta):
    """x: (N, Cin, H, W) f32 (PyTorch NCHW). Returns (N, Cout, H//2, W//2) f32."""
    # TODO(synk): grouped conv (groups > 1) not implemented; default groups=1 only.
    # TODO(synk): odd H or W not supported (BN-over-full-conv + floor-pool bookkeeping);
    #             even spatial sizes only.
    N, Cin, H, W = x.shape
    Cout = weight.shape[0]
    assert weight.shape == (Cout, Cin, 3, 3)
    assert H % 2 == 0 and W % 2 == 0

    Hout, Wout = H // 2, W // 2
    Cpad = _round_up(Cout, 128)              # lane-dense output-channel dim
    Wp = W + 2                               # conv-halo padded width
    TH = _pick_tile_h(H, W, Cin, Cpad)       # conv rows per grid step (even divisor of H)
    nT = H // TH
    n_blk = N * nT                           # kernel-1 grid size
    L = TH * Wp                              # flat conv rows (o = h*Wp + w) per block
    Bpad = _round_up((TH + 2) * Wp + 2, 8)   # halo'd flat input rows per block (padded)

    # ---------------- wrapper glue (~1.1-1.3x raw-input HBM traffic) ----------------
    x_cl = jnp.transpose(x, (0, 2, 3, 1))                                  # (N,H,W,Cin)
    x_pad = jnp.pad(x_cl, ((0, 0), (1, 1), (1, 1), (0, 0))).astype(jnp.bfloat16)
    # overlapping (halo'd) row blocks -> flat (hp*Wp + wp, Cin) slab per block
    blocks = [x_pad[:, t * TH: t * TH + TH + 2] for t in range(nT)]        # (N,TH+2,Wp,Cin)
    xb = jnp.stack(blocks, axis=1).reshape(n_blk, (TH + 2) * Wp, Cin)
    x_flat = jnp.pad(xb, ((0, 0), (0, Bpad - (TH + 2) * Wp), (0, 0)))      # (n_blk,Bpad,Cin)

    # per-tap weights (9, Cin, Cpad): (Cout,Cin,kh,kw) -> (kh,kw,Cin,Cout), zero-padded
    w_all = jnp.transpose(weight, (2, 3, 1, 0)).reshape(9, Cin, Cout)
    w_all = jnp.pad(w_all, ((0, 0), (0, 0), (0, Cpad - Cout))).astype(jnp.bfloat16)

    # stats validity mask over the flat row layout: only w < W columns are real conv
    # outputs (the 2 width-halo columns per row hold junk that BN must not see).
    mask = (jnp.arange(L, dtype=jnp.int32) % Wp < W).astype(jnp.float32).reshape(L, 1)

    # NOTE: the conv bias is never applied -- train-mode BatchNorm subtracts the
    # per-channel mean, which absorbs it exactly.
    del bias

    # ------------------------------------------------------------------
    # Kernel 1: 3x3 conv as 9 shifted matmuls over the flat slab, plus per-block
    # (masked) BN partial statistics.  grid = (n_blk,), fully parallel.
    # ------------------------------------------------------------------
    def conv_stats_kernel(x_ref, w_ref, mask_ref, conv_ref, sum_ref, ssq_ref):
        # output flat row o needs input flat row o + kh*Wp + kw
        acc = jnp.dot(x_ref[0, 0:L, :], w_ref[0],
                      preferred_element_type=jnp.float32)                  # (L, Cpad)
        for k in range(1, 9):                                              # static unroll
            kh, kw = divmod(k, 3)
            d = kh * Wp + kw
            acc = acc + jnp.dot(x_ref[0, d:d + L, :], w_ref[k],
                                preferred_element_type=jnp.float32)
        conv_ref[0] = acc.astype(conv_ref.dtype)
        m = acc * mask_ref[...]                          # zero the width-halo columns
        sum_ref[0] = jnp.sum(m, axis=0, keepdims=True)
        ssq_ref[0] = jnp.sum(m * acc, axis=0, keepdims=True)

    conv, sum_p, ssq_p = pl.pallas_call(
        conv_stats_kernel,
        out_shape=(
            jax.ShapeDtypeStruct((n_blk, L, Cpad), jnp.bfloat16),
            jax.ShapeDtypeStruct((n_blk, 1, Cpad), jnp.float32),
            jax.ShapeDtypeStruct((n_blk, 1, Cpad), jnp.float32),
        ),
        grid_spec=pltpu.PrefetchScalarGridSpec(
            num_scalar_prefetch=0,
            grid=(n_blk,),
            in_specs=[
                pl.BlockSpec((1, Bpad, Cin), lambda b: (b, 0, 0)),
                pl.BlockSpec((9, Cin, Cpad), lambda b: (0, 0, 0),
                             pipeline_mode=pl.Buffered(1)),   # grid-invariant weights
                pl.BlockSpec((L, 1), lambda b: (0, 0)),
            ],
            out_specs=[
                pl.BlockSpec((1, L, Cpad), lambda b: (b, 0, 0)),
                pl.BlockSpec((1, 1, Cpad), lambda b: (b, 0, 0)),
                pl.BlockSpec((1, 1, Cpad), lambda b: (b, 0, 0)),
            ],
        ),
        compiler_params=pltpu.CompilerParams(
            dimension_semantics=("parallel",),
            vmem_limit_bytes=32 * 1024 * 1024),
    )(x_flat, w_all, mask)

    # ---- tiny per-channel glue: training-mode BatchNorm (biased var, as in PyTorch) ----
    cnt = float(N * H * W)
    tot_sum = jnp.sum(sum_p[:, 0, :Cout], axis=0)
    tot_ssq = jnp.sum(ssq_p[:, 0, :Cout], axis=0)
    mean = tot_sum / cnt
    var = tot_ssq / cnt - mean * mean        # one-pass var in f32 (bias-free conv keeps
                                             # the mean small, so cancellation is mild)
    inv = gamma / jnp.sqrt(var + EPS)
    # fold the 0.25 AvgPool factor into scale/shift: relu(y)*0.25 == relu(0.25*y)
    scale = jnp.pad(0.25 * inv, (0, Cpad - Cout)).reshape(1, Cpad).astype(jnp.float32)
    shift = jnp.pad(0.25 * (beta - mean * inv),
                    (0, Cpad - Cout)).reshape(1, Cpad).astype(jnp.float32)

    # 0/1 selection matrix that pools along W (picks columns 2*wo and 2*wo+1)
    wo = jnp.arange(Wout)[:, None]
    wi = jnp.arange(Wp)[None, :]
    pmat = ((wi == 2 * wo) | (wi == 2 * wo + 1)).astype(jnp.float32)       # (Wout, Wp)

    # ------------------------------------------------------------------
    # Kernel 2: fused BatchNorm + ReLU + 2x2 average pool.  Each block holds RP pairs
    # of consecutive conv rows; H-pooling is one add, W-pooling is a tiny matmul.
    # ------------------------------------------------------------------
    n_rows = N * Hout                          # = n_blk * TH // 2
    conv2 = conv.reshape(n_rows, 2 * Wp, Cpad)
    RP = max(r for r in (8, 4, 2, 1) if n_rows % r == 0)

    def bn_relu_pool_kernel(c_ref, scale_ref, shift_ref, pmat_ref, o_ref):
        sc = scale_ref[...]
        sh = shift_ref[...]
        pm = pmat_ref[...]
        for p in range(RP):                                     # static unroll
            y = c_ref[p].astype(jnp.float32) * sc + sh          # BN (pool factor folded)
            y = jnp.maximum(y, 0.0)                             # ReLU
            yh = y[0:Wp, :] + y[Wp:2 * Wp, :]                   # pool along H
            o_ref[p] = jnp.dot(pm, yh,                          # pool along W
                               preferred_element_type=jnp.float32).astype(o_ref.dtype)

    pooled = pl.pallas_call(
        bn_relu_pool_kernel,
        out_shape=jax.ShapeDtypeStruct((n_rows, Wout, Cpad), jnp.bfloat16),
        grid_spec=pltpu.PrefetchScalarGridSpec(
            num_scalar_prefetch=0,
            grid=(n_rows // RP,),
            in_specs=[
                pl.BlockSpec((RP, 2 * Wp, Cpad), lambda i: (i, 0, 0)),
                pl.BlockSpec((1, Cpad), lambda i: (0, 0)),
                pl.BlockSpec((1, Cpad), lambda i: (0, 0)),
                pl.BlockSpec((Wout, Wp), lambda i: (0, 0)),
            ],
            out_specs=pl.BlockSpec((RP, Wout, Cpad), lambda i: (i, 0, 0)),
        ),
        compiler_params=pltpu.CompilerParams(
            dimension_semantics=("parallel",),
            vmem_limit_bytes=32 * 1024 * 1024),
    )(conv2, scale, shift, pmat)

    # back to PyTorch NCHW (small, pooled tensor)
    out = pooled[:, :, :Cout].astype(jnp.float32).reshape(N, Hout, Wout, Cout)
    return jnp.transpose(out, (0, 3, 1, 2))


def reference(x, weight, bias, gamma, beta):
    """Pure-JAX reference mirroring Conv2d + BatchNorm2d(train) + ReLU + AvgPool2d(2)."""
    conv = lax.conv_general_dilated(
        x, weight, window_strides=(1, 1), padding=((1, 1), (1, 1)),
        dimension_numbers=("NCHW", "OIHW", "NCHW"))
    conv = conv + bias[None, :, None, None]
    mean = conv.mean(axis=(0, 2, 3), keepdims=True)
    var = conv.var(axis=(0, 2, 3), keepdims=True)         # biased, as in BN training
    y = (conv - mean) / jnp.sqrt(var + EPS)
    y = y * gamma[None, :, None, None] + beta[None, :, None, None]
    y = jnp.maximum(y, 0.0)
    N, C, H, W = y.shape
    y = y[:, :, : (H // 2) * 2, : (W // 2) * 2]
    return y.reshape(N, C, H // 2, 2, W // 2, 2).mean(axis=(3, 5))


if __name__ == "__main__":
    N, Cin, Cout, H, W = 2, 4, 8, 16, 16

    key = jax.random.PRNGKey(0)
    k1, k2, k3, k4, k5 = jax.random.split(key, 5)
    x = jax.random.normal(k1, (N, Cin, H, W), jnp.float32)
    weight = jax.random.normal(k2, (Cout, Cin, 3, 3), jnp.float32) * 0.1
    bias = jax.random.normal(k3, (Cout,), jnp.float32) * 0.1
    gamma = 1.0 + 0.1 * jax.random.normal(k4, (Cout,), jnp.float32)
    beta = 0.1 * jax.random.normal(k5, (Cout,), jnp.float32)

    fn = jax.jit(down_block2d)
    out = jax.block_until_ready(fn(x, weight, bias, gamma, beta))
    ref = jax.block_until_ready(reference(x, weight, bias, gamma, beta))

    assert out.shape == (N, Cout, H // 2, W // 2), out.shape
    # bf16 activations/weights/intermediates -> relaxed tolerance vs f32 reference
    assert jnp.allclose(out, ref, atol=2e-2, rtol=2e-2), (
        float(jnp.max(jnp.abs(out - ref))))
    print("KERNEL_OK")
</pallas_src>

<mosaic_0001>
module attributes {stable_mosaic.version = 11 : i64} {
  func.func @conv_stats_kernel(%arg0: i32, %arg1: memref<1x328x4xbf16, #tpu.memory_space<vmem>>, %arg2: memref<9x4x128xbf16, #tpu.memory_space<vmem>>, %arg3: memref<288x1xf32, #tpu.memory_space<vmem>>, %arg4: memref<1x288x128xbf16, #tpu.memory_space<vmem>>, %arg5: memref<1x1x128xf32, #tpu.memory_space<vmem>>, %arg6: memref<1x1x128xf32, #tpu.memory_space<vmem>>) attributes {dimension_semantics = [#tpu.dimension_semantics<parallel>], iteration_bounds = array<i64: 2>, scalar_prefetch = 0 : i64, scratch_operands = 0 : i64, tpu.core_type = #tpu.core_type<tc>, window_params = [{transform_indices = @transform_0, window_bounds = array<i64: 1, 328, 4>}, {pipeline_mode = #tpu.pipeline_mode<synchronous>, transform_indices = @transform_1, window_bounds = array<i64: 9, 4, 128>}, {pipeline_mode = #tpu.pipeline_mode<synchronous>, transform_indices = @transform_2, window_bounds = array<i64: 288, 1>}, {transform_indices = @transform_3, window_bounds = array<i64: 1, 288, 128>}, {transform_indices = @transform_4, window_bounds = array<i64: 1, 1, 128>}, {transform_indices = @transform_5, window_bounds = array<i64: 1, 1, 128>}]} {
    %c0 = arith.constant 0 : index
    %c0_0 = arith.constant 0 : index
    %c0_1 = arith.constant 0 : index
    %0 = vector.load %arg1[%c0, %c0_0, %c0_1] : memref<1x328x4xbf16, #tpu.memory_space<vmem>>, vector<1x288x4xbf16>
    %1 = vector.shape_cast %0 : vector<1x288x4xbf16> to vector<288x4xbf16>
    %c0_2 = arith.constant 0 : index
    %c0_3 = arith.constant 0 : index
    %c0_4 = arith.constant 0 : index
    %2 = vector.load %arg2[%c0_2, %c0_3, %c0_4] : memref<9x4x128xbf16, #tpu.memory_space<vmem>>, vector<1x4x128xbf16>
    %3 = vector.shape_cast %2 : vector<1x4x128xbf16> to vector<4x128xbf16>
    %cst = arith.constant dense<0.000000e+00> : vector<288x128xf32>
    %4 = tpu.matmul %1, %3, %cst {dimension_numbers = #tpu.dot_dimension_numbers<[1], [0], [0], [1], [0, 0, 1, 1], [], []>} : vector<288x4xbf16>, vector<4x128xbf16>, vector<288x128xf32> -> vector<288x128xf32>
    %c0_5 = arith.constant 0 : index
    %c1 = arith.constant 1 : index
    %c0_6 = arith.constant 0 : index
    %5 = vector.load %arg1[%c0_5, %c1, %c0_6] : memref<1x328x4xbf16, #tpu.memory_space<vmem>>, vector<1x288x4xbf16>
    %6 = vector.shape_cast %5 : vector<1x288x4xbf16> to vector<288x4xbf16>
    %c1_7 = arith.constant 1 : index
    %c0_8 = arith.constant 0 : index
    %c0_9 = arith.constant 0 : index
    %7 = vector.load %arg2[%c1_7, %c0_8, %c0_9] : memref<9x4x128xbf16, #tpu.memory_space<vmem>>, vector<1x4x128xbf16>
    %8 = vector.shape_cast %7 : vector<1x4x128xbf16> to vector<4x128xbf16>
    %cst_10 = arith.constant dense<0.000000e+00> : vector<288x128xf32>
    %9 = tpu.matmul %6, %8, %cst_10 {dimension_numbers = #tpu.dot_dimension_numbers<[1], [0], [0], [1], [0, 0, 1, 1], [], []>} : vector<288x4xbf16>, vector<4x128xbf16>, vector<288x128xf32> -> vector<288x128xf32>
    %10 = arith.addf %4, %9 : vector<288x128xf32>
    %c0_11 = arith.constant 0 : index
    %c2 = arith.constant 2 : index
    %c0_12 = arith.constant 0 : index
    %11 = vector.load %arg1[%c0_11, %c2, %c0_12] : memref<1x328x4xbf16, #tpu.memory_space<vmem>>, vector<1x288x4xbf16>
    %12 = vector.shape_cast %11 : vector<1x288x4xbf16> to vector<288x4xbf16>
    %c2_13 = arith.constant 2 : index
    %c0_14 = arith.constant 0 : index
    %c0_15 = arith.constant 0 : index
    %13 = vector.load %arg2[%c2_13, %c0_14, %c0_15] : memref<9x4x128xbf16, #tpu.memory_space<vmem>>, vector<1x4x128xbf16>
    %14 = vector.shape_cast %13 : vector<1x4x128xbf16> to vector<4x128xbf16>
    %cst_16 = arith.constant dense<0.000000e+00> : vector<288x128xf32>
    %15 = tpu.matmul %12, %14, %cst_16 {dimension_numbers = #tpu.dot_dimension_numbers<[1], [0], [0], [1], [0, 0, 1, 1], [], []>} : vector<288x4xbf16>, vector<4x128xbf16>, vector<288x128xf32> -> vector<288x128xf32>
    %16 = arith.addf %10, %15 : vector<288x128xf32>
    %c0_17 = arith.constant 0 : index
    %c18 = arith.constant 18 : index
    %c0_18 = arith.constant 0 : index
    %17 = vector.load %arg1[%c0_17, %c18, %c0_18] : memref<1x328x4xbf16, #tpu.memory_space<vmem>>, vector<1x288x4xbf16>
    %18 = vector.shape_cast %17 : vector<1x288x4xbf16> to vector<288x4xbf16>
    %c3 = arith.constant 3 : index
    %c0_19 = arith.constant 0 : index
    %c0_20 = arith.constant 0 : index
    %19 = vector.load %arg2[%c3, %c0_19, %c0_20] : memref<9x4x128xbf16, #tpu.memory_space<vmem>>, vector<1x4x128xbf16>
    %20 = vector.shape_cast %19 : vector<1x4x128xbf16> to vector<4x128xbf16>
    %cst_21 = arith.constant dense<0.000000e+00> : vector<288x128xf32>
    %21 = tpu.matmul %18, %20, %cst_21 {dimension_numbers = #tpu.dot_dimension_numbers<[1], [0], [0], [1], [0, 0, 1, 1], [], []>} : vector<288x4xbf16>, vector<4x128xbf16>, vector<288x128xf32> -> vector<288x128xf32>
    %22 = arith.addf %16, %21 : vector<288x128xf32>
    %c0_22 = arith.constant 0 : index
    %c19 = arith.constant 19 : index
    %c0_23 = arith.constant 0 : index
    %23 = vector.load %arg1[%c0_22, %c19, %c0_23] : memref<1x328x4xbf16, #tpu.memory_space<vmem>>, vector<1x288x4xbf16>
    %24 = vector.shape_cast %23 : vector<1x288x4xbf16> to vector<288x4xbf16>
    %c4 = arith.constant 4 : index
    %c0_24 = arith.constant 0 : index
    %c0_25 = arith.constant 0 : index
    %25 = vector.load %arg2[%c4, %c0_24, %c0_25] : memref<9x4x128xbf16, #tpu.memory_space<vmem>>, vector<1x4x128xbf16>
    %26 = vector.shape_cast %25 : vector<1x4x128xbf16> to vector<4x128xbf16>
    %cst_26 = arith.constant dense<0.000000e+00> : vector<288x128xf32>
    %27 = tpu.matmul %24, %26, %cst_26 {dimension_numbers = #tpu.dot_dimension_numbers<[1], [0], [0], [1], [0, 0, 1, 1], [], []>} : vector<288x4xbf16>, vector<4x128xbf16>, vector<288x128xf32> -> vector<288x128xf32>
    %28 = arith.addf %22, %27 : vector<288x128xf32>
    %c0_27 = arith.constant 0 : index
    %c20 = arith.constant 20 : index
    %c0_28 = arith.constant 0 : index
    %29 = vector.load %arg1[%c0_27, %c20, %c0_28] : memref<1x328x4xbf16, #tpu.memory_space<vmem>>, vector<1x288x4xbf16>
    %30 = vector.shape_cast %29 : vector<1x288x4xbf16> to vector<288x4xbf16>
    %c5 = arith.constant 5 : index
    %c0_29 = arith.constant 0 : index
    %c0_30 = arith.constant 0 : index
    %31 = vector.load %arg2[%c5, %c0_29, %c0_30] : memref<9x4x128xbf16, #tpu.memory_space<vmem>>, vector<1x4x128xbf16>
    %32 = vector.shape_cast %31 : vector<1x4x128xbf16> to vector<4x128xbf16>
    %cst_31 = arith.constant dense<0.000000e+00> : vector<288x128xf32>
    %33 = tpu.matmul %30, %32, %cst_31 {dimension_numbers = #tpu.dot_dimension_numbers<[1], [0], [0], [1], [0, 0, 1, 1], [], []>} : vector<288x4xbf16>, vector<4x128xbf16>, vector<288x128xf32> -> vector<288x128xf32>
    %34 = arith.addf %28, %33 : vector<288x128xf32>
    %c0_32 = arith.constant 0 : index
    %c36 = arith.constant 36 : index
    %c0_33 = arith.constant 0 : index
    %35 = vector.load %arg1[%c0_32, %c36, %c0_33] : memref<1x328x4xbf16, #tpu.memory_space<vmem>>, vector<1x288x4xbf16>
    %36 = vector.shape_cast %35 : vector<1x288x4xbf16> to vector<288x4xbf16>
    %c6 = arith.constant 6 : index
    %c0_34 = arith.constant 0 : index
    %c0_35 = arith.constant 0 : index
    %37 = vector.load %arg2[%c6, %c0_34, %c0_35] : memref<9x4x128xbf16, #tpu.memory_space<vmem>>, vector<1x4x128xbf16>
    %38 = vector.shape_cast %37 : vector<1x4x128xbf16> to vector<4x128xbf16>
    %cst_36 = arith.constant dense<0.000000e+00> : vector<288x128xf32>
    %39 = tpu.matmul %36, %38, %cst_36 {dimension_numbers = #tpu.dot_dimension_numbers<[1], [0], [0], [1], [0, 0, 1, 1], [], []>} : vector<288x4xbf16>, vector<4x128xbf16>, vector<288x128xf32> -> vector<288x128xf32>
    %40 = arith.addf %34, %39 : vector<288x128xf32>
    %c0_37 = arith.constant 0 : index
    %c37 = arith.constant 37 : index
    %c0_38 = arith.constant 0 : index
    %41 = vector.load %arg1[%c0_37, %c37, %c0_38] : memref<1x328x4xbf16, #tpu.memory_space<vmem>>, vector<1x288x4xbf16>
    %42 = vector.shape_cast %41 : vector<1x288x4xbf16> to vector<288x4xbf16>
    %c7 = arith.constant 7 : index
    %c0_39 = arith.constant 0 : index
    %c0_40 = arith.constant 0 : index
    %43 = vector.load %arg2[%c7, %c0_39, %c0_40] : memref<9x4x128xbf16, #tpu.memory_space<vmem>>, vector<1x4x128xbf16>
    %44 = vector.shape_cast %43 : vector<1x4x128xbf16> to vector<4x128xbf16>
    %cst_41 = arith.constant dense<0.000000e+00> : vector<288x128xf32>
    %45 = tpu.matmul %42, %44, %cst_41 {dimension_numbers = #tpu.dot_dimension_numbers<[1], [0], [0], [1], [0, 0, 1, 1], [], []>} : vector<288x4xbf16>, vector<4x128xbf16>, vector<288x128xf32> -> vector<288x128xf32>
    %46 = arith.addf %40, %45 : vector<288x128xf32>
    %c0_42 = arith.constant 0 : index
    %c38 = arith.constant 38 : index
    %c0_43 = arith.constant 0 : index
    %47 = vector.load %arg1[%c0_42, %c38, %c0_43] : memref<1x328x4xbf16, #tpu.memory_space<vmem>>, vector<1x288x4xbf16>
    %48 = vector.shape_cast %47 : vector<1x288x4xbf16> to vector<288x4xbf16>
    %c8 = arith.constant 8 : index
    %c0_44 = arith.constant 0 : index
    %c0_45 = arith.constant 0 : index
    %49 = vector.load %arg2[%c8, %c0_44, %c0_45] : memref<9x4x128xbf16, #tpu.memory_space<vmem>>, vector<1x4x128xbf16>
    %50 = vector.shape_cast %49 : vector<1x4x128xbf16> to vector<4x128xbf16>
    %cst_46 = arith.constant dense<0.000000e+00> : vector<288x128xf32>
    %51 = tpu.matmul %48, %50, %cst_46 {dimension_numbers = #tpu.dot_dimension_numbers<[1], [0], [0], [1], [0, 0, 1, 1], [], []>} : vector<288x4xbf16>, vector<4x128xbf16>, vector<288x128xf32> -> vector<288x128xf32>
    %52 = arith.addf %46, %51 : vector<288x128xf32>
    %53 = arith.truncf %52 : vector<288x128xf32> to vector<288x128xbf16>
    %c0_47 = arith.constant 0 : index
    %c0_48 = arith.constant 0 : index
    %c0_49 = arith.constant 0 : index
    %54 = vector.load %arg4[%c0_47, %c0_48, %c0_49] : memref<1x288x128xbf16, #tpu.memory_space<vmem>>, vector<1x288x128xbf16>
    %55 = vector.shape_cast %54 : vector<1x288x128xbf16> to vector<288x128xbf16>
    %56 = vector.shape_cast %53 : vector<288x128xbf16> to vector<1x288x128xbf16>
    tpu.vector_store %arg4[%c0_47, %c0_48, %c0_49], %56 {strides = array<i32>} : memref<1x288x128xbf16, #tpu.memory_space<vmem>>, vector<1x288x128xbf16>,
    %c0_50 = arith.constant 0 : index
    %c0_51 = arith.constant 0 : index
    %57 = vector.load %arg3[%c0_50, %c0_51] : memref<288x1xf32, #tpu.memory_space<vmem>>, vector<288x1xf32>
    %58 = vector.broadcast %57 : vector<288x1xf32> to vector<288x128xf32>
    %59 = arith.mulf %52, %58 : vector<288x128xf32>
    %cst_52 = arith.constant dense<0.000000e+00> : vector<128xf32>
    %60 = vector.multi_reduction <add>, %59, %cst_52 [0] : vector<288x128xf32> to vector<128xf32>
    %61 = vector.shape_cast %60 : vector<128xf32> to vector<1x128xf32>
    %c0_53 = arith.constant 0 : index
    %c0_54 = arith.constant 0 : index
    %c0_55 = arith.constant 0 : index
    %62 = vector.load %arg5[%c0_53, %c0_54, %c0_55] : memref<1x1x128xf32, #tpu.memory_space<vmem>>, vector<1x1x128xf32>
    %63 = vector.shape_cast %62 : vector<1x1x128xf32> to vector<1x128xf32>
    %64 = vector.shape_cast %61 : vector<1x128xf32> to vector<1x1x128xf32>
    tpu.vector_store %arg5[%c0_53, %c0_54, %c0_55], %64 {strides = array<i32>} : memref<1x1x128xf32, #tpu.memory_space<vmem>>, vector<1x1x128xf32>,
    %65 = arith.mulf %59, %52 : vector<288x128xf32>
    %cst_56 = arith.constant dense<0.000000e+00> : vector<128xf32>
    %66 = vector.multi_reduction <add>, %65, %cst_56 [0] : vector<288x128xf32> to vector<128xf32>
    %67 = vector.shape_cast %66 : vector<128xf32> to vector<1x128xf32>
    %c0_57 = arith.constant 0 : index
    %c0_58 = arith.constant 0 : index
    %c0_59 = arith.constant 0 : index
    %68 = vector.load %arg6[%c0_57, %c0_58, %c0_59] : memref<1x1x128xf32, #tpu.memory_space<vmem>>, vector<1x1x128xf32>
    %69 = vector.shape_cast %68 : vector<1x1x128xf32> to vector<1x128xf32>
    %70 = vector.shape_cast %67 : vector<1x128xf32> to vector<1x1x128xf32>
    tpu.vector_store %arg6[%c0_57, %c0_58, %c0_59], %70 {strides = array<i32>} : memref<1x1x128xf32, #tpu.memory_space<vmem>>, vector<1x1x128xf32>,
    return
  }
  func.func @transform_0(%arg0: i32) -> (i32, i32, i32) {
    %c0_i32 = arith.constant 0 : i32
    %c0_i32_0 = arith.constant 0 : i32
    %c0_i32_1 = arith.constant 0 : i32
    return %arg0, %c0_i32, %c0_i32_0 : i32, i32, i32
  }
  func.func @transform_1(%arg0: i32) -> (i32, i32, i32) {
    %c0_i32 = arith.constant 0 : i32
    %c0_i32_0 = arith.constant 0 : i32
    %c0_i32_1 = arith.constant 0 : i32
    %c0_i32_2 = arith.constant 0 : i32
    return %c0_i32, %c0_i32_0, %c0_i32_1 : i32, i32, i32
  }
  func.func @transform_2(%arg0: i32) -> (i32, i32) {
    %c0_i32 = arith.constant 0 : i32
    %c0_i32_0 = arith.constant 0 : i32
    %c0_i32_1 = arith.constant 0 : i32
    return %c0_i32, %c0_i32_0 : i32, i32
  }
  func.func @transform_3(%arg0: i32) -> (i32, i32, i32) {
    %c0_i32 = arith.constant 0 : i32
    %c0_i32_0 = arith.constant 0 : i32
    %c0_i32_1 = arith.constant 0 : i32
    return %arg0, %c0_i32, %c0_i32_0 : i32, i32, i32
  }
  func.func @transform_4(%arg0: i32) -> (i32, i32, i32) {
    %c0_i32 = arith.constant 0 : i32
    %c0_i32_0 = arith.constant 0 : i32
    %c0_i32_1 = arith.constant 0 : i32
    return %arg0, %c0_i32, %c0_i32_0 : i32, i32, i32
  }
  func.func @transform_5(%arg0: i32) -> (i32, i32, i32) {
    %c0_i32 = arith.constant 0 : i32
    %c0_i32_0 = arith.constant 0 : i32
    %c0_i32_1 = arith.constant 0 : i32
    return %arg0, %c0_i32, %c0_i32_0 : i32, i32, i32
  }
}

module attributes {stable_mosaic.version = 11 : i64} {
  func.func @bn_relu_pool_kernel(%arg0: i32, %arg1: memref<8x36x128xbf16, #tpu.memory_space<vmem>>, %arg2: memref<1x128xf32, #tpu.memory_space<vmem>>, %arg3: memref<1x128xf32, #tpu.memory_space<vmem>>, %arg4: memref<8x18xf32, #tpu.memory_space<vmem>>, %arg5: memref<8x8x128xbf16, #tpu.memory_space<vmem>>) attributes {dimension_semantics = [#tpu.dimension_semantics<parallel>], iteration_bounds = array<i64: 2>, scalar_prefetch = 0 : i64, scratch_operands = 0 : i64, tpu.core_type = #tpu.core_type<tc>, window_params = [{transform_indices = @transform_0, window_bounds = array<i64: 8, 36, 128>}, {pipeline_mode = #tpu.pipeline_mode<synchronous>, transform_indices = @transform_1, window_bounds = array<i64: 1, 128>}, {pipeline_mode = #tpu.pipeline_mode<synchronous>, transform_indices = @transform_2, window_bounds = array<i64: 1, 128>}, {pipeline_mode = #tpu.pipeline_mode<synchronous>, transform_indices = @transform_3, window_bounds = array<i64: 8, 18>}, {transform_indices = @transform_4, window_bounds = array<i64: 8, 8, 128>}]} {
    %c0 = arith.constant 0 : index
    %c0_0 = arith.constant 0 : index
    %0 = vector.load %arg2[%c0, %c0_0] : memref<1x128xf32, #tpu.memory_space<vmem>>, vector<1x128xf32>
    %c0_1 = arith.constant 0 : index
    %c0_2 = arith.constant 0 : index
    %1 = vector.load %arg3[%c0_1, %c0_2] : memref<1x128xf32, #tpu.memory_space<vmem>>, vector<1x128xf32>
    %c0_3 = arith.constant 0 : index
    %c0_4 = arith.constant 0 : index
    %2 = vector.load %arg4[%c0_3, %c0_4] : memref<8x18xf32, #tpu.memory_space<vmem>>, vector<8x18xf32>
    %c0_5 = arith.constant 0 : index
    %c0_6 = arith.constant 0 : index
    %c0_7 = arith.constant 0 : index
    %3 = vector.load %arg1[%c0_5, %c0_6, %c0_7] : memref<8x36x128xbf16, #tpu.memory_space<vmem>>, vector<1x36x128xbf16>
    %4 = vector.shape_cast %3 : vector<1x36x128xbf16> to vector<36x128xbf16>
    %5 = arith.extf %4 : vector<36x128xbf16> to vector<36x128xf32>
    %6 = vector.broadcast %0 : vector<1x128xf32> to vector<36x128xf32>
    %7 = arith.mulf %5, %6 : vector<36x128xf32>
    %8 = vector.broadcast %1 : vector<1x128xf32> to vector<36x128xf32>
    %9 = arith.addf %7, %8 : vector<36x128xf32>
    %cst = arith.constant 0.000000e+00 : f32
    %10 = vector.broadcast %cst : f32 to vector<36x128xf32>
    %11 = arith.maximumf %9, %10 : vector<36x128xf32>
    %12 = vector.extract_strided_slice %11 {offsets = [0, 0], sizes = [18, 128], strides = [1, 1]} : vector<36x128xf32> to vector<18x128xf32>
    %13 = vector.extract_strided_slice %11 {offsets = [18, 0], sizes = [18, 128], strides = [1, 1]} : vector<36x128xf32> to vector<18x128xf32>
    %14 = arith.addf %12, %13 : vector<18x128xf32>
    %cst_8 = arith.constant dense<0.000000e+00> : vector<8x128xf32>
    %15 = tpu.matmul %2, %14, %cst_8 {dimension_numbers = #tpu.dot_dimension_numbers<[1], [0], [0], [1], [0, 0, 1, 1], [], []>} : vector<8x18xf32>, vector<18x128xf32>, vector<8x128xf32> -> vector<8x128xf32>
    %16 = arith.truncf %15 : vector<8x128xf32> to vector<8x128xbf16>
    %c0_9 = arith.constant 0 : index
    %c0_10 = arith.constant 0 : index
    %c0_11 = arith.constant 0 : index
    %17 = vector.load %arg5[%c0_9, %c0_10, %c0_11] : memref<8x8x128xbf16, #tpu.memory_space<vmem>>, vector<1x8x128xbf16>
    %18 = vector.shape_cast %17 : vector<1x8x128xbf16> to vector<8x128xbf16>
    %19 = vector.shape_cast %16 : vector<8x128xbf16> to vector<1x8x128xbf16>
    tpu.vector_store %arg5[%c0_9, %c0_10, %c0_11], %19 {strides = array<i32>} : memref<8x8x128xbf16, #tpu.memory_space<vmem>>, vector<1x8x128xbf16>,
    %c1 = arith.constant 1 : index
    %c0_12 = arith.constant 0 : index
    %c0_13 = arith.constant 0 : index
    %20 = vector.load %arg1[%c1, %c0_12, %c0_13] : memref<8x36x128xbf16, #tpu.memory_space<vmem>>, vector<1x36x128xbf16>
    %21 = vector.shape_cast %20 : vector<1x36x128xbf16> to vector<36x128xbf16>
    %22 = arith.extf %21 : vector<36x128xbf16> to vector<36x128xf32>
    %23 = vector.broadcast %0 : vector<1x128xf32> to vector<36x128xf32>
    %24 = arith.mulf %22, %23 : vector<36x128xf32>
    %25 = vector.broadcast %1 : vector<1x128xf32> to vector<36x128xf32>
    %26 = arith.addf %24, %25 : vector<36x128xf32>
    %cst_14 = arith.constant 0.000000e+00 : f32
    %27 = vector.broadcast %cst_14 : f32 to vector<36x128xf32>
    %28 = arith.maximumf %26, %27 : vector<36x128xf32>
    %29 = vector.extract_strided_slice %28 {offsets = [0, 0], sizes = [18, 128], strides = [1, 1]} : vector<36x128xf32> to vector<18x128xf32>
    %30 = vector.extract_strided_slice %28 {offsets = [18, 0], sizes = [18, 128], strides = [1, 1]} : vector<36x128xf32> to vector<18x128xf32>
    %31 = arith.addf %29, %30 : vector<18x128xf32>
    %cst_15 = arith.constant dense<0.000000e+00> : vector<8x128xf32>
    %32 = tpu.matmul %2, %31, %cst_15 {dimension_numbers = #tpu.dot_dimension_numbers<[1], [0], [0], [1], [0, 0, 1, 1], [], []>} : vector<8x18xf32>, vector<18x128xf32>, vector<8x128xf32> -> vector<8x128xf32>
    %33 = arith.truncf %32 : vector<8x128xf32> to vector<8x128xbf16>
    %c1_16 = arith.constant 1 : index
    %c0_17 = arith.constant 0 : index
    %c0_18 = arith.constant 0 : index
    %34 = vector.load %arg5[%c1_16, %c0_17, %c0_18] : memref<8x8x128xbf16, #tpu.memory_space<vmem>>, vector<1x8x128xbf16>
    %35 = vector.shape_cast %34 : vector<1x8x128xbf16> to vector<8x128xbf16>
    %36 = vector.shape_cast %33 : vector<8x128xbf16> to vector<1x8x128xbf16>
    tpu.vector_store %arg5[%c1_16, %c0_17, %c0_18], %36 {strides = array<i32>} : memref<8x8x128xbf16, #tpu.memory_space<vmem>>, vector<1x8x128xbf16>,
    %c2 = arith.constant 2 : index
    %c0_19 = arith.constant 0 : index
    %c0_20 = arith.constant 0 : index
    %37 = vector.load %arg1[%c2, %c0_19, %c0_20] : memref<8x36x128xbf16, #tpu.memory_space<vmem>>, vector<1x36x128xbf16>
    %38 = vector.shape_cast %37 : vector<1x36x128xbf16> to vector<36x128xbf16>
    %39 = arith.extf %38 : vector<36x128xbf16> to vector<36x128xf32>
    %40 = vector.broadcast %0 : vector<1x128xf32> to vector<36x128xf32>
    %41 = arith.mulf %39, %40 : vector<36x128xf32>
    %42 = vector.broadcast %1 : vector<1x128xf32> to vector<36x128xf32>
    %43 = arith.addf %41, %42 : vector<36x128xf32>
    %cst_21 = arith.constant 0.000000e+00 : f32
    %44 = vector.broadcast %cst_21 : f32 to vector<36x128xf32>
    %45 = arith.maximumf %43, %44 : vector<36x128xf32>
    %46 = vector.extract_strided_slice %45 {offsets = [0, 0], sizes = [18, 128], strides = [1, 1]} : vector<36x128xf32> to vector<18x128xf32>
    %47 = vector.extract_strided_slice %45 {offsets = [18, 0], sizes = [18, 128], strides = [1, 1]} : vector<36x128xf32> to vector<18x128xf32>
    %48 = arith.addf %46, %47 : vector<18x128xf32>
    %cst_22 = arith.constant dense<0.000000e+00> : vector<8x128xf32>
    %49 = tpu.matmul %2, %48, %cst_22 {dimension_numbers = #tpu.dot_dimension_numbers<[1], [0], [0], [1], [0, 0, 1, 1], [], []>} : vector<8x18xf32>, vector<18x128xf32>, vector<8x128xf32> -> vector<8x128xf32>
    %50 = arith.truncf %49 : vector<8x128xf32> to vector<8x128xbf16>
    %c2_23 = arith.constant 2 : index
    %c0_24 = arith.constant 0 : index
    %c0_25 = arith.constant 0 : index
    %51 = vector.load %arg5[%c2_23, %c0_24, %c0_25] : memref<8x8x128xbf16, #tpu.memory_space<vmem>>, vector<1x8x128xbf16>
    %52 = vector.shape_cast %51 : vector<1x8x128xbf16> to vector<8x128xbf16>
    %53 = vector.shape_cast %50 : vector<8x128xbf16> to vector<1x8x128xbf16>
    tpu.vector_store %arg5[%c2_23, %c0_24, %c0_25], %53 {strides = array<i32>} : memref<8x8x128xbf16, #tpu.memory_space<vmem>>, vector<1x8x128xbf16>,
    %c3 = arith.constant 3 : index
    %c0_26 = arith.constant 0 : index
    %c0_27 = arith.constant 0 : index
    %54 = vector.load %arg1[%c3, %c0_26, %c0_27] : memref<8x36x128xbf16, #tpu.memory_space<vmem>>, vector<1x36x128xbf16>
    %55 = vector.shape_cast %54 : vector<1x36x128xbf16> to vector<36x128xbf16>
    %56 = arith.extf %55 : vector<36x128xbf16> to vector<36x128xf32>
    %57 = vector.broadcast %0 : vector<1x128xf32> to vector<36x128xf32>
    %58 = arith.mulf %56, %57 : vector<36x128xf32>
    %59 = vector.broadcast %1 : vector<1x128xf32> to vector<36x128xf32>
    %60 = arith.addf %58, %59 : vector<36x128xf32>
    %cst_28 = arith.constant 0.000000e+00 : f32
    %61 = vector.broadcast %cst_28 : f32 to vector<36x128xf32>
    %62 = arith.maximumf %60, %61 : vector<36x128xf32>
    %63 = vector.extract_strided_slice %62 {offsets = [0, 0], sizes = [18, 128], strides = [1, 1]} : vector<36x128xf32> to vector<18x128xf32>
    %64 = vector.extract_strided_slice %62 {offsets = [18, 0], sizes = [18, 128], strides = [1, 1]} : vector<36x128xf32> to vector<18x128xf32>
    %65 = arith.addf %63, %64 : vector<18x128xf32>
    %cst_29 = arith.constant dense<0.000000e+00> : vector<8x128xf32>
    %66 = tpu.matmul %2, %65, %cst_29 {dimension_numbers = #tpu.dot_dimension_numbers<[1], [0], [0], [1], [0, 0, 1, 1], [], []>} : vector<8x18xf32>, vector<18x128xf32>, vector<8x128xf32> -> vector<8x128xf32>
    %67 = arith.truncf %66 : vector<8x128xf32> to vector<8x128xbf16>
    %c3_30 = arith.constant 3 : index
    %c0_31 = arith.constant 0 : index
    %c0_32 = arith.constant 0 : index
    %68 = vector.load %arg5[%c3_30, %c0_31, %c0_32] : memref<8x8x128xbf16, #tpu.memory_space<vmem>>, vector<1x8x128xbf16>
    %69 = vector.shape_cast %68 : vector<1x8x128xbf16> to vector<8x128xbf16>
    %70 = vector.shape_cast %67 : vector<8x128xbf16> to vector<1x8x128xbf16>
    tpu.vector_store %arg5[%c3_30, %c0_31, %c0_32], %70 {strides = array<i32>} : memref<8x8x128xbf16, #tpu.memory_space<vmem>>, vector<1x8x128xbf16>,
    %c4 = arith.constant 4 : index
    %c0_33 = arith.constant 0 : index
    %c0_34 = arith.constant 0 : index
    %71 = vector.load %arg1[%c4, %c0_33, %c0_34] : memref<8x36x128xbf16, #tpu.memory_space<vmem>>, vector<1x36x128xbf16>
    %72 = vector.shape_cast %71 : vector<1x36x128xbf16> to vector<36x128xbf16>
    %73 = arith.extf %72 : vector<36x128xbf16> to vector<36x128xf32>
    %74 = vector.broadcast %0 : vector<1x128xf32> to vector<36x128xf32>
    %75 = arith.mulf %73, %74 : vector<36x128xf32>
    %76 = vector.broadcast %1 : vector<1x128xf32> to vector<36x128xf32>
    %77 = arith.addf %75, %76 : vector<36x128xf32>
    %cst_35 = arith.constant 0.000000e+00 : f32
    %78 = vector.broadcast %cst_35 : f32 to vector<36x128xf32>
    %79 = arith.maximumf %77, %78 : vector<36x128xf32>
    %80 = vector.extract_strided_slice %79 {offsets = [0, 0], sizes = [18, 128], strides = [1, 1]} : vector<36x128xf32> to vector<18x128xf32>
    %81 = vector.extract_strided_slice %79 {offsets = [18, 0], sizes = [18, 128], strides = [1, 1]} : vector<36x128xf32> to vector<18x128xf32>
    %82 = arith.addf %80, %81 : vector<18x128xf32>
    %cst_36 = arith.constant dense<0.000000e+00> : vector<8x128xf32>
    %83 = tpu.matmul %2, %82, %cst_36 {dimension_numbers = #tpu.dot_dimension_numbers<[1], [0], [0], [1], [0, 0, 1, 1], [], []>} : vector<8x18xf32>, vector<18x128xf32>, vector<8x128xf32> -> vector<8x128xf32>
    %84 = arith.truncf %83 : vector<8x128xf32> to vector<8x128xbf16>
    %c4_37 = arith.constant 4 : index
    %c0_38 = arith.constant 0 : index
    %c0_39 = arith.constant 0 : index
    %85 = vector.load %arg5[%c4_37, %c0_38, %c0_39] : memref<8x8x128xbf16, #tpu.memory_space<vmem>>, vector<1x8x128xbf16>
    %86 = vector.shape_cast %85 : vector<1x8x128xbf16> to vector<8x128xbf16>
    %87 = vector.shape_cast %84 : vector<8x128xbf16> to vector<1x8x128xbf16>
    tpu.vector_store %arg5[%c4_37, %c0_38, %c0_39], %87 {strides = array<i32>} : memref<8x8x128xbf16, #tpu.memory_space<vmem>>, vector<1x8x128xbf16>,
    %c5 = arith.constant 5 : index
    %c0_40 = arith.constant 0 : index
    %c0_41 = arith.constant 0 : index
    %88 = vector.load %arg1[%c5, %c0_40, %c0_41] : memref<8x36x128xbf16, #tpu.memory_space<vmem>>, vector<1x36x128xbf16>
    %89 = vector.shape_cast %88 : vector<1x36x128xbf16> to vector<36x128xbf16>
    %90 = arith.extf %89 : vector<36x128xbf16> to vector<36x128xf32>
    %91 = vector.broadcast %0 : vector<1x128xf32> to vector<36x128xf32>
    %92 = arith.mulf %90, %91 : vector<36x128xf32>
    %93 = vector.broadcast %1 : vector<1x128xf32> to vector<36x128xf32>
    %94 = arith.addf %92, %93 : vector<36x128xf32>
    %cst_42 = arith.constant 0.000000e+00 : f32
    %95 = vector.broadcast %cst_42 : f32 to vector<36x128xf32>
    %96 = arith.maximumf %94, %95 : vector<36x128xf32>
    %97 = vector.extract_strided_slice %96 {offsets = [0, 0], sizes = [18, 128], strides = [1, 1]} : vector<36x128xf32> to vector<18x128xf32>
    %98 = vector.extract_strided_slice %96 {offsets = [18, 0], sizes = [18, 128], strides = [1, 1]} : vector<36x128xf32> to vector<18x128xf32>
    %99 = arith.addf %97, %98 : vector<18x128xf32>
    %cst_43 = arith.constant dense<0.000000e+00> : vector<8x128xf32>
    %100 = tpu.matmul %2, %99, %cst_43 {dimension_numbers = #tpu.dot_dimension_numbers<[1], [0], [0], [1], [0, 0, 1, 1], [], []>} : vector<8x18xf32>, vector<18x128xf32>, vector<8x128xf32> -> vector<8x128xf32>
    %101 = arith.truncf %100 : vector<8x128xf32> to vector<8x128xbf16>
    %c5_44 = arith.constant 5 : index
    %c0_45 = arith.constant 0 : index
    %c0_46 = arith.constant 0 : index
    %102 = vector.load %arg5[%c5_44, %c0_45, %c0_46] : memref<8x8x128xbf16, #tpu.memory_space<vmem>>, vector<1x8x128xbf16>
    %103 = vector.shape_cast %102 : vector<1x8x128xbf16> to vector<8x128xbf16>
    %104 = vector.shape_cast %101 : vector<8x128xbf16> to vector<1x8x128xbf16>
    tpu.vector_store %arg5[%c5_44, %c0_45, %c0_46], %104 {strides = array<i32>} : memref<8x8x128xbf16, #tpu.memory_space<vmem>>, vector<1x8x128xbf16>,
    %c6 = arith.constant 6 : index
    %c0_47 = arith.constant 0 : index
    %c0_48 = arith.constant 0 : index
    %105 = vector.load %arg1[%c6, %c0_47, %c0_48] : memref<8x36x128xbf16, #tpu.memory_space<vmem>>, vector<1x36x128xbf16>
    %106 = vector.shape_cast %105 : vector<1x36x128xbf16> to vector<36x128xbf16>
    %107 = arith.extf %106 : vector<36x128xbf16> to vector<36x128xf32>
    %108 = vector.broadcast %0 : vector<1x128xf32> to vector<36x128xf32>
    %109 = arith.mulf %107, %108 : vector<36x128xf32>
    %110 = vector.broadcast %1 : vector<1x128xf32> to vector<36x128xf32>
    %111 = arith.addf %109, %110 : vector<36x128xf32>
    %cst_49 = arith.constant 0.000000e+00 : f32
    %112 = vector.broadcast %cst_49 : f32 to vector<36x128xf32>
    %113 = arith.maximumf %111, %112 : vector<36x128xf32>
    %114 = vector.extract_strided_slice %113 {offsets = [0, 0], sizes = [18, 128], strides = [1, 1]} : vector<36x128xf32> to vector<18x128xf32>
    %115 = vector.extract_strided_slice %113 {offsets = [18, 0], sizes = [18, 128], strides = [1, 1]} : vector<36x128xf32> to vector<18x128xf32>
    %116 = arith.addf %114, %115 : vector<18x128xf32>
    %cst_50 = arith.constant dense<0.000000e+00> : vector<8x128xf32>
    %117 = tpu.matmul %2, %116, %cst_50 {dimension_numbers = #tpu.dot_dimension_numbers<[1], [0], [0], [1], [0, 0, 1, 1], [], []>} : vector<8x18xf32>, vector<18x128xf32>, vector<8x128xf32> -> vector<8x128xf32>
    %118 = arith.truncf %117 : vector<8x128xf32> to vector<8x128xbf16>
    %c6_51 = arith.constant 6 : index
    %c0_52 = arith.constant 0 : index
    %c0_53 = arith.constant 0 : index
    %119 = vector.load %arg5[%c6_51, %c0_52, %c0_53] : memref<8x8x128xbf16, #tpu.memory_space<vmem>>, vector<1x8x128xbf16>
    %120 = vector.shape_cast %119 : vector<1x8x128xbf16> to vector<8x128xbf16>
    %121 = vector.shape_cast %118 : vector<8x128xbf16> to vector<1x8x128xbf16>
    tpu.vector_store %arg5[%c6_51, %c0_52, %c0_53], %121 {strides = array<i32>} : memref<8x8x128xbf16, #tpu.memory_space<vmem>>, vector<1x8x128xbf16>,
    %c7 = arith.constant 7 : index
    %c0_54 = arith.constant 0 : index
    %c0_55 = arith.constant 0 : index
    %122 = vector.load %arg1[%c7, %c0_54, %c0_55] : memref<8x36x128xbf16, #tpu.memory_space<vmem>>, vector<1x36x128xbf16>
    %123 = vector.shape_cast %122 : vector<1x36x128xbf16> to vector<36x128xbf16>
    %124 = arith.extf %123 : vector<36x128xbf16> to vector<36x128xf32>
    %125 = vector.broadcast %0 : vector<1x128xf32> to vector<36x128xf32>
    %126 = arith.mulf %124, %125 : vector<36x128xf32>
    %127 = vector.broadcast %1 : vector<1x128xf32> to vector<36x128xf32>
    %128 = arith.addf %126, %127 : vector<36x128xf32>
    %cst_56 = arith.constant 0.000000e+00 : f32
    %129 = vector.broadcast %cst_56 : f32 to vector<36x128xf32>
    %130 = arith.maximumf %128, %129 : vector<36x128xf32>
    %131 = vector.extract_strided_slice %130 {offsets = [0, 0], sizes = [18, 128], strides = [1, 1]} : vector<36x128xf32> to vector<18x128xf32>
    %132 = vector.extract_strided_slice %130 {offsets = [18, 0], sizes = [18, 128], strides = [1, 1]} : vector<36x128xf32> to vector<18x128xf32>
    %133 = arith.addf %131, %132 : vector<18x128xf32>
    %cst_57 = arith.constant dense<0.000000e+00> : vector<8x128xf32>
    %134 = tpu.matmul %2, %133, %cst_57 {dimension_numbers = #tpu.dot_dimension_numbers<[1], [0], [0], [1], [0, 0, 1, 1], [], []>} : vector<8x18xf32>, vector<18x128xf32>, vector<8x128xf32> -> vector<8x128xf32>
    %135 = arith.truncf %134 : vector<8x128xf32> to vector<8x128xbf16>
    %c7_58 = arith.constant 7 : index
    %c0_59 = arith.constant 0 : index
    %c0_60 = arith.constant 0 : index
    %136 = vector.load %arg5[%c7_58, %c0_59, %c0_60] : memref<8x8x128xbf16, #tpu.memory_space<vmem>>, vector<1x8x128xbf16>
    %137 = vector.shape_cast %136 : vector<1x8x128xbf16> to vector<8x128xbf16>
    %138 = vector.shape_cast %135 : vector<8x128xbf16> to vector<1x8x128xbf16>
    tpu.vector_store %arg5[%c7_58, %c0_59, %c0_60], %138 {strides = array<i32>} : memref<8x8x128xbf16, #tpu.memory_space<vmem>>, vector<1x8x128xbf16>,
    return
  }
  func.func @transform_0(%arg0: i32) -> (i32, i32, i32) {
    %c0_i32 = arith.constant 0 : i32
    %c0_i32_0 = arith.constant 0 : i32
    %c0_i32_1 = arith.constant 0 : i32
    return %arg0, %c0_i32, %c0_i32_0 : i32, i32, i32
  }
  func.func @transform_1(%arg0: i32) -> (i32, i32) {
    %c0_i32 = arith.constant 0 : i32
    %c0_i32_0 = arith.constant 0 : i32
    %c0_i32_1 = arith.constant 0 : i32
    return %c0_i32, %c0_i32_0 : i32, i32
  }
  func.func @transform_2(%arg0: i32) -> (i32, i32) {
    %c0_i32 = arith.constant 0 : i32
    %c0_i32_0 = arith.constant 0 : i32
    %c0_i32_1 = arith.constant 0 : i32
    return %c0_i32, %c0_i32_0 : i32, i32
  }
  func.func @transform_3(%arg0: i32) -> (i32, i32) {
    %c0_i32 = arith.constant 0 : i32
    %c0_i32_0 = arith.constant 0 : i32
    %c0_i32_1 = arith.constant 0 : i32
    return %c0_i32, %c0_i32_0 : i32, i32
  }
  func.func @transform_4(%arg0: i32) -> (i32, i32, i32) {
    %c0_i32 = arith.constant 0 : i32
    %c0_i32_0 = arith.constant 0 : i32
    %c0_i32_1 = arith.constant 0 : i32
    return %arg0, %c0_i32, %c0_i32_0 : i32, i32, i32
  }
}

</mosaic_0001>

<bundles_post_ra>
// kernel: down_block2d.3
= control target key start
LH: loop header
LB: loop body
LE: loop exit
PB: predicated region body
PF: predicated region fallthrough
CT: control target
= control target key end

     0   :  { %s973_s15 = smov 0   ;;  %s1205_s0 = inlined_call_operand.vmem [shape: bf16[16,36,128], index: 0, kind: input, shape index: {}]   ;;  %s1206_s1 = inlined_call_operand.vmem [shape: f32[1,128], index: 1, kind: input, shape index: {}]   ;;  %s1207_s2 = inlined_call_operand.vmem [shape: f32[1,128], index: 2, kind: input, shape index: {}]   ;;  %s1208_s3 = inlined_call_operand.vmem [shape: f32[8,18], index: 3, kind: input, shape index: {}]   ;;  %s1209_s4 = inlined_call_operand.vmem [shape: bf16[16,8,128], index: 4, kind: output, shape index: {}]  }
   0x1 LB: > { %s801_s16 = sadd.s32 4294967295, %s946_s15   ;;  %p805_p0 = scmp.ge.s32.totalorder %s946_s15, 1  ;;  %s946_s15 = sphi %s973_s15, %s14_s15  }
   0x2   : > { %p164_p1 = scmp.lt.s32.totalorder %s946_s15, 3 }
   0x4   : > { %p165_p2 = pnand %p805_p0, %p164_p1 }
   0x5   : > { %s806_s17 = sshll.u32 (!%p165_p2), %s801_s16, 3 }
   0x6   : > { %168 = sbr.rel (%p165_p2) target bundleno = 207 (0xcf), region = 36  ;;  %p192_p3 = scmp.lt.s32.totalorder (!%p165_p2), %s806_s17, 15 }
   0xb   : > { %s1211_s17 = smov (!%p192_p3, %s806_s17), 15  ;;  %v992_v0 = vld [vmem:[%s1206_s1] ss:$0 sm:$0xff]  ;;  %vm241_vm0 = vcmask 1045504   ;;  %vm257_vm1 = vcmask 1041408   ;;  %vm253_vm2 = vcmask 146432  }
   0xc   : > { %s929_s18 = smul.u32 20, %s1211_s17  ;;  %v997_v1 = vld [vmem:[%s1207_s2] ss:$0 sm:$0xff]  ;;  %s809_s28 = sshll.u32 %s1211_s17, 2 }
   0xd   : > { %s202_s5 = scalar_lea.vmem %s1209_s4, %s809_s28 }
   0xe   : > { %s987_s21 = scalar_lea.vmem %s1205_s0, %s929_s18 }
   0xf   : > { %v921_v2 = vld [vmem:[%s987_s21 + $0x30] sm:$0xff]   ;;  %v824_v3 = vld [vmem:[%s987_s21 + $0x38] sm:$0x3]  ;;  %v922_v4 = vld [vmem:[%s987_s21 + $0x40] sm:$0xff]  }
  0x10   : > { %v888_v5 = vunpack.c.l.bf16 %v921_v2  ;;  %v889_v6 = vunpack.c.h.bf16 %v921_v2  ;;  %v359_v7 = vunpack.c.l.bf16 %v824_v3  ;;  %v893_v8 = vunpack.c.h.bf16 %v922_v4  ;;  %v832_v9 = vld [vmem:[%s987_s21 + $0x4c] sm:$0x3]  ;;  %v831_v11 = vld [vmem:[%s987_s21 + $0x48] sm:$0xf]  ;;  %v828_v36 = vld [vmem:[%s987_s21 + $0x3c] sm:$0xf] }
  0x11   : > { %v920_v10 = vld [vmem:[%s987_s21 + $0x28] sm:$0xff]   ;;  %v425_v12 = vunpack.c.l.bf16 %v832_v9  ;;  %v892_v14 = vunpack.c.l.bf16 %v922_v4  ;;  %v424_v15 = vunpack.c.l.bf16 %v831_v11  ;;  %v1023_v41 = vld [vmem:[%s987_s21 + $0x80] sm:$0xff]   ;;  %v421_v49 = vunpack.c.l.bf16 %v828_v36  ;;  %v1030_v55 = vld [vmem:[%s987_s21 + $0x90] sm:$0xff]  }
  0x12   : > { %v885_v13 = vunpack.c.h.bf16 %v920_v10  ;;  %v362_v16 = vmul.f32 %v992_v0, %v888_v5  ;;  %v364_v17 = vmul.f32 %v992_v0, %v359_v7  ;;  %v428_v18 = vmul.f32 %v992_v0, %v893_v8  ;;  %v856_v50 = vld [vmem:[%s987_s21 + $0x88] sm:$0x3]  ;;  %v864_v56 = vld [vmem:[%s987_s21 + $0x9c] sm:$0x3]  ;;  %v211_v8 = vld [vmem:[%s987_s21 + $0x10] sm:$0x3] }
  0x13   : > { %v363_v19 = vmul.f32 %v992_v0, %v889_v6  ;;  %v430_v20 = vmul.f32 %v992_v0, %v425_v12  ;;  %v427_v22 = vmul.f32 %v992_v0, %v892_v14  ;;  %v429_v23 = vmul.f32 %v992_v0, %v424_v15  ;;  %v918_v61 = vld [vmem:[%s987_s21 + $0x8] sm:$0xff]  }
  0x14   : > { %v361_v21 = vmul.f32 %v992_v0, %v885_v13  ;;  %v367_v24 = vadd.f32 %v997_v1, %v362_v16  ;;  %v369_v25 = vadd.f32 %v997_v1, %v364_v17  ;;  %v433_v26 = vadd.f32 %v997_v1, %v428_v18 }
  0x15   : > { %v368_v27 = vadd.f32 %v997_v1, %v363_v19  ;;  %v435_v28 = vadd.f32 %v997_v1, %v430_v20  ;;  %v432_v30 = vadd.f32 %v997_v1, %v427_v22  ;;  %v434_v31 = vadd.f32 %v997_v1, %v429_v23  ;;  %v816_v22 = vld [vmem:[%s987_s21 + $0x24] sm:$0x3] }
  0x16   : > { %v366_v29 = vadd.f32 %v997_v1, %v361_v21  ;;  %v372_v32 = vmax.f32 %v367_v24, 0.0  ;;  %v374_v33 = vmax.f32 %v369_v25, 0.0  ;;  %v438_v34 = vmax.f32 %v433_v26, 0.0  ;;  %v919_v21 = vld [vmem:[%s987_s21 + $0x18] sm:$0xff]   ;;  %v1058_v24 = vld [vmem:[%s1208_s3] sm:$0xff] }
  0x17   : > { %v373_v35 = vmax.f32 %v368_v27, 0.0  ;;  %v440_v37 = vmax.f32 %v435_v28, 0.0  ;;  %v437_v39 = vmax.f32 %v432_v30, 0.0  ;;  %v439_v40 = vmax.f32 %v434_v31, 0.0  ;;  %v1066_v28 = vld [vmem:[%s987_s21] sm:$0xff]  }
  0x18   : > { %v371_v38 = vmax.f32 %v366_v29, 0.0  ;;  %v378_v42 = vrot.slane %v372_v32, 2  ;;  %v381_v43 = vrot.slane %v374_v33, 2  ;;  %v444_v44 = vrot.slane %v438_v34, 2 }
  0x19   : > { %v379_v45 = vrot.slane %v373_v35, 2  ;;  %v447_v46 = vrot.slane %v440_v37, 2  ;;  %v445_v47 = vrot.slane %v439_v40, 2  ;;  %v884_v48 = vunpack.c.l.bf16 %v920_v10 }
  0x1a   : > { %v388_v51 = vadd.f32 %v381_v43, %v372_v32  ;;  %v912_v54 = vunpack.c.l.bf16 %v1023_v41  ;;  %v426_v63 = vmul.f32 %v992_v0, %v421_v49  ;;  %v623_v3 = vunpack.c.l.bf16 %v856_v50 }
  0x1b   : > { %v382_v52 = vsel %vm241_vm0, %v379_v45, %v381_v43  ;;  %v380_v53 = vsel %vm241_vm0, %v378_v42, %v379_v45  ;;  %v454_v57 = vadd.f32 %v447_v46, %v438_v34  ;;  %v448_v59 = vsel %vm241_vm0, %v445_v47, %v447_v46  ;;  %v815_v46 = vld [vmem:[%s987_s21 + $0x20] sm:$0xf] }
  0x1c   : > { %v387_v58 = vadd.f32 %v382_v52, %v371_v38  ;;  %v360_v60 = vmul.f32 %v992_v0, %v884_v48  ;;  %825 = vmatpush.msk.msra.mxu2 %vm257_vm1, %v388_v51  ;;  %v453_v62 = vadd.f32 %v448_v59, %v437_v39  ;;  %v446_v2 = vsel %vm241_vm0, %v444_v44, %v445_v47  ;;  %v1090_v51 = vld [vmem:[%s987_s21 + $0x78] sm:$0xff]  }
  0x1d   : > { %833 = vmatpush.msk.msra.mxu3 %vm257_vm1, %v454_v57  ;;  %v626_v5 = vmul.f32 %v992_v0, %v912_v54  ;;  %v917_v6 = vunpack.c.h.bf16 %v1030_v55  ;;  %v689_v7 = vunpack.c.l.bf16 %v864_v56  ;;  %v431_v9 = vadd.f32 %v997_v1, %v426_v63 }
  0x1e   : > { %v365_v4 = vadd.f32 %v997_v1, %v360_v60  ;;  %406 = vmatpush.msra.mxu2 %v387_v58  ;;  %v628_v10 = vmul.f32 %v992_v0, %v623_v3  ;;  %v876_v11 = vunpack.c.l.bf16 %v918_v61  ;;  %v877_v12 = vunpack.c.h.bf16 %v918_v61 }
  0x1f   : > { %472 = vmatpush.msra.mxu3 %v453_v62  ;;  %v1047_v14 = vadd.f32 %v997_v1, %v626_v5  ;;  %v692_v15 = vmul.f32 %v992_v0, %v917_v6  ;;  %v694_v16 = vmul.f32 %v992_v0, %v689_v7  ;;  %v436_v17 = vmax.f32 %v431_v9, 0.0  ;;  %v863_v7 = vld [vmem:[%s987_s21 + $0x98] sm:$0xf] }
  0x20   : > { %v370_v13 = vmax.f32 %v365_v4, 0.0  ;;  %v633_v18 = vadd.f32 %v997_v1, %v628_v10  ;;  %v216_v19 = vunpack.c.l.bf16 %v211_v8  ;;  %v222_v20 = vmul.f32 %v992_v0, %v876_v11 }
  0x21   : > { %v636_v25 = vmax.f32 %v1047_v14, 0.0  ;;  %v1062_v26 = vadd.f32 %v997_v1, %v692_v15  ;;  %v699_v27 = vadd.f32 %v997_v1, %v694_v16  ;;  %v452_v29 = vadd.f32 %v446_v2, %v436_v17 }
  0x22   : > { %v386_v23 = vadd.f32 %v380_v53, %v370_v13  ;;  %v638_v30 = vmax.f32 %v633_v18, 0.0  ;;  %v224_v31 = vmul.f32 %v992_v0, %v216_v19  ;;  %v230_v32 = vadd.f32 %v997_v1, %v222_v20 }
  0x23   : > { %v702_v33 = vmax.f32 %v1062_v26, 0.0  ;;  %v704_v34 = vmax.f32 %v699_v27, 0.0  ;;  %v881_v35 = vunpack.c.h.bf16 %v919_v21  ;;  %v293_v36 = vunpack.c.l.bf16 %v816_v22  ;;  %473 = vmatpush.msra.mxu3 %v452_v29 }
  0x24   : > { %407 = vmatpush.msra.mxu2 %v386_v23  ;;  %v1073_v37 = vrot.slane %v638_v30, 2  ;;  %v232_v38 = vadd.f32 %v997_v1, %v224_v31  ;;  %v235_v39 = vmax.f32 %v230_v32, 0.0  ;;  %v873_v40 = vunpack.c.h.bf16 %v1066_v28  ;;  %834 = vmatmul.msk.f32.vlgmr.msra.gmra.mxu3 %vm253_vm2, %v1058_v24  ;;  %v1121_v32 = vld [vmem:[%s987_s21 + $0x58] sm:$0xff]  }
  0x25   : > { %826 = vmatmul.msk.f32.vlgmr.msra.gmra.mxu2 %vm253_vm2, %v1058_v24  ;;  %v1079_v42 = vrot.slane %v704_v34, 2  ;;  %v296_v43 = vmul.f32 %v992_v0, %v881_v35  ;;  %v298_v44 = vmul.f32 %v992_v0, %v293_v36  ;;  %v223_v45 = vmul.f32 %v992_v0, %v877_v12 }
  0x26   : > { %v652_v47 = vadd.f32 %v1073_v37, %v636_v25  ;;  %v237_v48 = vmax.f32 %v232_v38, 0.0  ;;  %v242_v49 = vrot.slane %v235_v39, 2  ;;  %v221_v50 = vmul.f32 %v992_v0, %v873_v40 }
  0x27   : > { %v718_v52 = vadd.f32 %v1079_v42, %v702_v33  ;;  %v301_v53 = vadd.f32 %v997_v1, %v296_v43  ;;  %v303_v54 = vadd.f32 %v997_v1, %v298_v44  ;;  %v231_v56 = vadd.f32 %v997_v1, %v223_v45  ;;  %v840_v45 = vld [vmem:[%s987_s21 + $0x60] sm:$0x3] }
  0x28   : > { %857 = vmatpush.msk.msrb.mxu2 %vm257_vm1, %v652_v47  ;;  %v245_v57 = vrot.slane %v237_v48, 2  ;;  %v229_v58 = vadd.f32 %v997_v1, %v221_v50  ;;  %v880_v59 = vunpack.c.l.bf16 %v919_v21  ;;  %v292_v60 = vunpack.c.l.bf16 %v815_v46  ;;  %v812_v21 = vld [vmem:[%s987_s21 + $0x14] sm:$0xf]  ;;  %v1133_v50 = vld [vmem:[%s987_s21 + $0x68] sm:$0xff]  }
  0x29   : > { %865 = vmatpush.msk.msrb.mxu3 %vm257_vm1, %v718_v52  ;;  %v306_v61 = vmax.f32 %v301_v53, 0.0  ;;  %v308_v62 = vmax.f32 %v303_v54, 0.0  ;;  %v236_v63 = vmax.f32 %v231_v56, 0.0  ;;  %v909_v2 = vunpack.c.h.bf16 %v1090_v51 }
  0x2a   : > { %v252_v3 = vadd.f32 %v245_v57, %v235_v39  ;;  %v234_v4 = vmax.f32 %v229_v58, 0.0  ;;  %v295_v5 = vmul.f32 %v992_v0, %v880_v59  ;;  %v297_v6 = vmul.f32 %v992_v0, %v292_v60 }
  0x2b   : > { %v312_v8 = vrot.slane %v306_v61, 2  ;;  %v315_v9 = vrot.slane %v308_v62, 2  ;;  %v243_v10 = vrot.slane %v236_v63, 2  ;;  %v913_v11 = vunpack.c.h.bf16 %v1023_v41 }
  0x2c   : > { %810 = vmatpush.msk.msra.mxu0 %vm257_vm1, %v252_v3  ;;  %v300_v12 = vadd.f32 %v997_v1, %v295_v5  ;;  %v302_v13 = vadd.f32 %v997_v1, %v297_v6  ;;  %v625_v15 = vmul.f32 %v992_v0, %v909_v2  ;;  %v916_v16 = vunpack.c.l.bf16 %v1030_v55 }
  0x2d   : > { %v322_v17 = vadd.f32 %v315_v9, %v306_v61  ;;  %v246_v18 = vsel %vm241_vm0, %v243_v10, %v245_v57  ;;  %v627_v19 = vmul.f32 %v992_v0, %v913_v11  ;;  %v688_v20 = vunpack.c.l.bf16 %v863_v7 }
  0x2e   : > { %v251_v22 = vadd.f32 %v246_v18, %v234_v4  ;;  %v305_v41 = vmax.f32 %v300_v12, 0.0  ;;  %v307_v23 = vmax.f32 %v302_v13, 0.0  ;;  %v630_v27 = vadd.f32 %v997_v1, %v625_v15 }
  0x2f   : > { %817 = vmatpush.msk.msra.mxu1 %vm257_vm1, %v322_v17  ;;  %v632_v29 = vadd.f32 %v997_v1, %v627_v19  ;;  %v691_v30 = vmul.f32 %v992_v0, %v916_v16  ;;  %v693_v55 = vmul.f32 %v992_v0, %v688_v20  ;;  %v872_v31 = vunpack.c.l.bf16 %v1066_v28  ;;  %v923_v16 = vld [vmem:[%s987_s21 + $0x50] sm:$0xff]  }
  0x30   : > { %275 = vmatpush.msra.mxu0 %v251_v22  ;;  %v313_v34 = vrot.slane %v307_v23, 2  ;;  %v635_v35 = vmax.f32 %v630_v27, 0.0  ;;  %v244_v36 = vsel %vm241_vm0, %v242_v49, %v243_v10  ;;  %v289_v38 = vunpack.c.l.bf16 %v812_v21  ;;  %v848_v49 = vld [vmem:[%s987_s21 + $0x74] sm:$0x3] }
  0x31   : > { %v637_v39 = vmax.f32 %v632_v29, 0.0  ;;  %v696_v40 = vadd.f32 %v997_v1, %v691_v30  ;;  %v698_v43 = vadd.f32 %v997_v1, %v693_v55  ;;  %v220_v44 = vmul.f32 %v992_v0, %v872_v31 }
  0x32   : > { %v316_v28 = vsel %vm241_vm0, %v313_v34, %v315_v9  ;;  %v294_v46 = vmul.f32 %v992_v0, %v289_v38  ;;  %v314_v47 = vsel %vm241_vm0, %v312_v8, %v313_v34  ;;  %v900_v48 = vunpack.c.l.bf16 %v1121_v32 }
  0x33   : > { %v321_v52 = vadd.f32 %v316_v28, %v305_v41  ;;  %v643_v53 = vrot.slane %v637_v39, 2  ;;  %v701_v54 = vmax.f32 %v696_v40, 0.0  ;;  %v703_v56 = vmax.f32 %v698_v43, 0.0 }
  0x34   : > { %v228_v57 = vadd.f32 %v997_v1, %v220_v44  ;;  %v299_v58 = vadd.f32 %v997_v1, %v294_v46  ;;  %v491_v59 = vunpack.c.l.bf16 %v840_v45  ;;  %v494_v60 = vmul.f32 %v992_v0, %v900_v48 }
  0x35   : > { %340 = vmatpush.msra.mxu1 %v321_v52  ;;  %v646_v61 = vsel %vm241_vm0, %v643_v53, %v1073_v37  ;;  %v709_v62 = vrot.slane %v703_v56, 2  ;;  %v905_v63 = vunpack.c.h.bf16 %v1133_v50  ;;  %v557_v2 = vunpack.c.l.bf16 %v848_v49  ;;  %v860_v37 = vld [vmem:[%s987_s21 + $0x8c] sm:$0xf]  ;;  %v844_v49 = vld [vmem:[%s987_s21 + $0x64] sm:$0xf] }
  0x36   : > { %v651_v3 = vadd.f32 %v646_v61, %v635_v35  ;;  %v233_v4 = vmax.f32 %v228_v57, 0.0  ;;  %v304_v5 = vmax.f32 %v299_v58, 0.0  ;;  %v496_v6 = vmul.f32 %v992_v0, %v491_v59 }
  0x37   : > { %v712_v7 = vsel %vm241_vm0, %v709_v62, %v1079_v42  ;;  %v499_v8 = vadd.f32 %v997_v1, %v494_v60  ;;  %v560_v9 = vmul.f32 %v992_v0, %v905_v63  ;;  %v562_v10 = vmul.f32 %v992_v0, %v557_v2 }
  0x38   : > { %670 = vmatpush.msrb.mxu2 %v651_v3  ;;  %v717_v11 = vadd.f32 %v712_v7, %v701_v54  ;;  %v250_v12 = vadd.f32 %v244_v36, %v233_v4  ;;  %v320_v13 = vadd.f32 %v314_v47, %v304_v5  ;;  %v501_v15 = vadd.f32 %v997_v1, %v496_v6 }
  0x39   : > { %v504_v17 = vmax.f32 %v499_v8, 0.0  ;;  %v565_v18 = vadd.f32 %v997_v1, %v560_v9  ;;  %v567_v42 = vadd.f32 %v997_v1, %v562_v10  ;;  %v908_v19 = vunpack.c.l.bf16 %v1090_v51  ;;  %v847_v51 = vld [vmem:[%s987_s21 + $0x70] sm:$0xf] }
  0x3a   : > { %736 = vmatpush.msrb.mxu3 %v717_v11  ;;  %276 = vmatpush.msra.mxu0 %v250_v12  ;;  %v506_v20 = vmax.f32 %v501_v15, 0.0  ;;  %v642_v21 = vrot.slane %v636_v25, 2  ;;  %v685_v22 = vunpack.c.l.bf16 %v860_v37  ;;  %v708_v41 = vrot.slane %v702_v33, 2 }
  0x3b   : > { %341 = vmatpush.msra.mxu1 %v320_v13  ;;  %811 = vmatmul.msk.f32.vlgmr.msra.gmra.mxu0 %vm253_vm2, %v1058_v24  ;;  %v570_v23 = vmax.f32 %v565_v18, 0.0  ;;  %v572_v27 = vmax.f32 %v567_v42, 0.0  ;;  %v624_v29 = vmul.f32 %v992_v0, %v908_v19  ;;  %v897_v30 = vunpack.c.h.bf16 %v923_v16 }
  0x3c   : > { %818 = vmatmul.msk.f32.vlgmr.msra.gmra.mxu1 %vm253_vm2, %v1058_v24  ;;  %v513_v55 = vrot.slane %v506_v20, 2  ;;  %v644_v14 = vsel %vm241_vm0, %v642_v21, %v643_v53  ;;  %v690_v25 = vmul.f32 %v992_v0, %v685_v22  ;;  %v710_v26 = vsel %vm241_vm0, %v708_v41, %v709_v62 }
  0x3d   : > { %v579_v33 = vrot.slane %v572_v27, 2  ;;  %v629_v31 = vadd.f32 %v997_v1, %v624_v29  ;;  %v901_v34 = vunpack.c.h.bf16 %v1121_v32  ;;  %v493_v35 = vmul.f32 %v992_v0, %v897_v30 }
  0x3e   : > { %v520_v36 = vadd.f32 %v513_v55, %v504_v17  ;;  %v695_v38 = vadd.f32 %v997_v1, %v690_v25  ;;  %v904_v39 = vunpack.c.l.bf16 %v1133_v50  ;;  %v556_v40 = vunpack.c.l.bf16 %v847_v51 }
  0x3f   : > { %v586_v43 = vadd.f32 %v579_v33, %v570_v23  ;;  %v634_v44 = vmax.f32 %v629_v31, 0.0  ;;  %v495_v45 = vmul.f32 %v992_v0, %v901_v34  ;;  %v498_v28 = vadd.f32 %v997_v1, %v493_v35 }
  0x40   : > { %841 = vmatpush.msk.msrb.mxu0 %vm257_vm1, %v520_v36  ;;  %v700_v46 = vmax.f32 %v695_v38, 0.0  ;;  %v559_v47 = vmul.f32 %v992_v0, %v904_v39  ;;  %v561_v32 = vmul.f32 %v992_v0, %v556_v40  ;;  %v896_v48 = vunpack.c.l.bf16 %v923_v16 }
  0x41   : > { %849 = vmatpush.msk.msrb.mxu1 %vm257_vm1, %v586_v43  ;;  %v650_v52 = vadd.f32 %v644_v14, %v634_v44  ;;  %v500_v50 = vadd.f32 %v997_v1, %v495_v45  ;;  %v510_v59 = vrot.slane %v504_v17, 2  ;;  %v553_v60 = vunpack.c.l.bf16 %v844_v49 }
  0x42   : > { %v716_v53 = vadd.f32 %v710_v26, %v700_v46  ;;  %v564_v54 = vadd.f32 %v997_v1, %v559_v47  ;;  %v566_v56 = vadd.f32 %v997_v1, %v561_v32  ;;  %v492_v57 = vmul.f32 %v992_v0, %v896_v48 }
  0x43   : > { %671 = vmatpush.msrb.mxu2 %v650_v52  ;;  %v505_v58 = vmax.f32 %v500_v50, 0.0  ;;  %v503_v61 = vmax.f32 %v498_v28, 0.0  ;;  %v576_v2 = vrot.slane %v570_v23, 2  ;;  %v558_v5 = vmul.f32 %v992_v0, %v553_v60 }
  0x44   : > { %737 = vmatpush.msrb.mxu3 %v716_v53  ;;  %858 = vmatmul.msk.f32.vlgmr.msrb.gmra.mxu2 %vm253_vm2, %v1058_v24  ;;  %v571_v62 = vmax.f32 %v566_v56, 0.0  ;;  %v497_v63 = vadd.f32 %v997_v1, %v492_v57  ;;  %v569_v4 = vmax.f32 %v564_v54, 0.0 }
  0x45   : > { %866 = vmatmul.msk.f32.vlgmr.msrb.gmra.mxu3 %vm253_vm2, %v1058_v24  ;;  %v511_v3 = vrot.slane %v505_v58, 2  ;;  %v563_v10 = vadd.f32 %v997_v1, %v558_v5 }
  0x46   : > { %v577_v6 = vrot.slane %v571_v62, 2  ;;  %v502_v7 = vmax.f32 %v497_v63, 0.0 }
  0x47   : > { %v514_v8 = vsel %vm241_vm0, %v511_v3, %v513_v55  ;;  %v512_v9 = vsel %vm241_vm0, %v510_v59, %v511_v3  ;;  %v568_v16 = vmax.f32 %v563_v10, 0.0 }
  0x48   : > { %v519_v37 = vadd.f32 %v514_v8, %v503_v61  ;;  %v580_v11 = vsel %vm241_vm0, %v577_v6, %v579_v33  ;;  %v518_v12 = vadd.f32 %v512_v9, %v502_v7  ;;  %v578_v13 = vsel %vm241_vm0, %v576_v2, %v577_v6 }
  0x49   : > { %v585_v15 = vadd.f32 %v580_v11, %v569_v4  ;;  %v584_v0 = vadd.f32 %v578_v13, %v568_v16 }
  0x4a   : > { %538 = vmatpush.msrb.mxu0 %v519_v37 }
  0x4b   : > { %604 = vmatpush.msrb.mxu1 %v585_v15 }
  0x4c   : > { %539 = vmatpush.msrb.mxu0 %v518_v12 }
  0x4d   : > { %605 = vmatpush.msrb.mxu1 %v584_v0  ;;  %842 = vmatmul.msk.f32.vlgmr.msrb.gmra.mxu0 %vm253_vm2, %v1058_v24 }
  0x4e   : > { %850 = vmatmul.msk.f32.vlgmr.msrb.gmra.mxu1 %vm253_vm2, %v1058_v24 }
  0xa7   : > { %v475_v18 = vpop.f32.mrf.mxu3 }
  0xa8   : > { %v409_v1 = vpop.f32.mrf.mxu2  ;;  %v478_v42 = vpack.c.bf16 %v475_v18, %v475_v18 }
  0xa9   : > { %v412_v17 = vpack.c.bf16 %v409_v1, %v409_v1 }
  0xaa   : > { %835 = vst [vmem:[%s202_s5 + $0xc] sm:$0xf] %v478_v42 }
  0xab   : > { %827 = vst [vmem:[%s202_s5 + $0x8] sm:$0xf] %v412_v17 }
  0xb8   : > { %v278_v19 = vpop.f32.mrf.mxu0 }
  0xb9   : > { %v281_v20 = vpack.c.bf16 %v278_v19, %v278_v19  ;;  %v343_v21 = vpop.f32.mrf.mxu1 }
  0xba   : > { %v346_v22 = vpack.c.bf16 %v343_v21, %v343_v21 }
  0xbb   : > { %282 = vst [vmem:[%s202_s5] sm:$0xf] %v281_v20 }
  0xbc   : > { %819 = vst [vmem:[%s202_s5 + $0x4] sm:$0xf] %v346_v22 }
  0xc7   : > { %v673_v41 = vpop.f32.mrf.mxu2 }
  0xc8   : > { %v676_v23 = vpack.c.bf16 %v673_v41, %v673_v41  ;;  %v739_v24 = vpop.f32.mrf.mxu3 }
  0xc9   : > { %v742_v27 = vpack.c.bf16 %v739_v24, %v739_v24 }
  0xca   : > { %v541_v29 = vpop.f32.mrf.mxu0  ;;  %859 = vst [vmem:[%s202_s5 + $0x18] sm:$0xf] %v676_v23 }
  0xcb   : > { %v544_v30 = vpack.c.bf16 %v541_v29, %v541_v29  ;;  %v607_v51 = vpop.f32.mrf.mxu1  ;;  %867 = vst [vmem:[%s202_s5 + $0x1c] sm:$0xf] %v742_v27 }
  0xcc   : > { %v610_v55 = vpack.c.bf16 %v607_v51, %v607_v51 }
  0xcd   : > { %843 = vst [vmem:[%s202_s5 + $0x10] sm:$0xf] %v544_v30 }
  0xce   : > { %851 = vst [vmem:[%s202_s5 + $0x14] sm:$0xf] %v610_v55 }
  0xcf PF: > { %s14_s15 = sadd.s32 1, %s946_s15  }
  0xd0   : > { %p11_p4 = scmp.ge.s32.totalorder %s14_s15, 4  }
  0xd2   :  { %13 = sbr.rel (!%p11_p4) target bundleno = 1 (0x1), region = 80 }

// kernel: down_block2d.2
= control target key start
LH: loop header
LB: loop body
LE: loop exit
PB: predicated region body
PF: predicated region fallthrough
CT: control target
= control target key end

     0   :  { %s4162_s18 = smov 0   ;;  %s5398_s0 = inlined_call_operand.vmem [shape: bf16[2,328,4], index: 0, kind: input, shape index: {}]   ;;  %s5399_s1 = inlined_call_operand.vmem [shape: bf16[9,4,128], index: 1, kind: input, shape index: {}]   ;;  %s5400_s2 = inlined_call_operand.vmem [shape: f32[288,1], index: 2, kind: input, shape index: {}]   ;;  %s5401_s3 = inlined_call_operand.vmem [shape: bf16[2,288,128], index: 3, kind: output, shape index: {0}]   ;;  %s5402_s4 = inlined_call_operand.vmem [shape: f32[2,1,128], index: 4, kind: output, shape index: {1}]   ;;  %s5403_s5 = inlined_call_operand.vmem [shape: f32[2,1,128], index: 5, kind: output, shape index: {2}]  }
   0x1 LB: > { %s3538_s19 = sadd.s32 4294967295, %s4129_s18   ;;  %p3542_p0 = scmp.ge.s32.totalorder %s4129_s18, 1  ;;  %s4129_s18 = sphi %s4162_s18, %s16_s18  }
   0x2   : > { %p192_p1 = scmp.lt.s32.totalorder %s4129_s18, 3 }
   0x4   : > { %p193_p2 = pnand %p3542_p0, %p192_p1 }
   0x6   : > { %196 = sbr.rel (%p193_p2) target bundleno = 831 (0x33f), region = 32 }
   0xb   : > { %v3545_v0 = vld [vmem:[%s5399_s1 + $0x2] sm:$0x3]  ;;  %vm580_vm0 = vcmask 1041408   ;;  %p226_p3 = scmp.lt.s32.totalorder %s3538_s19, 1  ;;  %v3650_v2 = vld [vmem:[%s5399_s1 + $0x4] sm:$0x3] }
   0xc   : > { %v582_v1 = vsel %vm580_vm0, %v3545_v0, 0  ;;  %v279_v3 = vld [vmem:[%s5399_s1] sm:$0x3]  ;;  %v920_v4 = vsel %vm580_vm0, %v3650_v2, 0  ;;  %v3756_v6 = vld [vmem:[%s5399_s1 + $0x8] sm:$0x3] }
   0xd   : > { %4086 = vmatpush.bf16.msra.mxu1 %v582_v1  ;;  %4087 = vmatpush.bf16.msra.mxu2 %v582_v1  ;;  %s5433_s19 = smov (!%p226_p3, %s3538_s19), 1  ;;  %v720_v5 = vsel %vm580_vm0, %v279_v3, 0  ;;  %v1650_v7 = vsel %vm580_vm0, %v3756_v6, 0  ;;  %vm376_vm1 = vsmask.f32 7424  ;;  %vm525_vm2 = vcmask 31744  }
   0xe   : > { %591 = vmatpush.bf16.msra.mxu0 %v582_v1  ;;  %s4089_s28 = smul.u32 164, %s5433_s19  ;;  %4088 = vmatpush.bf16.msra.mxu3 %v582_v1  ;;  %v3669_v45 = vld [vmem:[%s5399_s1 + $0x6] sm:$0x3]  ;;  %vm827_vm3 = vcmask 1046528   ;;  %vm1424_vm4 = vsmask.f32 6400  ;;  %s238_s7 = scalar_lea.vmem %s5402_s4, %s5433_s19 }
   0xf   : > { %v1281_v53 = vsel %vm580_vm0, %v3669_v45, 0  ;;  %vm2390_vm5 = vsmask.f32 5376  ;;  %vm1793_vm6 = vcmask 1045504   ;;  %vm2759_vm7 = vcmask 1044480   ;;  %s4090_s11 = smul.u32 144, %s5433_s19  ;;  %s241_s9 = scalar_lea.vmem %s5403_s5, %s5433_s19 }
  0x10   : > { %s4192_s6 = scalar_lea.vmem %s5398_s0, %s4089_s28 }
  0x11   : > { %929 = vmatpush.bf16.msrb.mxu2 %v920_v4  ;;  %729 = vmatpush.bf16.msrb.mxu1 %v720_v5  ;;  %v4195_v8 = vld [vmem:[%s4192_s6 + $0x28] sm:$0xff]  ;;  %v4198_v9 = vld [vmem:[%s4192_s6 + $0x30] sm:$0xff]  ;;  %v4204_v11 = vld [vmem:[%s4192_s6 + $0x58] sm:$0xff]  ;;  %s5043_s14 = scalar_lea.vmem %s5401_s3, %s4090_s11 }
  0x12   : > { %1659 = vmatpush.bf16.msrb.mxu0 %v1650_v7  ;;  %v4201_v10 = vld [vmem:[%s4192_s6 + $0x50] sm:$0xff]  ;;  %v4207_v12 = vld [vmem:[%s4192_s6] sm:$0xff]   ;;  %v4210_v13 = vld [vmem:[%s4192_s6 + $0x8] sm:$0xff]  ;;  %v417_v14 = vshll.u32 %v4195_v8, 16  ;;  %v421_v15 = vshrl.u32 %v4195_v8, 16  ;;  %v425_v16 = vshll.u32 %v4198_v9, 16  ;;  %1290 = vmatpush.bf16.msrb.mxu3 %v1281_v53 }
  0x13   : > { %v457_v17 = vshll.u32 %v4201_v10, 16  ;;  %v461_v18 = vshrl.u32 %v4201_v10, 16  ;;  %v465_v19 = vshll.u32 %v4204_v11, 16  ;;  %v378_v20 = vshrl.u32 %v4207_v12, 16  ;;  %v4228_v31 = vld [vmem:[%s4192_s6 + $0x78] sm:$0xff]  ;;  %v3936_v32 = vld [vmem:[%s4192_s6 + $0x80] sm:$0xff] }
  0x14   : > { %v380_v21 = vshll.u32 %v4207_v12, 16  ;;  %v4220_v22 = vrot.slane %v417_v14, 1  ;;  %v427_v23 = vrot.slane %v425_v16, 1  ;;  %v385_v25 = vshll.u32 %v4210_v13, 16  ;;  %v4237_v37 = vld [vmem:[%s4192_s6 + $0x38] sm:$0xff]  ;;  %v4241_v38 = vld [vmem:[%s4192_s6 + $0x60] sm:$0xff] }
  0x15   : > { %v4222_v24 = vrot.slane %v457_v17, 1  ;;  %v467_v26 = vrot.slane %v465_v19, 1  ;;  %v497_v39 = vshll.u32 %v4228_v31, 16  ;;  %v501_v40 = vshrl.u32 %v4228_v31, 16  ;;  %v4246_v42 = vld [vmem:[%s4192_s6 + $0x10] sm:$0xff]  ;;  %v3937_v59 = vld [vmem:[%s4192_s6 + $0x88] sm:$0xff] }
  0x16   : > { %v382_v27 = vrot.slane %v380_v21, 1  ;;  %v423_v28 = vor.u32 %v421_v15, %v4220_v22  ;;  %v387_v30 = vrot.slane %v385_v25, 1  ;;  %v505_v41 = vshll.u32 %v3936_v32, 16  ;;  %v4265_v60 = vld [vmem:[%s4192_s6 + $0x48] sm:$0xff]  ;;  %v4274_v5 = vld [vmem:[%s4192_s6 + $0x40] sm:$0xff]  ;;  %v4282_v17 = vld [vmem:[%s4192_s6 + $0x18] sm:$0xff] }
  0x17   : > { %v463_v29 = vor.u32 %v461_v18, %v4222_v24  ;;  %v4248_v43 = vrot.slane %v497_v39, 1  ;;  %v429_v46 = vshrl.u32 %v4198_v9, 16  ;;  %v433_v47 = vshll.u32 %v4237_v37, 16  ;;  %v4277_v6 = vld [vmem:[%s4192_s6 + $0x68] sm:$0xff]  ;;  %v280_v18 = vld [vmem:[%s4192_s6 + $0x90] sm:$0x1] }
  0x18   : > { %v383_v33 = vor.u32 %v382_v27, %v378_v20  ;;  %v428_v34 = vsel %vm376_vm1, %v423_v28, %v427_v23  ;;  %v507_v44 = vrot.slane %v505_v41, 1  ;;  %v469_v48 = vshrl.u32 %v4204_v11, 16  ;;  %v4291_v27 = vld [vmem:[%s4192_s6 + $0x20] sm:$0xff] }
  0x19   : > { %v468_v35 = vsel %vm376_vm1, %v463_v29, %v467_v26  ;;  %3619 = vmatmul.msk.bf16.vlgmr.msra.gmra.mxu1 %vm525_vm2, %v428_v34  ;;  %v473_v49 = vshll.u32 %v4241_v38, 16  ;;  %v503_v50 = vor.u32 %v501_v40, %v4248_v43  ;;  %v389_v51 = vshrl.u32 %v4210_v13, 16 }
  0x1a   : > { %3624 = vmatmul.msk.bf16.vlgmr.msra.gmra.mxu2 %vm525_vm2, %v468_v35  ;;  %v388_v36 = vsel %vm376_vm1, %v383_v33, %v387_v30  ;;  %v393_v52 = vshll.u32 %v4246_v42, 16  ;;  %v431_v55 = vor.u32 %v429_v46, %v427_v23  ;;  %v435_v56 = vrot.slane %v433_v47, 1 }
  0x1b   : > { %3614 = vmatmul.msk.bf16.vlgmr.msra.gmra.mxu0 %vm525_vm2, %v388_v36  ;;  %v508_v54 = vsel %vm376_vm1, %v503_v50, %v507_v44  ;;  %v471_v57 = vor.u32 %v469_v48, %v467_v26  ;;  %v475_v58 = vrot.slane %v473_v49, 1  ;;  %v391_v61 = vor.u32 %v389_v51, %v387_v30 }
  0x1c   : > { %3629 = vmatmul.msk.bf16.vlgmr.msra.gmra.mxu3 %vm525_vm2, %v508_v54  ;;  %v395_v62 = vrot.slane %v393_v52, 1  ;;  %v436_v63 = vsel %vm376_vm1, %v431_v55, %v435_v56  ;;  %v509_v1 = vshrl.u32 %v3936_v32, 16  ;;  %v513_v2 = vshll.u32 %v3937_v59, 16  ;;  %v4312_v52 = vld [vmem:[%s4192_s6 + $0x70] sm:$0xff] }
  0x1d   : > { %v476_v0 = vsel %vm376_vm1, %v471_v57, %v475_v58  ;;  %v449_v3 = vshll.u32 %v4265_v60, 16  ;;  %v453_v16 = vshrl.u32 %v4265_v60, 16  ;;  %v437_v20 = vshrl.u32 %v4237_v37, 16 }
  0x1e   : > { %v396_v4 = vsel %vm376_vm1, %v391_v61, %v395_v62  ;;  %v511_v7 = vor.u32 %v509_v1, %v507_v44  ;;  %v515_v14 = vrot.slane %v513_v2, 1  ;;  %v441_v21 = vshll.u32 %v4274_v5, 16 }
  0x1f   : > { %v451_v15 = vrot.slane %v449_v3, 1  ;;  %v477_v23 = vshrl.u32 %v4241_v38, 16  ;;  %v481_v25 = vshll.u32 %v4277_v6, 16  ;;  %v356_v28 = vunpack.c.l.b16 %v280_v18 }
  0x20   : > { %v516_v26 = vsel %vm376_vm1, %v511_v7, %v515_v14  ;;  %v397_v30 = vshrl.u32 %v4246_v42, 16  ;;  %v401_v32 = vshll.u32 %v4282_v17, 16  ;;  %v439_v33 = vor.u32 %v437_v20, %v435_v56  ;;  %v3938_v7 = vld [vmem:[%s4192_s6 + $0x10] sm:$0xff] }
  0x21   : > { %v455_v19 = vor.u32 %v453_v16, %v451_v15  ;;  %v443_v34 = vrot.slane %v441_v21, 1  ;;  %v479_v35 = vor.u32 %v477_v23, %v475_v58  ;;  %v483_v36 = vrot.slane %v481_v25, 1  ;;  %v3794_v21 = vld [vmem:[%s5399_s1 + $0xc] sm:$0x3]  ;;  %v3881_v25 = vld [vmem:[%s5399_s1 + $0xe] sm:$0x3] }
  0x22   : > { %v409_v39 = vshll.u32 %v4291_v27, 16  ;;  %v4301_v40 = vpack.c.b16 %v356_v28, %v356_v28  ;;  %v399_v41 = vor.u32 %v397_v30, %v395_v62  ;;  %v403_v44 = vrot.slane %v401_v32, 1  ;;  %v1057_v62 = vld [vmem:[%s4192_s6 + $0x8] sm:$0xe]  ;;  %v3900_v32 = vld [vmem:[%s5399_s1 + $0x10] sm:$0x3] }
  0x23   : > { %v4295_v29 = vsel %vm376_vm1, %v455_v19, %v4222_v24  ;;  %v444_v24 = vsel %vm376_vm1, %v439_v33, %v443_v34  ;;  %v484_v45 = vsel %vm376_vm1, %v479_v35, %v483_v36  ;;  %v517_v47 = vshrl.u32 %v3937_v59, 16 }
  0x24   : > { %v411_v46 = vrot.slane %v409_v39, 1  ;;  %v521_v48 = vshll.u32 %v4301_v40, 16  ;;  %v413_v49 = vshrl.u32 %v4291_v27, 16  ;;  %v404_v50 = vsel %vm376_vm1, %v399_v41, %v403_v44  ;;  %v3939_v41 = vld [vmem:[%s4192_s6 + $0x18] sm:$0xff] }
  0x25   : > { %v519_v53 = vor.u32 %v517_v47, %v515_v14  ;;  %v445_v56 = vshrl.u32 %v4274_v5, 16  ;;  %v485_v57 = vshrl.u32 %v4277_v6, 16  ;;  %v489_v58 = vshll.u32 %v4312_v52, 16 }
  0x26   : > { %v415_v51 = vor.u32 %v413_v49, %v411_v46  ;;  %v523_v54 = vrot.slane %v521_v48, 1  ;;  %v405_v61 = vshrl.u32 %v4282_v17, 16  ;;  %v1133_v3 = vunpack.c.l.b16 %v1057_v62 }
  0x27   : > { %v487_v1 = vor.u32 %v485_v57, %v483_v36  ;;  %v491_v2 = vrot.slane %v489_v58, 1  ;;  %v1190_v20 = vrot.slane %v3938_v7, 1  ;;  %v2616_v28 = vsel %vm580_vm0, %v3881_v25, 0 }
  0x28   : > { %v420_v55 = vsel %vm376_vm1, %v415_v51, %v4220_v22  ;;  %v524_v59 = vsel %vm376_vm1, %v519_v53, %v523_v54  ;;  %2625 = vmatpush.bf16.msra.mxu3 %v2616_v28  ;;  %v2852_v33 = vsel %vm580_vm0, %v3900_v32, 0  ;;  %v1434_v48 = vshrl.u32 %v3938_v7, 16 }
  0x29   : > { %3620 = vmatmul.msk.bf16.gmra.mxu1 %vm525_vm2, %v436_v63  ;;  %v4323_v63 = vld [vmem:[%s4192_s6 + $0xc] sm:$0xf]  ;;  %v492_v16 = vsel %vm376_vm1, %v487_v1, %v491_v2  ;;  %2861 = vmatpush.bf16.msra.mxu0 %v2852_v33  ;;  %v1437_v49 = vshll.u32 %v3938_v7, 16  ;;  %v1443_v1 = vshrl.u32 %v3939_v41, 16  ;;  %v833_v28 = vrot.slane %v4282_v17, 1  ;;  %v3942_v33 = vld [vmem:[%s4192_s6 + $0x30] sm:$0xff] }
  0x2a   : > { %3625 = vmatmul.msk.bf16.gmra.mxu2 %vm525_vm2, %v476_v0  ;;  %v447_v0 = vor.u32 %v445_v56, %v443_v34  ;;  %v5404_v22 = vunpack.c.l.b16 %v4323_v63  ;;  %v493_v34 = vshrl.u32 %v4312_v52, 16  ;;  %v1436_v54 = vrot.slane %v1434_v48, 1 }
  0x2b   : > { %3615 = vmatmul.msk.bf16.gmra.mxu0 %vm525_vm2, %v396_v4  ;;  %v407_v4 = vor.u32 %v405_v61, %v403_v44  ;;  %v4066_v44 = vld [vmem:[%s4192_s6] sm:$0xf0]  ;;  %v1439_v56 = vrot.slane %v1437_v49, 2 }
  0x2c   : > { %3630 = vmatmul.msk.bf16.gmra.mxu3 %vm525_vm2, %v516_v26  ;;  %v452_v14 = vsel %vm376_vm1, %v447_v0, %v451_v15  ;;  %v1170_v18 = vpack.c.b16 %v5404_v22, %v1133_v3  ;;  %v2247_v15 = vsel %vm580_vm0, %v3794_v21, 0  ;;  %v3775_v26 = vld [vmem:[%s5399_s1 + $0xa] sm:$0x3]  ;;  %v495_v36 = vor.u32 %v493_v34, %v491_v2  ;;  %v3940_v61 = vld [vmem:[%s4192_s6 + $0x20] sm:$0xff] }
  0x2d   : > { %v412_v19 = vsel %vm376_vm1, %v407_v4, %v411_v46  ;;  %2256 = vmatpush.bf16.msra.mxu2 %v2247_v15  ;;  %v1886_v30 = vsel %vm580_vm0, %v3775_v26, 0  ;;  %v1440_v58 = vor.u32 %v1439_v56, %v1436_v54  ;;  %v1194_v0 = vrot.slane %v3940_v61, 1  ;;  %v3948_v22 = vld [vmem:[%s4192_s6 + $0x60] sm:$0xff] }
  0x2e   : > { %v1189_v23 = vrot.slane %v1170_v18, 1  ;;  %1895 = vmatpush.bf16.msra.mxu1 %v1886_v30  ;;  %v500_v39 = vsel %vm376_vm1, %v495_v36, %v4248_v43  ;;  %v1426_v46 = vshrl.u32 %v1170_v18, 16  ;;  %v1429_v47 = vshll.u32 %v1170_v18, 16 }
  0x2f   : > { %v1446_v2 = vshll.u32 %v3939_v41, 16  ;;  %v1445_v4 = vrot.slane %v1443_v1, 1  ;;  %v1452_v21 = vshrl.u32 %v3940_v61, 16  ;;  %v1198_v34 = vrot.slane %v3942_v33, 1  ;;  %v3944_v1 = vld [vmem:[%s4192_s6 + $0x40] sm:$0xff] }
  0x30   : > { %v1191_v35 = vsel %vm827_vm3, %v1189_v23, %v1190_v20  ;;  %v1428_v43 = vrot.slane %v1426_v46, 1  ;;  %v1431_v53 = vrot.slane %v1429_v47, 2  ;;  %v1455_v23 = vshll.u32 %v3940_v61, 16  ;;  %v3943_v47 = vld [vmem:[%s4192_s6 + $0x38] sm:$0xff] }
  0x31   : > { %v1448_v7 = vrot.slane %v1446_v2, 2  ;;  %v1454_v25 = vrot.slane %v1452_v21, 1 }
  0x32   : > { %v1432_v57 = vor.u32 %v1431_v53, %v1428_v43  ;;  %v1457_v26 = vrot.slane %v1455_v23, 2  ;;  %v1473_v43 = vshll.u32 %v3942_v33, 16  ;;  %v839_v23 = vrot.slane %v4198_v9, 1 }
  0x34   : > { %v1441_v62 = vsel %vm1424_vm4, %v1432_v57, %v1440_v58  ;;  %v1458_v30 = vor.u32 %v1457_v26, %v1454_v25  ;;  %v1475_v57 = vrot.slane %v1473_v43, 2 }
  0x39   : > { %3621 = vmatmul.msk.bf16.gmra.mxu1 %vm525_vm2, %v444_v24  ;;  %v1192_v24 = vrot.slane %v3939_v41, 1 }
  0x3a   : > { %3626 = vmatmul.msk.bf16.gmra.mxu2 %vm525_vm2, %v484_v45  ;;  %v4067_v45 = vld [vmem:[%s4192_s6] sm:$0xe] }
  0x3b   : > { %3616 = vmatmul.msk.bf16.gmra.mxu0 %vm525_vm2, %v404_v50  ;;  %v4068_v50 = vor.u32 %v4067_v45, %v4066_v44  ;;  %v1193_v51 = vsel %vm827_vm3, %v1190_v20, %v1192_v24  ;;  %v1195_v3 = vsel %vm827_vm3, %v1192_v24, %v1194_v0  ;;  %v835_v24 = vrot.slane %v4291_v27, 1 }
  0x3c   : > { %3631 = vmatmul.msk.bf16.gmra.mxu3 %vm525_vm2, %v524_v59 }
  0x49   : > { %3622 = vmatmul.msk.bf16.gmra.mxu1 %vm525_vm2, %v452_v14  ;;  %v831_v14 = vrot.slane %v4246_v42, 1 }
  0x4a   : > { %3627 = vmatmul.msk.bf16.gmra.mxu2 %vm525_vm2, %v492_v16  ;;  %v1449_v16 = vor.u32 %v1448_v7, %v1445_v4  ;;  %v1202_v4 = vrot.slane %v3944_v1, 1  ;;  %v1479_v7 = vshrl.u32 %v3943_v47, 16 }
  0x4b   : > { %3617 = vmatmul.msk.bf16.gmra.mxu0 %vm525_vm2, %v412_v19  ;;  %v834_v32 = vsel %vm827_vm3, %v831_v14, %v833_v28 }
  0x4c   : > { %3738 = vmatmul.msk.bf16.vlgmr.msrb.gmra.mxu3 %vm525_vm2, %v1191_v35  ;;  %v1450_v19 = vsel %vm1424_vm4, %v1440_v58, %v1449_v16  ;;  %v1481_v21 = vrot.slane %v1479_v7, 1 }
  0x59   : > { %3623 = vmatmul.msk.bf16.gmra.mxu1 %vm525_vm2, %v4295_v29  ;;  %v828_v29 = vrot.slane %v4068_v50, 1  ;;  %v1200_v50 = vrot.slane %v3943_v47, 1 }
  0x5a   : > { %3628 = vmatmul.msk.bf16.gmra.mxu2 %vm525_vm2, %v500_v39 }
  0x5b   : > { %3618 = vmatmul.msk.bf16.gmra.mxu0 %vm525_vm2, %v420_v55  ;;  %v829_v55 = vrot.slane %v4210_v13, 1  ;;  %v1201_v56 = vsel %vm827_vm3, %v1198_v34, %v1200_v50 }
  0x5c   : > { %3739 = vmatmul.msk.bf16.gmra.mxu3 %vm525_vm2, %v1193_v51  ;;  %v1470_v51 = vshrl.u32 %v3942_v33, 16 }
  0x5d   : > { %v830_v59 = vsel %vm827_vm3, %v828_v29, %v829_v55  ;;  %v832_v18 = vsel %vm827_vm3, %v829_v55, %v831_v14  ;;  %v1482_v14 = vshll.u32 %v3943_v47, 16  ;;  %v841_v47 = vrot.slane %v4237_v37, 1 }
  0x5e   : > { %v1472_v55 = vrot.slane %v1470_v51, 1 }
  0x60   : > { %v1476_v58 = vor.u32 %v1475_v57, %v1472_v55  ;;  %v3946_v55 = vld [vmem:[%s4192_s6 + $0x50] sm:$0xff] }
  0x69   : > { %3632 = vmatmul.msk.bf16.vlgmr.msrb.gmra.mxu1 %vm525_vm2, %v4207_v12  ;;  %v3941_v12 = vld [vmem:[%s4192_s6 + $0x28] sm:$0xff] }
  0x6a   : > { %3651 = vmatmul.msk.bf16.vlgmr.msrb.gmra.mxu2 %vm525_vm2, %v830_v59  ;;  %v1196_v20 = vrot.slane %v3941_v12, 1  ;;  %v1461_v35 = vshrl.u32 %v3941_v12, 16  ;;  %v1464_v36 = vshll.u32 %v3941_v12, 16 }
  0x6b   : > { %3757 = vmatmul.msk.bf16.vlgmr.msrb.gmra.mxu0 %vm525_vm2, %v1441_v62 }
  0x6c   : > { %3740 = vmatmul.msk.bf16.gmra.mxu3 %vm525_vm2, %v1195_v3  ;;  %v1197_v15 = vsel %vm827_vm3, %v1194_v0, %v1196_v20  ;;  %v1199_v39 = vsel %vm827_vm3, %v1196_v20, %v1198_v34  ;;  %v1463_v41 = vrot.slane %v1461_v35, 1  ;;  %v1466_v44 = vrot.slane %v1464_v36, 2 }
  0x6d   : > { %v1488_v35 = vshrl.u32 %v3944_v1, 16  ;;  %v1491_v36 = vshll.u32 %v3944_v1, 16 }
  0x6e   : > { %v1467_v45 = vor.u32 %v1466_v44, %v1463_v41 }
  0x70   : > { %v1468_v49 = vsel %vm1424_vm4, %v1458_v30, %v1467_v45  ;;  %v1477_v3 = vsel %vm1424_vm4, %v1467_v45, %v1476_v58 }
  0x79   : > { %3633 = vmatmul.msk.bf16.gmra.mxu1 %vm525_vm2, %v4210_v13  ;;  %v1459_v13 = vsel %vm1424_vm4, %v1449_v16, %v1458_v30 }
  0x7a   : > { %3652 = vmatmul.msk.bf16.gmra.mxu2 %vm525_vm2, %v832_v18 }
  0x7b   : > { %3758 = vmatmul.msk.bf16.gmra.mxu0 %vm525_vm2, %v1450_v19  ;;  %v1203_v19 = vsel %vm827_vm3, %v1200_v50, %v1202_v4 }
  0x7c   : > { %3741 = vmatmul.msk.bf16.gmra.mxu3 %vm525_vm2, %v1197_v15 }
  0x89   : > { %3634 = vmatmul.msk.bf16.gmra.mxu1 %vm525_vm2, %v4246_v42  ;;  %v836_v42 = vsel %vm827_vm3, %v833_v28, %v835_v24 }
  0x8a   : > { %3653 = vmatmul.msk.bf16.gmra.mxu2 %vm525_vm2, %v834_v32  ;;  %v3945_v32 = vld [vmem:[%s4192_s6 + $0x48] sm:$0xff] }
  0x8b   : > { %3759 = vmatmul.msk.bf16.gmra.mxu0 %vm525_vm2, %v1459_v13  ;;  %v1204_v34 = vrot.slane %v3945_v32, 1  ;;  %v1500_v1 = vshll.u32 %v3945_v32, 16 }
  0x8c   : > { %3742 = vmatmul.msk.bf16.gmra.mxu3 %vm525_vm2, %v1199_v39 }
  0x96   : > { %v4397_v46 = vpop.f32.mrf.mxu1 }
  0x98   : > { %v4401_v48 = vpop.f32.mrf.mxu0 }
  0x99   : > { %3635 = vmatmul.msk.bf16.gmra.mxu1 %vm525_vm2, %v4282_v17  ;;  %v837_v17 = vrot.slane %v4195_v8, 1 }
  0x9a   : > { %3654 = vmatmul.msk.bf16.gmra.mxu2 %vm525_vm2, %v836_v42  ;;  %v1490_v42 = vrot.slane %v1488_v35, 1  ;;  %v3947_v35 = vld [vmem:[%s4192_s6 + $0x58] sm:$0xff] }
  0x9b   : > { %3760 = vmatmul.msk.bf16.gmra.mxu0 %vm525_vm2, %v1468_v49  ;;  %v838_v0 = vsel %vm827_vm3, %v835_v24, %v837_v17  ;;  %v840_v30 = vsel %vm827_vm3, %v837_v17, %v839_v23  ;;  %v1205_v24 = vsel %vm827_vm3, %v1202_v4, %v1204_v34 }
  0x9c   : > { %3743 = vmatmul.msk.bf16.gmra.mxu3 %vm525_vm2, %v1201_v56  ;;  %v842_v56 = vsel %vm827_vm3, %v839_v23, %v841_v47 }
  0x9d   : > { %v4408_v53 = vpop.f32.mrf.mxu2 }
  0x9e   : > { %v4410_v54 = vpop.f32.mrf.mxu1 }
  0x9f   : > { %v4419_v61 = vpop.f32.mrf.mxu3 }
  0xa0   : > { %v4413_v29 = vpop.f32.mrf.mxu0  ;;  %5407 = vst [vmem:[#allocation2_spill] sm:$0xff] %v4419_v61 }
  0xa5   : > { %v4417_v59 = vpop.f32.mrf.mxu2 }
  0xa6   : > { %v4421_v62 = vpop.f32.mrf.mxu1 }
  0xa7   : > { %v4434_v18 = vpop.f32.mrf.mxu3 }
  0xa8   : > { %v4425_v2 = vpop.f32.mrf.mxu0  ;;  %5408 = vst [vmem:[#allocation3_spill] sm:$0xff] %v4434_v18 }
  0xa9   : > { %3636 = vmatmul.msk.bf16.gmra.mxu1 %vm525_vm2, %v4291_v27  ;;  %v1484_v27 = vrot.slane %v1482_v14, 2 }
  0xaa   : > { %3655 = vmatmul.msk.bf16.gmra.mxu2 %vm525_vm2, %v838_v0  ;;  %v1497_v0 = vshrl.u32 %v3945_v32, 16 }
  0xab   : > { %3761 = vmatmul.msk.bf16.gmra.mxu0 %vm525_vm2, %v1477_v3  ;;  %v1485_v15 = vor.u32 %v1484_v27, %v1481_v21  ;;  %v843_v27 = vrot.slane %v4274_v5, 1 }
  0xac   : > { %3744 = vmatmul.msk.bf16.gmra.mxu3 %vm525_vm2, %v1203_v19  ;;  %v1499_v21 = vrot.slane %v1497_v0, 1 }
  0xad   : > { %v4432_v16 = vpop.f32.mrf.mxu2  ;;  %v1486_v13 = vsel %vm1424_vm4, %v1476_v58, %v1485_v15  ;;  %v1206_v58 = vrot.slane %v3946_v55, 1 }
  0xae   : > { %v4436_v12 = vpop.f32.mrf.mxu1 }
  0xaf   : > { %v4445_v26 = vpop.f32.mrf.mxu3  ;;  %v1207_v14 = vsel %vm827_vm3, %v1204_v34, %v1206_v58 }
  0xb0   : > { %v4439_v20 = vpop.f32.mrf.mxu0  ;;  %5409 = vst [vmem:[#allocation4_spill] sm:$0xff] %v4445_v26 }
  0xb5   : > { %v4443_v25 = vpop.f32.mrf.mxu2 }
  0xb6   : > { %v4447_v28 = vpop.f32.mrf.mxu1 }
  0xb7   : > { %v4460_v41 = vpop.f32.mrf.mxu3 }
  0xb8   : > { %v4451_v33 = vpop.f32.mrf.mxu0  ;;  %5410 = vst [vmem:[#allocation5_spill] sm:$0xff] %v4460_v41 }
  0xb9   : > { %3637 = vmatmul.msk.bf16.gmra.mxu1 %vm525_vm2, %v4195_v8  ;;  %v1493_v8 = vrot.slane %v1491_v36, 2 }
  0xba   : > { %3656 = vmatmul.msk.bf16.gmra.mxu2 %vm525_vm2, %v840_v30 }
  0xbb   : > { %3762 = vmatmul.msk.bf16.gmra.mxu0 %vm525_vm2, %v1486_v13  ;;  %v1494_v49 = vor.u32 %v1493_v8, %v1490_v42  ;;  %v844_v13 = vsel %vm827_vm3, %v841_v47, %v843_v27  ;;  %v1506_v42 = vshrl.u32 %v3946_v55, 16  ;;  %v1509_v8 = vshll.u32 %v3946_v55, 16 }
  0xbc   : > { %3745 = vmatmul.msk.bf16.gmra.mxu3 %vm525_vm2, %v1205_v24  ;;  %v1208_v24 = vrot.slane %v3947_v35, 1 }
  0xbd   : > { %v4458_v39 = vpop.f32.mrf.mxu2  ;;  %v1495_v17 = vsel %vm1424_vm4, %v1485_v15, %v1494_v49 }
  0xbe   : > { %v4462_v44 = vpop.f32.mrf.mxu1  ;;  %v1209_v0 = vsel %vm827_vm3, %v1206_v58, %v1208_v24  ;;  %v1210_v58 = vrot.slane %v3948_v22, 1 }
  0xbf   : > { %v4471_v51 = vpop.f32.mrf.mxu3 }
  0xc0   : > { %v4465_v45 = vpop.f32.mrf.mxu0  ;;  %5411 = vst [vmem:[#allocation6_spill] sm:$0xff] %v4471_v51  ;;  %v1211_v26 = vsel %vm827_vm3, %v1208_v24, %v1210_v58  ;;  %v3949_v24 = vld [vmem:[%s4192_s6 + $0x68] sm:$0xff] }
  0xc5   : > { %v4469_v50 = vpop.f32.mrf.mxu2 }
  0xc6   : > { %v4473_v43 = vpop.f32.mrf.mxu1 }
  0xc7   : > { %v4486_v4 = vpop.f32.mrf.mxu3 }
  0xc8   : > { %v4477_v57 = vpop.f32.mrf.mxu0  ;;  %5412 = vst [vmem:[#allocation7_spill] sm:$0xff] %v4486_v4 }
  0xc9   : > { %3638 = vmatmul.msk.bf16.gmra.mxu1 %vm525_vm2, %v4198_v9  ;;  %v1502_v9 = vrot.slane %v1500_v1, 2 }
  0xca   : > { %3657 = vmatmul.msk.bf16.gmra.mxu2 %vm525_vm2, %v842_v56 }
  0xcb   : > { %3763 = vmatmul.msk.bf16.gmra.mxu0 %vm525_vm2, %v1495_v17  ;;  %v1503_v23 = vor.u32 %v1502_v9, %v1499_v21 }
  0xcc   : > { %3746 = vmatmul.msk.bf16.gmra.mxu3 %vm525_vm2, %v1207_v14  ;;  %v1511_v14 = vrot.slane %v1509_v8, 2  ;;  %v1515_v8 = vshrl.u32 %v3947_v35, 16 }
  0xcd   : > { %v4484_v3 = vpop.f32.mrf.mxu2  ;;  %v1504_v34 = vsel %vm1424_vm4, %v1494_v49, %v1503_v23  ;;  %v1508_v49 = vrot.slane %v1506_v42, 1 }
  0xce   : > { %v4488_v7 = vpop.f32.mrf.mxu1  ;;  %v1517_v61 = vrot.slane %v1515_v8, 1 }
  0xcf   : > { %v1292_v30 = vpop.f32.mrf.mxu3  ;;  %v1512_v21 = vor.u32 %v1511_v14, %v1508_v49 }
  0xd0   : > { %v4491_v19 = vpop.f32.mrf.mxu0 }
  0xd1   : > { %v1513_v51 = vsel %vm1424_vm4, %v1503_v23, %v1512_v21 }
  0xd5   : > { %v4495_v15 = vpop.f32.mrf.mxu2 }
  0xd6   : > { %v4497_v32 = vpop.f32.mrf.mxu1 }
  0xd7   : > { %v1294_v17 = vpop.f32.mrf.mxu3 }
  0xd8   : > { %v4501_v36 = vpop.f32.mrf.mxu0 }
  0xd9   : > { %3639 = vmatmul.msk.bf16.gmra.mxu1 %vm525_vm2, %v4237_v37  ;;  %v845_v37 = vrot.slane %v4265_v60, 1 }
  0xda   : > { %3658 = vmatmul.msk.bf16.gmra.mxu2 %vm525_vm2, %v844_v13 }
  0xdb   : > { %3764 = vmatmul.msk.bf16.gmra.mxu0 %vm525_vm2, %v1504_v34  ;;  %v846_v34 = vsel %vm827_vm3, %v843_v27, %v845_v37 }
  0xdc   : > { %3747 = vmatmul.msk.bf16.gmra.mxu3 %vm525_vm2, %v1209_v0  ;;  %v1518_v0 = vshll.u32 %v3947_v35, 16 }
  0xdd   : > { %v4508_v56 = vpop.f32.mrf.mxu2 }
  0xde   : > { %5413 = vst [vmem:[#allocation8_spill] sm:$0xff] %v4508_v56  ;;  %v4510_v47 = vpop.f32.mrf.mxu1 }
  0xdf   : > { %v1297_v13 = vpop.f32.mrf.mxu3 }
  0xe0   : > { %v4513_v1 = vpop.f32.mrf.mxu0 }
  0xe5   : > { %v4517_v9 = vpop.f32.mrf.mxu2 }
  0xe6   : > { %5414 = vst [vmem:[#allocation9_spill] sm:$0xff] %v4517_v9  ;;  %v731_v55 = vpop.f32.mrf.mxu1 }
  0xe7   : > { %v732_v42 = vadd.f32 %v731_v55, %v4401_v48  ;;  %v1299_v14 = vpop.f32.mrf.mxu3 }
  0xe8   : > { %v1661_v4 = vpop.f32.mrf.mxu0 }
  0xe9   : > { %3640 = vmatmul.msk.bf16.gmra.mxu1 %vm525_vm2, %v4274_v5  ;;  %v1520_v5 = vrot.slane %v1518_v0, 2  ;;  %v1527_v0 = vshll.u32 %v3948_v22, 16 }
  0xea   : > { %3659 = vmatmul.msk.bf16.gmra.mxu2 %vm525_vm2, %v846_v34 }
  0xeb   : > { %3765 = vmatmul.msk.bf16.gmra.mxu0 %vm525_vm2, %v1513_v51  ;;  %v847_v51 = vrot.slane %v4201_v10, 1  ;;  %v1521_v35 = vor.u32 %v1520_v5, %v1517_v61 }
  0xec   : > { %3748 = vmatmul.msk.bf16.gmra.mxu3 %vm525_vm2, %v1211_v26 }
  0xed   : > { %v931_v49 = vpop.f32.mrf.mxu2  ;;  %v848_v56 = vsel %vm827_vm3, %v845_v37, %v847_v51  ;;  %v1522_v8 = vsel %vm1424_vm4, %v1512_v21, %v1521_v35 }
  0xee   : > { %v1021_v41 = vadd.f32 %v931_v49, %v732_v42  ;;  %v733_v27 = vpop.f32.mrf.mxu1 }
  0xef   : > { %v734_v48 = vadd.f32 %v733_v27, %v4413_v29  ;;  %v1302_v9 = vpop.f32.mrf.mxu3  ;;  %v1212_v29 = vrot.slane %v3949_v24, 1 }
  0xf0   : > { %v1382_v23 = vadd.f32 %v1292_v30, %v1021_v41  ;;  %v1663_v18 = vpop.f32.mrf.mxu0 }
  0xf1   : > { %v1213_v21 = vsel %vm827_vm3, %v1210_v58, %v1212_v29  ;;  %v3950_v58 = vld [vmem:[%s4192_s6 + $0x70] sm:$0xff] }
  0xf2   : > { %v4529_v34 = vadd.f32 %v1661_v4, %v1382_v23  ;;  %v1524_v4 = vshrl.u32 %v3948_v22, 16 }
  0xf5   : > { %v933_v55 = vpop.f32.mrf.mxu2 }
  0xf6   : > { %v1022_v42 = vadd.f32 %v933_v55, %v734_v48  ;;  %v736_v49 = vpop.f32.mrf.mxu1  ;;  %v1526_v48 = vrot.slane %v1524_v4, 1  ;;  %v849_v55 = vrot.slane %v4204_v11, 1 }
  0xf7   : > { %v737_v61 = vadd.f32 %v736_v49, %v4425_v2  ;;  %v1304_v27 = vpop.f32.mrf.mxu3 }
  0xf8   : > { %v1383_v41 = vadd.f32 %v1294_v17, %v1022_v42  ;;  %v1666_v30 = vpop.f32.mrf.mxu0 }
  0xf9   : > { %3641 = vmatmul.msk.bf16.gmra.mxu1 %vm525_vm2, %v4265_v60 }
  0xfa   : > { %3660 = vmatmul.msk.bf16.gmra.mxu2 %vm525_vm2, %v848_v56  ;;  %v4539_v26 = vadd.f32 %v1663_v18, %v1383_v41  ;;  %v1529_v56 = vrot.slane %v1527_v0, 2 }
  0xfb   : > { %3766 = vmatmul.msk.bf16.gmra.mxu0 %vm525_vm2, %v1522_v8 }
  0xfc   : > { %3749 = vmatmul.msk.bf16.gmra.mxu3 %vm525_vm2, %v1213_v21  ;;  %v1530_v22 = vor.u32 %v1529_v56, %v1526_v48 }
  0xfd   : > { %v936_v37 = vpop.f32.mrf.mxu2 }
  0xfe   : > { %v1023_v17 = vadd.f32 %v936_v37, %v737_v61  ;;  %v738_v23 = vpop.f32.mrf.mxu1  ;;  %v850_v61 = vsel %vm827_vm3, %v847_v51, %v849_v55  ;;  %v1531_v4 = vsel %vm1424_vm4, %v1521_v35, %v1530_v22 }
  0xff   : > { %v739_v2 = vadd.f32 %v738_v23, %v4439_v20  ;;  %v1307_v49 = vpop.f32.mrf.mxu3  ;;  %v1214_v20 = vrot.slane %v3950_v58, 1  ;;  %v1536_v23 = vshll.u32 %v3949_v24, 16 }
 0x100   : > { %v1384_v5 = vadd.f32 %v1297_v13, %v1023_v17  ;;  %v1668_v60 = vpop.f32.mrf.mxu0  ;;  %v1533_v17 = vshrl.u32 %v3949_v24, 16 }
 0x101   : > { %v1215_v35 = vsel %vm827_vm3, %v1212_v29, %v1214_v20  ;;  %v3951_v29 = vld [vmem:[%s4192_s6 + $0x78] sm:$0xff] }
 0x102   : > { %v4545_v18 = vadd.f32 %v1666_v30, %v1384_v5  ;;  %v1535_v56 = vrot.slane %v1533_v17, 1 }
 0x105   : > { %v938_v42 = vpop.f32.mrf.mxu2 }
 0x106   : > { %v1024_v41 = vadd.f32 %v938_v42, %v739_v2  ;;  %v741_v8 = vpop.f32.mrf.mxu1  ;;  %v1538_v2 = vrot.slane %v1536_v23, 2  ;;  %v851_v42 = vrot.slane %v4241_v38, 1 }
 0x107   : > { %v742_v0 = vadd.f32 %v741_v8, %v4451_v33  ;;  %v1309_v21 = vpop.f32.mrf.mxu3 }
 0x108   : > { %v1385_v13 = vadd.f32 %v1299_v14, %v1024_v41  ;;  %v1671_v37 = vpop.f32.mrf.mxu0  ;;  %v1539_v24 = vor.u32 %v1538_v2, %v1535_v56 }
 0x109   : > { %3642 = vmatmul.msk.bf16.gmra.mxu1 %vm525_vm2, %v4201_v10 }
 0x10a   : > { %3661 = vmatmul.msk.bf16.gmra.mxu2 %vm525_vm2, %v850_v61  ;;  %v4555_v30 = vadd.f32 %v1668_v60, %v1385_v13  ;;  %v1540_v17 = vsel %vm1424_vm4, %v1530_v22, %v1539_v24 }
 0x10b   : > { %3767 = vmatmul.msk.bf16.gmra.mxu0 %vm525_vm2, %v1531_v4  ;;  %v852_v4 = vsel %vm827_vm3, %v849_v55, %v851_v42 }
 0x10c   : > { %3750 = vmatmul.msk.bf16.gmra.mxu3 %vm525_vm2, %v1215_v35 }
 0x10d   : > { %v941_v51 = vpop.f32.mrf.mxu2 }
 0x10e   : > { %v1025_v14 = vadd.f32 %v941_v51, %v742_v0  ;;  %v743_v5 = vpop.f32.mrf.mxu1  ;;  %v1542_v51 = vshrl.u32 %v3950_v58, 16 }
 0x10f   : > { %v744_v33 = vadd.f32 %v743_v5, %v4465_v45  ;;  %v1312_v8 = vpop.f32.mrf.mxu3  ;;  %v1216_v45 = vrot.slane %v3951_v29, 1 }
 0x110   : > { %v1386_v48 = vadd.f32 %v1302_v9, %v1025_v14  ;;  %v1673_v10 = vpop.f32.mrf.mxu0  ;;  %v1545_v14 = vshll.u32 %v3950_v58, 16  ;;  %v1544_v56 = vrot.slane %v1542_v51, 1 }
 0x111   : > { %v1217_v22 = vsel %vm827_vm3, %v1214_v20, %v1216_v45  ;;  %v3952_v20 = vld [vmem:[%s4192_s6 + $0x80] sm:$0xff] }
 0x112   : > { %v4561_v60 = vadd.f32 %v1671_v37, %v1386_v48  ;;  %v1547_v2 = vrot.slane %v1545_v14, 2  ;;  %v1551_v14 = vshrl.u32 %v3951_v29, 16 }
 0x114   : > { %v1548_v58 = vor.u32 %v1547_v2, %v1544_v56  ;;  %v855_v2 = vrot.slane %v4312_v52, 1 }
 0x115   : > { %v943_v41 = vpop.f32.mrf.mxu2 }
 0x116   : > { %v1026_v61 = vadd.f32 %v943_v41, %v744_v33  ;;  %v746_v13 = vpop.f32.mrf.mxu1  ;;  %v853_v33 = vrot.slane %v4277_v6, 1 }
 0x117   : > { %v747_v23 = vadd.f32 %v746_v13, %v4477_v57  ;;  %v1314_v5 = vpop.f32.mrf.mxu3 }
 0x118   : > { %v1387_v9 = vadd.f32 %v1304_v27, %v1026_v61  ;;  %v1676_v0 = vpop.f32.mrf.mxu0 }
 0x119   : > { %3643 = vmatmul.msk.bf16.gmra.mxu1 %vm525_vm2, %v4204_v11 }
 0x11a   : > { %3662 = vmatmul.msk.bf16.gmra.mxu2 %vm525_vm2, %v852_v4  ;;  %v4571_v37 = vadd.f32 %v1673_v10, %v1387_v9  ;;  %v854_v9 = vsel %vm827_vm3, %v851_v42, %v853_v33 }
 0x11b   : > { %3768 = vmatmul.msk.bf16.gmra.mxu0 %vm525_vm2, %v1540_v17 }
 0x11c   : > { %3751 = vmatmul.msk.bf16.gmra.mxu3 %vm525_vm2, %v1217_v22 }
 0x11d   : > { %v946_v55 = vpop.f32.mrf.mxu2 }
 0x11e   : > { %v1027_v27 = vadd.f32 %v946_v55, %v747_v23  ;;  %v748_v35 = vpop.f32.mrf.mxu1  ;;  %v1549_v23 = vsel %vm1424_vm4, %v1539_v24, %v1548_v58  ;;  %v1554_v55 = vshll.u32 %v3951_v29, 16 }
 0x11f   : > { %v749_v57 = vadd.f32 %v748_v35, %v4491_v19  ;;  %v1317_v61 = vpop.f32.mrf.mxu3  ;;  %v1218_v19 = vrot.slane %v3952_v20, 1 }
 0x120   : > { %v1388_v48 = vadd.f32 %v1307_v49, %v1027_v27  ;;  %v1678_v11 = vpop.f32.mrf.mxu0  ;;  %v1556_v56 = vrot.slane %v1554_v55, 2  ;;  %v1563_v55 = vshll.u32 %v3952_v20, 16 }
 0x121   : > { %v1219_v24 = vsel %vm827_vm3, %v1216_v45, %v1218_v19  ;;  %v3953_v45 = vld [vmem:[%s4192_s6 + $0x88] sm:$0xff] }
 0x122   : > { %v4577_v10 = vadd.f32 %v1676_v0, %v1388_v48  ;;  %v1553_v48 = vrot.slane %v1551_v14, 1  ;;  %v1560_v14 = vshrl.u32 %v3952_v20, 16 }
 0x124   : > { %v1557_v29 = vor.u32 %v1556_v56, %v1553_v48  ;;  %v857_v48 = vrot.slane %v4228_v31, 1 }
 0x125   : > { %v948_v41 = vpop.f32.mrf.mxu2 }
 0x126   : > { %v1028_v13 = vadd.f32 %v948_v41, %v749_v57  ;;  %v751_v4 = vpop.f32.mrf.mxu1 }
 0x127   : > { %v752_v51 = vadd.f32 %v751_v4, %v4501_v36  ;;  %v1319_v27 = vpop.f32.mrf.mxu3 }
 0x128   : > { %v1389_v49 = vadd.f32 %v1309_v21, %v1028_v13  ;;  %v1681_v17 = vpop.f32.mrf.mxu0 }
 0x129   : > { %3644 = vmatmul.msk.bf16.gmra.mxu1 %vm525_vm2, %v4241_v38 }
 0x12a   : > { %3663 = vmatmul.msk.bf16.gmra.mxu2 %vm525_vm2, %v854_v9  ;;  %v4587_v0 = vadd.f32 %v1678_v11, %v1389_v49  ;;  %v856_v9 = vsel %vm827_vm3, %v853_v33, %v855_v2 }
 0x12b   : > { %3769 = vmatmul.msk.bf16.gmra.mxu0 %vm525_vm2, %v1549_v23  ;;  %v1558_v23 = vsel %vm1424_vm4, %v1548_v58, %v1557_v29 }
 0x12c   : > { %3752 = vmatmul.msk.bf16.gmra.mxu3 %vm525_vm2, %v1219_v24  ;;  %v1562_v24 = vrot.slane %v1560_v14, 1 }
 0x12d   : > { %v951_v42 = vpop.f32.mrf.mxu2 }
 0x12e   : > { %v1029_v21 = vadd.f32 %v951_v42, %v752_v51  ;;  %v753_v35 = vpop.f32.mrf.mxu1 }
 0x12f   : > { %v754_v36 = vadd.f32 %v753_v35, %v4513_v1  ;;  %v1322_v41 = vpop.f32.mrf.mxu3  ;;  %v1220_v1 = vrot.slane %v3953_v45, 1 }
 0x130   : > { %v1390_v22 = vadd.f32 %v1312_v8, %v1029_v21  ;;  %v1683_v38 = vpop.f32.mrf.mxu0 }
 0x131   : > { %v1221_v58 = vsel %vm827_vm3, %v1218_v19, %v1220_v1  ;;  %v3954_v19 = vld [vmem:[%s4192_s6 + $0x90] sm:$0xff] }
 0x132   : > { %v4593_v11 = vadd.f32 %v1681_v17, %v1390_v22  ;;  %v1565_v22 = vrot.slane %v1563_v55, 2 }
 0x134   : > { %v1566_v20 = vor.u32 %v1565_v22, %v1562_v24 }
 0x135   : > { %v953_v57 = vpop.f32.mrf.mxu2 }
 0x136   : > { %v1030_v13 = vadd.f32 %v953_v57, %v754_v36  ;;  %v756_v4 = vpop.f32.mrf.mxu1 }
 0x137   : > { %v757_v51 = vadd.f32 %v756_v4, %v4397_v46  ;;  %v1324_v42 = vpop.f32.mrf.mxu3  ;;  %v858_v4 = vsel %vm827_vm3, %v855_v2, %v857_v48  ;;  %v1569_v2 = vshrl.u32 %v3953_v45, 16 }
 0x138   : > { %v1391_v8 = vadd.f32 %v1314_v5, %v1030_v13  ;;  %v1686_v49 = vpop.f32.mrf.mxu0 }
 0x139   : > { %3645 = vmatmul.msk.bf16.gmra.mxu1 %vm525_vm2, %v4277_v6 }
 0x13a   : > { %3664 = vmatmul.msk.bf16.gmra.mxu2 %vm525_vm2, %v856_v9  ;;  %v4603_v17 = vadd.f32 %v1683_v38, %v1391_v8  ;;  %v1567_v8 = vsel %vm1424_vm4, %v1557_v29, %v1566_v20 }
 0x13b   : > { %3770 = vmatmul.msk.bf16.gmra.mxu0 %vm525_vm2, %v1558_v23  ;;  %v1572_v23 = vshll.u32 %v3953_v45, 16 }
 0x13c   : > { %3753 = vmatmul.msk.bf16.gmra.mxu3 %vm525_vm2, %v1221_v58  ;;  %v1093_v58 = vld [vmem:[%s4192_s6 + $0x98] sm:$0x1] }
 0x13d   : > { %v956_v33 = vpop.f32.mrf.mxu2 }
 0x13e   : > { %v1031_v5 = vadd.f32 %v956_v33, %v757_v51  ;;  %v758_v21 = vpop.f32.mrf.mxu1 }
 0x13f   : > { %v759_v46 = vadd.f32 %v758_v21, %v4410_v54  ;;  %v1327_v36 = vpop.f32.mrf.mxu3  ;;  %v1222_v54 = vrot.slane %v3954_v19, 1  ;;  %v1574_v21 = vrot.slane %v1572_v23, 2 }
 0x140   : > { %v1392_v35 = vadd.f32 %v1317_v61, %v1031_v5  ;;  %v1688_v6 = vpop.f32.mrf.mxu0  ;;  %v1571_v5 = vrot.slane %v1569_v2, 1  ;;  %v4104_v2 = vld [vmem:[%s4192_s6 + $0x78] sm:$0xff] }
 0x142   : > { %v4609_v38 = vadd.f32 %v1686_v49, %v1392_v35 }
 0x145   : > { %v958_v56 = vpop.f32.mrf.mxu2 }
 0x146   : > { %v1032_v57 = vadd.f32 %v958_v56, %v759_v46  ;;  %v761_v13 = vpop.f32.mrf.mxu1 }
 0x147   : > { %v762_v49 = vadd.f32 %v761_v13, %v4421_v62  ;;  %v4623_v51 = vpop.f32.mrf.mxu3  ;;  %v4631_v62 = vld [vmem:[%s4192_s6 + $0x80] sm:$0xff] }
 0x148   : > { %v1393_v61 = vadd.f32 %v1319_v27, %v1032_v57  ;;  %v1691_v9 = vpop.f32.mrf.mxu0  ;;  %v859_v45 = vrot.slane %v4631_v62, 1 }
 0x149   : > { %3646 = vmatmul.msk.bf16.gmra.mxu1 %vm525_vm2, %v4312_v52  ;;  %v1223_v52 = vsel %vm827_vm3, %v1220_v1, %v1222_v54  ;;  %v1575_v1 = vor.u32 %v1574_v21, %v1571_v5  ;;  %v4655_v21 = vld [vmem:[%s4192_s6 + $0x18] sm:$0xff] }
 0x14a   : > { %3665 = vmatmul.msk.bf16.gmra.mxu2 %vm525_vm2, %v858_v4  ;;  %v4619_v31 = vadd.f32 %v1688_v6, %v1393_v61  ;;  %v1169_v6 = vunpack.c.l.b16 %v1093_v58  ;;  %v860_v57 = vsel %vm827_vm3, %v857_v48, %v859_v45 }
 0x14b   : > { %3771 = vmatmul.msk.bf16.gmra.mxu0 %vm525_vm2, %v1567_v8  ;;  %v2023_v8 = vld [vmem:[%s4192_s6 + $0x10] sm:$0xc] }
 0x14c   : > { %3754 = vmatmul.msk.bf16.gmra.mxu3 %vm525_vm2, %v1223_v52  ;;  %v1188_v13 = vpack.c.b16 %v1169_v6, %v1169_v6  ;;  %v2099_v48 = vunpack.c.l.b16 %v2023_v8 }
 0x14d   : > { %v961_v27 = vpop.f32.mrf.mxu2 }
 0x14e   : > { %v1033_v29 = vadd.f32 %v961_v27, %v762_v49  ;;  %v763_v14 = vpop.f32.mrf.mxu1  ;;  %v4641_v49 = vld [vmem:[%s4192_s6 + $0x14] sm:$0xf]  ;;  %v1224_v23 = vrot.slane %v1188_v13, 1  ;;  %v1578_v27 = vshrl.u32 %v3954_v19, 16 }
 0x14f   : > { %v764_v24 = vadd.f32 %v763_v14, %v4436_v12  ;;  %v4635_v22 = vpop.f32.mrf.mxu3 }
 0x150   : > { %v1394_v55 = vadd.f32 %v1322_v41, %v1033_v29  ;;  %v1693_v33 = vpop.f32.mrf.mxu0  ;;  %v1581_v29 = vshll.u32 %v3954_v19, 16 }
 0x152   : > { %v4628_v35 = vadd.f32 %v1691_v9, %v1394_v55  ;;  %v1576_v9 = vsel %vm1424_vm4, %v1566_v20, %v1575_v1 }
 0x155   : > { %v963_v41 = vpop.f32.mrf.mxu2 }
 0x156   : > { %v1034_v46 = vadd.f32 %v963_v41, %v764_v24  ;;  %v766_v56 = vpop.f32.mrf.mxu1  ;;  %v1580_v41 = vrot.slane %v1578_v27, 1 }
 0x157   : > { %v767_v20 = vadd.f32 %v766_v56, %v4447_v28  ;;  %v4651_v52 = vpop.f32.mrf.mxu3  ;;  %v1418_v28 = vld [vmem:[%s4192_s6 + $0x98] sm:$0x3]  ;;  %v4663_v56 = vld [vmem:[%s4192_s6 + $0x88] sm:$0xff] }
 0x158   : > { %v1395_v4 = vadd.f32 %v1324_v42, %v1034_v46  ;;  %v1696_v61 = vpop.f32.mrf.mxu0  ;;  %v5405_v42 = vunpack.c.l.b16 %v4641_v49  ;;  %v1583_v46 = vrot.slane %v1581_v29, 2  ;;  %v861_v19 = vrot.slane %v4663_v56, 1 }
 0x159   : > { %3647 = vmatmul.msk.bf16.gmra.mxu1 %vm525_vm2, %v4104_v2  ;;  %v1422_v2 = vunpack.c.l.b16 %v1418_v28 }
 0x15a   : > { %3666 = vmatmul.msk.bf16.gmra.mxu2 %vm525_vm2, %v860_v57  ;;  %v4646_v12 = vadd.f32 %v1693_v33, %v1395_v4  ;;  %v1225_v33 = vsel %vm827_vm3, %v1222_v54, %v1224_v23  ;;  %v4659_v58 = vpack.c.b16 %v5405_v42, %v2099_v48  ;;  %v2400_v4 = vshrl.u32 %v4655_v21, 16 }
 0x15b   : > { %3772 = vmatmul.msk.bf16.gmra.mxu0 %vm525_vm2, %v1576_v9  ;;  %v1584_v8 = vor.u32 %v1583_v46, %v1580_v41  ;;  %v862_v27 = vsel %vm827_vm3, %v859_v45, %v861_v19 }
 0x15c   : > { %5415 = vst [vmem:[#allocation10_spill] sm:$0xff] %v4646_v12  ;;  %3755 = vmatmul.msk.bf16.gmra.mxu3 %vm525_vm2, %v1225_v33  ;;  %v2392_v54 = vshrl.u32 %v4659_v58, 16  ;;  %v2395_v13 = vshll.u32 %v4659_v58, 16  ;;  %v4679_v12 = vpack.c.b16 %v1422_v2, %v1422_v2  ;;  %v863_v2 = vrot.slane %v4301_v40, 1 }
 0x15d   : > { %v966_v14 = vpop.f32.mrf.mxu2 }
 0x15e   : > { %v1035_v55 = vadd.f32 %v966_v14, %v767_v20  ;;  %v768_v5 = vpop.f32.mrf.mxu1  ;;  %v2394_v29 = vrot.slane %v2392_v54, 2  ;;  %v2397_v14 = vrot.slane %v2395_v13, 3 }
 0x15f   : > { %v769_v9 = vadd.f32 %v768_v5, %v4462_v44  ;;  %v4674_v48 = vpop.f32.mrf.mxu3 }
 0x160   : > { %v1396_v6 = vadd.f32 %v1327_v36, %v1035_v55  ;;  %v1698_v24 = vpop.f32.mrf.mxu0  ;;  %v2403_v36 = vshll.u32 %v4655_v21, 16  ;;  %v2402_v55 = vrot.slane %v2400_v4, 2  ;;  %v2398_v45 = vor.u32 %v2397_v14, %v2394_v29 }
 0x162   : > { %v4667_v57 = vadd.f32 %v1696_v61, %v1396_v6  ;;  %v2405_v33 = vrot.slane %v2403_v36, 3 }
 0x164   : > { %5416 = vst [vmem:[#allocation11_spill] sm:$0xff] %v4667_v57  ;;  %v1585_v57 = vsel %vm1424_vm4, %v1575_v1, %v1584_v8  ;;  %v2406_v5 = vor.u32 %v2405_v33, %v2402_v55  ;;  %v1590_v1 = vshll.u32 %v4679_v12, 16  ;;  %v864_v33 = vsel %vm827_vm3, %v861_v19, %v863_v2  ;;  %v4724_v2 = vld [vmem:[%s4192_s6 + $0x28] sm:$0xff] }
 0x165   : > { %v968_v23 = vpop.f32.mrf.mxu2 }
 0x166   : > { %v1036_v20 = vadd.f32 %v968_v23, %v769_v9  ;;  %v771_v61 = vpop.f32.mrf.mxu1  ;;  %v2407_v13 = vsel %vm2390_vm5, %v2398_v45, %v2406_v5 }
 0x167   : > { %v772_v41 = vadd.f32 %v771_v61, %v4473_v43  ;;  %v4690_v28 = vpop.f32.mrf.mxu3  ;;  %v1592_v43 = vrot.slane %v1590_v1, 2  ;;  %v2753_v1 = vld [vmem:[%s4192_s6 + $0x10] sm:$0x8] }
 0x168   : > { %v1397_v6 = vadd.f32 %v4623_v51, %v1036_v20  ;;  %v1701_v42 = vpop.f32.mrf.mxu0  ;;  %v1587_v51 = vshrl.u32 %v4679_v12, 16 }
 0x169   : > { %3648 = vmatmul.msk.bf16.gmra.mxu1 %vm525_vm2, %v4631_v62 }
 0x16a   : > { %3667 = vmatmul.msk.bf16.gmra.mxu2 %vm525_vm2, %v862_v27  ;;  %v4684_v44 = vadd.f32 %v1698_v24, %v1397_v6  ;;  %v4694_v24 = vld [vmem:[%s4192_s6 + $0x20] sm:$0xff]  ;;  %v1589_v36 = vrot.slane %v1587_v51, 1  ;;  %v1787_v6 = vld [vmem:[%s4192_s6 + $0x8] sm:$0xc] }
 0x16b   : > { %3773 = vmatmul.msk.bf16.gmra.mxu0 %vm525_vm2, %v1585_v57  ;;  %v2409_v23 = vshrl.u32 %v4694_v24, 16  ;;  %v2412_v20 = vshll.u32 %v4694_v24, 16 }
 0x16c   : > { %3882 = vmatmul.msk.bf16.vlgmr.msra.gmra.mxu3 %vm525_vm2, %v2407_v13  ;;  %v1593_v61 = vor.u32 %v1592_v43, %v1589_v36 }
 0x16d   : > { %v971_v46 = vpop.f32.mrf.mxu2  ;;  %v2414_v45 = vrot.slane %v2412_v20, 3  ;;  %v5418_v20 = vunpack.c.l.b16 %v4641_v49  ;;  %v2156_v49 = vrot.slane %v4655_v21, 2 }
 0x16e   : > { %v1037_v54 = vadd.f32 %v971_v46, %v772_v41  ;;  %v773_v62 = vpop.f32.mrf.mxu1  ;;  %v1594_v51 = vsel %vm1424_vm4, %v1584_v8, %v1593_v61  ;;  %v3061_v61 = vld [vmem:[%s5400_s2] sm:$0xff] }
 0x16f   : > { %v774_v27 = vadd.f32 %v773_v62, %v4488_v7  ;;  %v1791_v7 = vunpack.c.l.b16 %v1787_v6  ;;  %v2757_v62 = vunpack.c.l.b16 %v2753_v1 }
 0x170   : > { %v1398_v57 = vadd.f32 %v4635_v22, %v1037_v54  ;;  %v1703_v4 = vpop.f32.mrf.mxu0  ;;  %v4704_v22 = vpop.f32.mrf.mxu3 }
 0x172   : > { %v4698_v9 = vadd.f32 %v1701_v42, %v1398_v57  ;;  %v2411_v42 = vrot.slane %v2409_v23, 2  ;;  %v5417_v57 = vunpack.c.l.b16 %v4323_v63 }
 0x174   : > { %v2415_v19 = vor.u32 %v2414_v45, %v2411_v42  ;;  %v1792_v36 = vpack.c.b16 %v5417_v57, %v1791_v7  ;;  %v2761_v45 = vrot.slane %v4655_v21, 3  ;;  %v3062_v21 = vld [vmem:[%s5400_s2 + $0x8] sm:$0xff] }
 0x175   : > { %v973_v29 = vpop.f32.mrf.mxu2 }
 0x176   : > { %v1038_v14 = vadd.f32 %v973_v29, %v774_v27  ;;  %v776_v55 = vpop.f32.mrf.mxu1  ;;  %v2416_v43 = vsel %vm2390_vm5, %v2406_v5, %v2415_v19  ;;  %v4131_v27 = vmov 0   ;;  %v1794_v63 = vrot.slane %v1792_v36, 2  ;;  %v4106_v29 = vld [vmem:[%s4192_s6 + $0x10] sm:$0xff] }
 0x177   : > { %v777_v54 = vadd.f32 %v776_v55, %v4497_v32  ;;  %v2758_v32 = vpack.c.b16 %v5418_v20, %v2757_v62  ;;  %4100 = vset.pattern.permute.xlu0 %v4131_v27  ;;  %4101 = vset.pattern.permute.xlu1 %v4131_v27  ;;  %v1795_v5 = vrot.slane %v4106_v29, 2  ;;  %v2418_v55 = vshrl.u32 %v4724_v2, 16 }
 0x178   : > { %v1399_v40 = vadd.f32 %v4651_v52, %v1038_v14  ;;  %v1706_v41 = vpop.f32.mrf.mxu0  ;;  %v4718_v13 = vpop.f32.mrf.mxu3  ;;  %3099 = vperm.xlu0 %4100, %v3061_v61   ;;  %4102 = vset.pattern.permute.xlu2 %v4131_v27  ;;  %v4757_v27 = vld [vmem:[%s4192_s6 + $0x30] sm:$0xff] }
 0x179   : > { %3649 = vmatmul.msk.bf16.gmra.mxu1 %vm525_vm2, %v4663_v56  ;;  %v2760_v42 = vrot.slane %v2758_v32, 3  ;;  %v1796_v7 = vsel %vm1793_vm6, %v1794_v63, %v1795_v5 }
 0x17a   : > { %3668 = vmatmul.msk.bf16.gmra.mxu2 %vm525_vm2, %v864_v33  ;;  %v4714_v46 = vadd.f32 %v1703_v4, %v1399_v40  ;;  %v2421_v33 = vshll.u32 %v4724_v2, 16 }
 0x17b   : > { %3774 = vmatmul.msk.bf16.gmra.mxu0 %vm525_vm2, %v1594_v51 }
 0x17c   : > { %3883 = vmatmul.msk.bf16.gmra.mxu3 %vm525_vm2, %v2416_v43  ;;  %v2423_v62 = vrot.slane %v2421_v33, 3  ;;  %v2430_v33 = vshll.u32 %v4757_v27, 16 }
 0x17d   : > { %v976_v52 = vpop.f32.mrf.mxu2 }
 0x17e   : > { %v1039_v8 = vadd.f32 %v976_v52, %v777_v54  ;;  %v778_v56 = vpop.f32.mrf.mxu1  ;;  %v2420_v54 = vrot.slane %v2418_v55, 2  ;;  %v2158_v55 = vrot.slane %v4694_v24, 2 }
 0x17f   : > { %v779_v6 = vadd.f32 %v778_v56, %v4510_v47  ;;  %v2762_v47 = vsel %vm2759_vm7, %v2760_v42, %v2761_v45 }
 0x180   : > { %v1400_v4 = vadd.f32 %v4674_v48, %v1039_v8  ;;  %v1708_v23 = vpop.f32.mrf.mxu0  ;;  %v2155_v48 = vrot.slane %v4659_v58, 2  ;;  %v1347_v51 = vpop.f32.mrf.mxu3  ;;  %3104 = vperm.xlu0 %4100, %v3062_v21   ;;  %v2424_v36 = vor.u32 %v2423_v62, %v2420_v54  ;;  %v2432_v62 = vrot.slane %v2430_v33, 3 }
 0x182   : > { %v4734_v14 = vadd.f32 %v1706_v41, %v1400_v4  ;;  %v2157_v58 = vsel %vm1793_vm6, %v2155_v48, %v2156_v49  ;;  %v2425_v32 = vsel %vm2390_vm5, %v2415_v19, %v2424_v36  ;;  %v2427_v19 = vshrl.u32 %v4757_v27, 16 }
 0x184   : > { %v2429_v54 = vrot.slane %v2427_v19, 2 }
 0x185   : > { %v978_v40 = vpop.f32.mrf.mxu2 }
 0x186   : > { %v1040_v1 = vadd.f32 %v978_v40, %v779_v6  ;;  %v781_v41 = vpop.f32.mrf.mxu1  ;;  %v2763_v6 = vrot.slane %v4694_v24, 3 }
 0x188   : > { %v1401_v52 = vadd.f32 %v4690_v28, %v1040_v1  ;;  %v1711_v8 = vpop.f32.mrf.mxu0  ;;  %v782_v28 = vadd.f32 %v781_v41, %v4408_v53  ;;  %v1349_v43 = vpop.f32.mrf.mxu3  ;;  %v4107_v53 = vld [vmem:[%s4192_s6 + $0x18] sm:$0xff] }
 0x189   : > { %3776 = vmatmul.msk.bf16.vlgmr.msra.gmra.mxu1 %vm525_vm2, %v1796_v7  ;;  %v1797_v48 = vrot.slane %v4107_v53, 2  ;;  %v2160_v53 = vrot.slane %v4724_v2, 2 }
 0x18a   : > { %3863 = vmatmul.msk.bf16.vlgmr.msra.gmra.mxu2 %vm525_vm2, %v2157_v58  ;;  %v4751_v57 = vadd.f32 %v1708_v23, %v1401_v52  ;;  %v3063_v23 = vld [vmem:[%s5400_s2 + $0x10] sm:$0xff]  ;;  %v2159_v58 = vsel %vm1793_vm6, %v2156_v49, %v2158_v55 }
 0x18b   : > { %3901 = vmatmul.msk.bf16.vlgmr.msra.gmra.mxu0 %vm525_vm2, %v2762_v47  ;;  %3109 = vperm.xlu1 %4101, %v3063_v23   ;;  %v1798_v7 = vsel %vm1793_vm6, %v1795_v5, %v1797_v48  ;;  %v2764_v47 = vsel %vm2759_vm7, %v2761_v45, %v2763_v6  ;;  %v2433_v5 = vor.u32 %v2432_v62, %v2429_v54 }
 0x18c   : > { %3884 = vmatmul.msk.bf16.gmra.mxu3 %vm525_vm2, %v2425_v32 }
 0x18d   : > { %v981_v56 = vpop.f32.mrf.mxu2 }
 0x18e   : > { %v1041_v4 = vadd.f32 %v981_v56, %v782_v28  ;;  %v783_v20 = vpop.f32.mrf.mxu1  ;;  %v2434_v56 = vsel %vm2390_vm5, %v2424_v36, %v2433_v5  ;;  %v2765_v36 = vrot.slane %v4724_v2, 3 }
 0x190   : > { %v1402_v61 = vadd.f32 %v4704_v22, %v1041_v4  ;;  %v1713_v63 = vpop.f32.mrf.mxu0  ;;  %v784_v22 = vadd.f32 %v783_v20, %v4417_v59  ;;  %v1352_v40 = vpop.f32.mrf.mxu3  ;;  %v3064_v59 = vld [vmem:[%s5400_s2 + $0x18] sm:$0xff] }
 0x191   : > { %v4787_v4 = vld [vmem:[%s4192_s6 + $0x38] sm:$0xff] }
 0x192   : > { %v4764_v29 = vadd.f32 %v1711_v8, %v1402_v61  ;;  %v2439_v19 = vshll.u32 %v4787_v4, 16 }
 0x193   : > { %3114 = vperm.xlu1 %4101, %v3064_v59  }
 0x194   : > { %v2441_v54 = vrot.slane %v2439_v19, 3 }
 0x195   : > { %v983_v42 = vpop.f32.mrf.mxu2 }
 0x196   : > { %v1042_v1 = vadd.f32 %v983_v42, %v784_v22  ;;  %v786_v41 = vpop.f32.mrf.mxu1 }
 0x198   : > { %v1403_v52 = vadd.f32 %v4718_v13, %v1042_v1  ;;  %v1716_v8 = vpop.f32.mrf.mxu0  ;;  %v787_v13 = vadd.f32 %v786_v41, %v4432_v16  ;;  %v1354_v21 = vpop.f32.mrf.mxu3  ;;  %v2436_v16 = vshrl.u32 %v4787_v4, 16 }
 0x199   : > { %3777 = vmatmul.msk.bf16.gmra.mxu1 %vm525_vm2, %v1798_v7  ;;  %v2161_v7 = vsel %vm1793_vm6, %v2158_v55, %v2160_v53 }
 0x19a   : > { %3864 = vmatmul.msk.bf16.gmra.mxu2 %vm525_vm2, %v2159_v58  ;;  %v4781_v24 = vadd.f32 %v1713_v63, %v1403_v52  ;;  %v4108_v63 = vld [vmem:[%s4192_s6 + $0x20] sm:$0xff]  ;;  %v2438_v58 = vrot.slane %v2436_v16, 2  ;;  %v2767_v16 = vrot.slane %v4757_v27, 3 }
 0x19b   : > { %3902 = vmatmul.msk.bf16.gmra.mxu0 %vm525_vm2, %v2764_v47  ;;  %v1799_v23 = vrot.slane %v4108_v63, 2 }
 0x19c   : > { %3885 = vmatmul.msk.bf16.gmra.mxu3 %vm525_vm2, %v2434_v56  ;;  %v2442_v2 = vor.u32 %v2441_v54, %v2438_v58 }
 0x19d   : > { %v986_v49 = vpop.f32.mrf.mxu2  ;;  %v1800_v41 = vsel %vm1793_vm6, %v1797_v48, %v1799_v23 }
 0x19e   : > { %v1043_v45 = vadd.f32 %v986_v49, %v787_v13  ;;  %v788_v28 = vpop.f32.mrf.mxu1  ;;  %v2443_v13 = vsel %vm2390_vm5, %v2433_v5, %v2442_v2 }
 0x19f   : > { %v789_v33 = vadd.f32 %v788_v28, %v4443_v25  ;;  %v3067_v28 = vld [vmem:[%s5400_s2 + $0x30] sm:$0xff] }
 0x1a0   : > { %v1404_v20 = vadd.f32 %v1347_v51, %v1043_v45  ;;  %v1718_v32 = vpop.f32.mrf.mxu0  ;;  %v1357_v42 = vpop.f32.mrf.mxu3  ;;  %3129 = vperm.xlu0 %4100, %v3067_v28  }
 0x1a2   : > { %v4790_v61 = vadd.f32 %v1716_v8, %v1404_v20  ;;  %v2766_v8 = vsel %vm2759_vm7, %v2763_v6, %v2765_v36  ;;  %v4811_v6 = vld [vmem:[%s4192_s6 + $0x40] sm:$0xff] }
 0x1a3   : > { %v2445_v63 = vshrl.u32 %v4811_v6, 16  ;;  %v2448_v5 = vshll.u32 %v4811_v6, 16 }
 0x1a5   : > { %v988_v22 = vpop.f32.mrf.mxu2  ;;  %v2450_v58 = vrot.slane %v2448_v5, 3 }
 0x1a6   : > { %v1044_v51 = vadd.f32 %v988_v22, %v789_v33  ;;  %v791_v1 = vpop.f32.mrf.mxu1 }
 0x1a7   : > { %v792_v48 = vadd.f32 %v791_v1, %v4458_v39  ;;  %v4109_v39 = vld [vmem:[%s4192_s6 + $0x28] sm:$0xff] }
 0x1a8   : > { %v1405_v62 = vadd.f32 %v1349_v43, %v1044_v51  ;;  %v1721_v52 = vpop.f32.mrf.mxu0  ;;  %v4807_v47 = vpop.f32.mrf.mxu3  ;;  %v1801_v20 = vrot.slane %v4109_v39, 2 }
 0x1a9   : > { %3778 = vmatmul.msk.bf16.gmra.mxu1 %vm525_vm2, %v1800_v41 }
 0x1aa   : > { %3865 = vmatmul.msk.bf16.gmra.mxu2 %vm525_vm2, %v2161_v7  ;;  %v4803_v25 = vadd.f32 %v1718_v32, %v1405_v62  ;;  %v2162_v32 = vrot.slane %v4757_v27, 2  ;;  %v1802_v1 = vsel %vm1793_vm6, %v1799_v23, %v1801_v20  ;;  %v2447_v7 = vrot.slane %v2445_v63, 2  ;;  %v3068_v27 = vld [vmem:[%s5400_s2 + $0x38] sm:$0xff] }
 0x1ab   : > { %3903 = vmatmul.msk.bf16.gmra.mxu0 %vm525_vm2, %v2766_v8  ;;  %3134 = vperm.xlu1 %4101, %v3068_v27   ;;  %v2164_v63 = vrot.slane %v4787_v4, 2 }
 0x1ac   : > { %3886 = vmatmul.msk.bf16.gmra.mxu3 %vm525_vm2, %v2443_v13  ;;  %v2163_v41 = vsel %vm1793_vm6, %v2160_v53, %v2162_v32 }
 0x1ad   : > { %v991_v55 = vpop.f32.mrf.mxu2 }
 0x1ae   : > { %v1045_v59 = vadd.f32 %v991_v55, %v792_v48  ;;  %v793_v43 = vpop.f32.mrf.mxu1 }
 0x1b0   : > { %v1406_v49 = vadd.f32 %v1352_v40, %v1045_v59  ;;  %v1723_v45 = vpop.f32.mrf.mxu0  ;;  %v794_v40 = vadd.f32 %v793_v43, %v4469_v50  ;;  %v4825_v33 = vpop.f32.mrf.mxu3  ;;  %v3065_v50 = vld [vmem:[%s5400_s2 + $0x20] sm:$0xff]  ;;  %v4846_v43 = vld [vmem:[%s4192_s6 + $0x48] sm:$0xff] }
 0x1b1   : > { %3119 = vperm.xlu2 %4102, %v3065_v50   ;;  %v2454_v5 = vshrl.u32 %v4846_v43, 16 }
 0x1b2   : > { %v4817_v56 = vadd.f32 %v1721_v52, %v1406_v49  ;;  %v2768_v52 = vsel %vm2759_vm7, %v2765_v36, %v2767_v16 }
 0x1b5   : > { %v993_v19 = vpop.f32.mrf.mxu2 }
 0x1b6   : > { %v1046_v22 = vadd.f32 %v993_v19, %v794_v40  ;;  %v796_v51 = vpop.f32.mrf.mxu1  ;;  %v2769_v40 = vrot.slane %v4787_v4, 3 }
 0x1b7   : > { %v797_v53 = vadd.f32 %v796_v51, %v4484_v3  ;;  %v4110_v3 = vld [vmem:[%s4192_s6 + $0x30] sm:$0xff] }
 0x1b8   : > { %v1407_v54 = vadd.f32 %v1354_v21, %v1046_v22  ;;  %v1726_v62 = vpop.f32.mrf.mxu0  ;;  %v2451_v21 = vor.u32 %v2450_v58, %v2447_v7  ;;  %v4842_v8 = vpop.f32.mrf.mxu3  ;;  %v1803_v39 = vrot.slane %v4110_v3, 2  ;;  %v2165_v7 = vsel %vm1793_vm6, %v2162_v32, %v2164_v63  ;;  %v4111_v3 = vld [vmem:[%s4192_s6 + $0x38] sm:$0xff] }
 0x1b9   : > { %3779 = vmatmul.msk.bf16.gmra.mxu1 %vm525_vm2, %v1802_v1  ;;  %v2456_v58 = vrot.slane %v2454_v5, 2  ;;  %v2770_v50 = vsel %vm2759_vm7, %v2767_v16, %v2769_v40  ;;  %v1805_v5 = vrot.slane %v4111_v3, 2 }
 0x1ba   : > { %3866 = vmatmul.msk.bf16.gmra.mxu2 %vm525_vm2, %v2163_v41  ;;  %v4838_v23 = vadd.f32 %v1723_v45, %v1407_v54  ;;  %v2452_v59 = vsel %vm2390_vm5, %v2442_v2, %v2451_v21  ;;  %v3066_v45 = vld [vmem:[%s5400_s2 + $0x28] sm:$0xff]  ;;  %v2457_v2 = vshll.u32 %v4846_v43, 16  ;;  %v1804_v41 = vsel %vm1793_vm6, %v1801_v20, %v1803_v39 }
 0x1bb   : > { %3904 = vmatmul.msk.bf16.gmra.mxu0 %vm525_vm2, %v2768_v52  ;;  %3124 = vperm.xlu2 %4102, %v3066_v45  }
 0x1bc   : > { %3887 = vmatmul.msk.bf16.gmra.mxu3 %vm525_vm2, %v2452_v59  ;;  %v2459_v54 = vrot.slane %v2457_v2, 3  ;;  %v2166_v2 = vrot.slane %v4811_v6, 2 }
 0x1bd   : > { %v996_v36 = vpop.f32.mrf.mxu2 }
 0x1be   : > { %v1047_v48 = vadd.f32 %v996_v36, %v797_v53  ;;  %v798_v55 = vpop.f32.mrf.mxu1  ;;  %v2460_v20 = vor.u32 %v2459_v54, %v2456_v58  ;;  %v1806_v54 = vsel %vm1793_vm6, %v1803_v39, %v1805_v5 }
 0x1c0   : > { %v1408_v13 = vadd.f32 %v1357_v42, %v1047_v48  ;;  %v1728_v49 = vpop.f32.mrf.mxu0  ;;  %v799_v42 = vadd.f32 %v798_v55, %v4495_v15  ;;  %v1367_v22 = vpop.f32.mrf.mxu3  ;;  %v3070_v15 = vld [vmem:[%s5400_s2 + $0x48] sm:$0xff]  ;;  %v2461_v48 = vsel %vm2390_vm5, %v2451_v21, %v2460_v20  ;;  %v4877_v55 = vld [vmem:[%s4192_s6 + $0x50] sm:$0xff] }
 0x1c1   : > { %3144 = vperm.xlu0 %4100, %v3070_v15   ;;  %v2463_v21 = vshrl.u32 %v4877_v55, 16 }
 0x1c2   : > { %v4852_v28 = vadd.f32 %v1726_v62, %v1408_v13 }
 0x1c5   : > { %v998_v19 = vpop.f32.mrf.mxu2 }
 0x1c6   : > { %v1048_v51 = vadd.f32 %v998_v19, %v799_v42  ;;  %v801_v1 = vpop.f32.mrf.mxu1  ;;  %v2466_v42 = vshll.u32 %v4877_v55, 16  ;;  %v5420_v19 = vld [vmem:[#allocation9_spill] sm:$0xff] }
 0x1c8   : > { %v1409_v62 = vadd.f32 %v4807_v47, %v1048_v51  ;;  %v1731_v52 = vpop.f32.mrf.mxu0  ;;  %v5419_v47 = vld [vmem:[#allocation8_spill] sm:$0xff]  ;;  %v4873_v53 = vpop.f32.mrf.mxu3  ;;  %v2771_v51 = vrot.slane %v4811_v6, 3  ;;  %v3069_v6 = vld [vmem:[%s5400_s2 + $0x40] sm:$0xff] }
 0x1c9   : > { %3780 = vmatmul.msk.bf16.gmra.mxu1 %vm525_vm2, %v1804_v41  ;;  %v802_v32 = vadd.f32 %v801_v1, %v5419_v47  ;;  %3139 = vperm.xlu2 %4102, %v3069_v6  }
 0x1ca   : > { %3867 = vmatmul.msk.bf16.gmra.mxu2 %vm525_vm2, %v2165_v7  ;;  %v4869_v4 = vadd.f32 %v1728_v49, %v1409_v62  ;;  %v3071_v49 = vld [vmem:[%s5400_s2 + $0x50] sm:$0xff]  ;;  %v2167_v62 = vsel %vm1793_vm6, %v2164_v63, %v2166_v2 }
 0x1cb   : > { %3905 = vmatmul.msk.bf16.gmra.mxu0 %vm525_vm2, %v2770_v50  ;;  %3149 = vperm.xlu1 %4101, %v3071_v49   ;;  %v2468_v50 = vrot.slane %v2466_v42, 3  ;;  %v4909_v49 = vld [vmem:[%s4192_s6 + $0x58] sm:$0xff] }
 0x1cc   : > { %3888 = vmatmul.msk.bf16.gmra.mxu3 %vm525_vm2, %v2461_v48 }
 0x1cd   : > { %v1001_v27 = vpop.f32.mrf.mxu2 }
 0x1ce   : > { %v1049_v16 = vadd.f32 %v1001_v27, %v802_v32  ;;  %v803_v36 = vpop.f32.mrf.mxu1  ;;  %v2772_v32 = vsel %vm2759_vm7, %v2769_v40, %v2771_v51 }
 0x1d0   : > { %v1410_v59 = vadd.f32 %v4825_v33, %v1049_v16  ;;  %v1733_v13 = vpop.f32.mrf.mxu0  ;;  %v804_v33 = vadd.f32 %v803_v36, %v5420_v19  ;;  %v1372_v41 = vpop.f32.mrf.mxu3  ;;  %v4112_v19 = vld [vmem:[%s4192_s6 + $0x40] sm:$0xff] }
 0x1d2   : > { %v4884_v45 = vadd.f32 %v1731_v52, %v1410_v59  ;;  %v2465_v52 = vrot.slane %v2463_v21, 2 }
 0x1d4   : > { %v2469_v63 = vor.u32 %v2468_v50, %v2465_v52 }
 0x1d5   : > { %v1003_v1 = vpop.f32.mrf.mxu2 }
 0x1d6   : > { %v1050_v7 = vadd.f32 %v1003_v1, %v804_v33  ;;  %v806_v58 = vpop.f32.mrf.mxu1  ;;  %v2470_v59 = vsel %vm2390_vm5, %v2460_v20, %v2469_v63  ;;  %v1807_v33 = vrot.slane %v4112_v19, 2  ;;  %v2168_v1 = vrot.slane %v4846_v43, 2 }
 0x1d7   : > { %v2475_v20 = vshll.u32 %v4909_v49, 16 }
 0x1d8   : > { %v1411_v15 = vadd.f32 %v4842_v8, %v1050_v7  ;;  %v1736_v47 = vpop.f32.mrf.mxu0  ;;  %v5421_v8 = vld [vmem:[#allocation2_spill] sm:$0xff]  ;;  %v4905_v36 = vpop.f32.mrf.mxu3  ;;  %v2472_v7 = vshrl.u32 %v4909_v49, 16 }
 0x1d9   : > { %3781 = vmatmul.msk.bf16.gmra.mxu1 %vm525_vm2, %v1806_v54  ;;  %v807_v27 = vadd.f32 %v806_v58, %v5421_v8  ;;  %v5422_v58 = vld [vmem:[#allocation3_spill] sm:$0xff]  ;;  %v2773_v54 = vrot.slane %v4846_v43, 3  ;;  %v2477_v8 = vrot.slane %v2475_v20, 3 }
 0x1da   : > { %3868 = vmatmul.msk.bf16.gmra.mxu2 %vm525_vm2, %v2167_v62  ;;  %v4901_v39 = vadd.f32 %v1733_v13, %v1411_v15  ;;  %v3073_v13 = vld [vmem:[%s5400_s2 + $0x60] sm:$0xff]  ;;  %v2474_v6 = vrot.slane %v2472_v7, 2  ;;  %v3074_v43 = vld [vmem:[%s5400_s2 + $0x68] sm:$0xff] }
 0x1db   : > { %3906 = vmatmul.msk.bf16.gmra.mxu0 %vm525_vm2, %v2772_v32  ;;  %3159 = vperm.xlu0 %4100, %v3073_v13   ;;  %v1808_v32 = vsel %vm1793_vm6, %v1805_v5, %v1807_v33  ;;  %v4940_v7 = vld [vmem:[%s4192_s6 + $0x60] sm:$0xff] }
 0x1dc   : > { %3889 = vmatmul.msk.bf16.gmra.mxu3 %vm525_vm2, %v2470_v59  ;;  %3164 = vperm.xlu1 %4101, %v3074_v43  }
 0x1dd   : > { %v1006_v16 = vpop.f32.mrf.mxu2 }
 0x1de   : > { %v1051_v40 = vadd.f32 %v1006_v16, %v807_v27  ;;  %v808_v48 = vpop.f32.mrf.mxu1 }
 0x1e0   : > { %v1412_v3 = vadd.f32 %v1367_v22, %v1051_v40  ;;  %v1738_v21 = vpop.f32.mrf.mxu0  ;;  %v809_v22 = vadd.f32 %v808_v48, %v5422_v58  ;;  %v1377_v52 = vpop.f32.mrf.mxu3  ;;  %v2774_v40 = vsel %vm2759_vm7, %v2771_v51, %v2773_v54 }
 0x1e2   : > { %v4915_v42 = vadd.f32 %v1736_v47, %v1412_v3  ;;  %v2169_v47 = vsel %vm1793_vm6, %v2166_v2, %v2168_v1  ;;  %v2478_v2 = vor.u32 %v2477_v8, %v2474_v6  ;;  %v2775_v6 = vrot.slane %v4877_v55, 3 }
 0x1e4   : > { %v2479_v19 = vsel %vm2390_vm5, %v2469_v63, %v2478_v2  ;;  %v2484_v63 = vshll.u32 %v4940_v7, 16 }
 0x1e5   : > { %v1008_v62 = vpop.f32.mrf.mxu2 }
 0x1e6   : > { %v1052_v50 = vadd.f32 %v1008_v62, %v809_v22  ;;  %v811_v15 = vpop.f32.mrf.mxu1  ;;  %v4113_v62 = vld [vmem:[%s4192_s6 + $0x48] sm:$0xff] }
 0x1e8   : > { %v1413_v27 = vadd.f32 %v4873_v53, %v1052_v50  ;;  %v1741_v16 = vpop.f32.mrf.mxu0  ;;  %v5423_v53 = vld [vmem:[#allocation4_spill] sm:$0xff]  ;;  %v4936_v3 = vpop.f32.mrf.mxu3  ;;  %v1809_v50 = vrot.slane %v4113_v62, 2 }
 0x1e9   : > { %3782 = vmatmul.msk.bf16.gmra.mxu1 %vm525_vm2, %v1808_v32  ;;  %v812_v48 = vadd.f32 %v811_v15, %v5423_v53  ;;  %v2170_v15 = vrot.slane %v4877_v55, 2  ;;  %v2481_v32 = vshrl.u32 %v4940_v7, 16  ;;  %v3076_v55 = vld [vmem:[%s5400_s2 + $0x78] sm:$0xff] }
 0x1ea   : > { %3869 = vmatmul.msk.bf16.gmra.mxu2 %vm525_vm2, %v2169_v47  ;;  %v4932_v5 = vadd.f32 %v1738_v21, %v1413_v27  ;;  %v3072_v21 = vld [vmem:[%s5400_s2 + $0x58] sm:$0xff]  ;;  %3174 = vperm.xlu0 %4100, %v3076_v55  }
 0x1eb   : > { %3907 = vmatmul.msk.bf16.gmra.mxu0 %vm525_vm2, %v2774_v40  ;;  %3154 = vperm.xlu2 %4102, %v3072_v21   ;;  %v5424_v47 = vld [vmem:[#allocation5_spill] sm:$0xff]  ;;  %v2171_v53 = vsel %vm1793_vm6, %v2168_v1, %v2170_v15 }
 0x1ec   : > { %3890 = vmatmul.msk.bf16.gmra.mxu3 %vm525_vm2, %v2479_v19 }
 0x1ed   : > { %v1011_v59 = vpop.f32.mrf.mxu2 }
 0x1ee   : > { %v1053_v51 = vadd.f32 %v1011_v59, %v812_v48  ;;  %v813_v13 = vpop.f32.mrf.mxu1  ;;  %v2483_v48 = vrot.slane %v2481_v32, 2  ;;  %v2486_v59 = vrot.slane %v2484_v63, 3 }
 0x1f0   : > { %v1414_v20 = vadd.f32 %v1372_v41, %v1053_v51  ;;  %v1743_v58 = vpop.f32.mrf.mxu0  ;;  %v814_v41 = vadd.f32 %v813_v13, %v5424_v47  ;;  %v4954_v27 = vpop.f32.mrf.mxu3  ;;  %v2487_v1 = vor.u32 %v2486_v59, %v2483_v48  ;;  %v4973_v47 = vld [vmem:[%s4192_s6 + $0x68] sm:$0xff] }
 0x1f1   : > { %v2490_v48 = vshrl.u32 %v4973_v47, 16  ;;  %v5426_v59 = vld [vmem:[#allocation7_spill] sm:$0xff] }
 0x1f2   : > { %v4946_v22 = vadd.f32 %v1741_v16, %v1414_v20  ;;  %v1810_v16 = vsel %vm1793_vm6, %v1807_v33, %v1809_v50  ;;  %v2776_v20 = vsel %vm2759_vm7, %v2773_v54, %v2775_v6  ;;  %v2488_v63 = vsel %vm2390_vm5, %v2478_v2, %v2487_v1 }
 0x1f3   : > { %v2493_v2 = vshll.u32 %v4973_v47, 16 }
 0x1f5   : > { %v1013_v8 = vpop.f32.mrf.mxu2 }
 0x1f6   : > { %v1054_v40 = vadd.f32 %v1013_v8, %v814_v41  ;;  %v816_v43 = vpop.f32.mrf.mxu1 }
 0x1f8   : > { %v1415_v51 = vadd.f32 %v4905_v36, %v1054_v40  ;;  %v1746_v19 = vpop.f32.mrf.mxu0  ;;  %v5425_v36 = vld [vmem:[#allocation6_spill] sm:$0xff]  ;;  %v4969_v62 = vpop.f32.mrf.mxu3 }
 0x1f9   : > { %3783 = vmatmul.msk.bf16.gmra.mxu1 %vm525_vm2, %v1810_v16  ;;  %v817_v13 = vadd.f32 %v816_v43, %v5425_v36  ;;  %v4114_v43 = vld [vmem:[%s4192_s6 + $0x50] sm:$0xff] }
 0x1fa   : > { %3870 = vmatmul.msk.bf16.gmra.mxu2 %vm525_vm2, %v2171_v53  ;;  %v4965_v33 = vadd.f32 %v1743_v58, %v1415_v51  ;;  %v3077_v58 = vld [vmem:[%s5400_s2 + $0x80] sm:$0xff]  ;;  %v1811_v16 = vrot.slane %v4114_v43, 2  ;;  %v2172_v53 = vrot.slane %v4909_v49, 2  ;;  %v2777_v51 = vrot.slane %v4909_v49, 3  ;;  %v3075_v49 = vld [vmem:[%s5400_s2 + $0x70] sm:$0xff] }
 0x1fb   : > { %3908 = vmatmul.msk.bf16.gmra.mxu0 %vm525_vm2, %v2776_v20  ;;  %3179 = vperm.xlu1 %4101, %v3077_v58  }
 0x1fc   : > { %3891 = vmatmul.msk.bf16.gmra.mxu3 %vm525_vm2, %v2488_v63  ;;  %v2495_v63 = vrot.slane %v2493_v2, 3  ;;  %v2778_v43 = vsel %vm2759_vm7, %v2775_v6, %v2777_v51  ;;  %3169 = vperm.xlu2 %4102, %v3075_v49  }
 0x1fd   : > { %v1016_v21 = vpop.f32.mrf.mxu2 }
 0x1fe   : > { %v1055_v54 = vadd.f32 %v1016_v21, %v817_v13  ;;  %v818_v32 = vpop.f32.mrf.mxu1  ;;  %v2173_v21 = vsel %vm1793_vm6, %v2170_v15, %v2172_v53 }
 0x200   : > { %v1416_v41 = vadd.f32 %v1377_v52, %v1055_v54  ;;  %v1748_v8 = vpop.f32.mrf.mxu0  ;;  %v819_v52 = vadd.f32 %v818_v32, %v5426_v59  ;;  %v4987_v55 = vpop.f32.mrf.mxu3  ;;  %v2492_v54 = vrot.slane %v2490_v48, 2 }
 0x201   : > { %v3100_v59 = vpop.permute.xlu0 %3099 }
 0x202   : > { %v4979_v40 = vadd.f32 %v1746_v19, %v1416_v41  ;;  %v1812_v19 = vsel %vm1793_vm6, %v1809_v50, %v1811_v16  ;;  %v2496_v15 = vor.u32 %v2495_v63, %v2492_v54 }
 0x205   : > { %v1018_v20 = vpop.f32.mrf.mxu2 }
 0x206   : > { %v1056_v36 = vadd.f32 %v1018_v20, %v819_v52  ;;  %v1897_v13 = vpop.f32.mrf.mxu1  ;;  %v2497_v52 = vsel %vm2390_vm5, %v2487_v1, %v2496_v15  ;;  %v5006_v20 = vld [vmem:[%s4192_s6 + $0x70] sm:$0xff] }
 0x207   : > { %v2499_v1 = vshrl.u32 %v5006_v20, 16  ;;  %v2502_v54 = vshll.u32 %v5006_v20, 16 }
 0x208   : > { %v1417_v41 = vadd.f32 %v4936_v3, %v1056_v36  ;;  %v2863_v58 = vpop.f32.mrf.mxu0  ;;  %v1987_v3 = vadd.f32 %v1897_v13, %v4529_v34  ;;  %v5002_v48 = vpop.f32.mrf.mxu3  ;;  %v5014_v34 = vld [vmem:[%s4192_s6 + $0x58] sm:$0xff] }
 0x209   : > { %3784 = vmatmul.msk.bf16.gmra.mxu1 %vm525_vm2, %v1812_v19  ;;  %v1813_v13 = vrot.slane %v5014_v34, 2  ;;  %v5428_v34 = vrot.slane %v4940_v7, 3 }
 0x20a   : > { %3871 = vmatmul.msk.bf16.gmra.mxu2 %vm525_vm2, %v2173_v21  ;;  %v4998_v50 = vadd.f32 %v1748_v8, %v1417_v41  ;;  %v3079_v8 = vld [vmem:[%s5400_s2 + $0x90] sm:$0xff]  ;;  %v2174_v21 = vrot.slane %v4940_v7, 2  ;;  %v5406_v41 = vrot.slane %v4940_v7, 3  ;;  %v3088_v7 = vld [vmem:[%s5400_s2 + $0xd8] sm:$0xff] }
 0x20b   : > { %3909 = vmatmul.msk.bf16.gmra.mxu0 %vm525_vm2, %v2778_v43  ;;  %3189 = vperm.xlu0 %4100, %v3079_v8   ;;  %v2504_v8 = vrot.slane %v2502_v54, 3 }
 0x20c   : > { %5427 = vst [vmem:[#allocation8_spill] sm:$0xff] %v4998_v50  ;;  %3892 = vmatmul.msk.bf16.gmra.mxu3 %vm525_vm2, %v2497_v52  ;;  %v1814_v52 = vsel %vm1793_vm6, %v1811_v16, %v1813_v13 }
 0x20d   : > { %v2258_v32 = vpop.f32.mrf.mxu2 }
 0x20e   : > { %v2348_v6 = vadd.f32 %v2258_v32, %v1987_v3  ;;  %v1899_v2 = vpop.f32.mrf.mxu1  ;;  %v3080_v32 = vld [vmem:[%s5400_s2 + $0x98] sm:$0xff] }
 0x20f   : > { %v1988_v63 = vadd.f32 %v1899_v2, %v4539_v26  ;;  %v2175_v26 = vsel %vm1793_vm6, %v2172_v53, %v2174_v21  ;;  %v2501_v2 = vrot.slane %v2499_v1, 2  ;;  %3194 = vperm.xlu1 %4101, %v3080_v32   ;;  %v3082_v1 = vld [vmem:[%s5400_s2 + $0xa8] sm:$0xff] }
 0x210   : > { %v2865_v36 = vpop.f32.mrf.mxu0  ;;  %v2717_v19 = vadd.f32 %v4954_v27, %v2348_v6  ;;  %v5022_v49 = vpop.f32.mrf.mxu3 }
 0x212   : > { %v2953_v27 = vadd.f32 %v2863_v58, %v2717_v19 }
 0x213   : > { %3204 = vperm.xlu0 %4100, %v3082_v1  }
 0x214   : > { %v3277_v50 = vmul.f32 %v3100_v59, %v2953_v27 }
 0x215   : > { %v2260_v43 = vpop.f32.mrf.mxu2 }
 0x216   : > { %v2349_v3 = vadd.f32 %v2260_v43, %v1988_v63  ;;  %v1902_v6 = vpop.f32.mrf.mxu1  ;;  %v2780_v63 = vsel %vm2759_vm7, %v2777_v51, %v5406_v41  ;;  %v3105_v43 = vpop.permute.xlu0 %3104 }
 0x217   : > { %v1989_v53 = vadd.f32 %v1902_v6, %v4545_v18  ;;  %v3083_v18 = vld [vmem:[%s5400_s2 + $0xb0] sm:$0xff] }
 0x218   : > { %v2718_v58 = vadd.f32 %v4969_v62, %v2349_v3  ;;  %v2868_v19 = vpop.f32.mrf.mxu0  ;;  %v5046_v62 = vor.u32 %v2504_v8, %v2501_v2  ;;  %v5052_v54 = vpop.f32.mrf.mxu3  ;;  %v3355_v3 = vmul.f32 %v3277_v50, %v2953_v27  ;;  %3209 = vperm.xlu1 %4101, %v3083_v18  }
 0x219   : > { %3785 = vmatmul.msk.bf16.gmra.mxu1 %vm525_vm2, %v1814_v52  ;;  %v3110_v2 = vpop.permute.xlu1 %3109 }
 0x21a   : > { %3872 = vmatmul.msk.bf16.gmra.mxu2 %vm525_vm2, %v2175_v26  ;;  %v2954_v16 = vadd.f32 %v2865_v36, %v2718_v58  ;;  %v2506_v8 = vsel %vm2390_vm5, %v2496_v15, %v5046_v62  ;;  %v5061_v58 = vld [vmem:[%s4192_s6 + $0x78] sm:$0xff]  ;;  %v2176_v15 = vrot.slane %v4973_v47, 2 }
 0x21b   : > { %3910 = vmatmul.msk.bf16.gmra.mxu0 %vm525_vm2, %v2780_v63  ;;  %v2511_v1 = vshll.u32 %v5061_v58, 16 }
 0x21c   : > { %v3979_v51 = vpack.c.bf16 %v2954_v16, %v2953_v27  ;;  %v3278_v59 = vmul.f32 %v3105_v43, %v2954_v16  ;;  %3893 = vmatmul.msk.bf16.gmra.mxu3 %vm525_vm2, %v2506_v8 }
 0x21d   : > { %v2263_v36 = vpop.f32.mrf.mxu2 }
 0x21e   : > { %3980 = vst [vmem:[%s5043_s14] sm:$0xff] %v3979_v51   ;;  %v3313_v32 = vadd.f32 %v3278_v59, %v3277_v50  ;;  %v3356_v52 = vmul.f32 %v3278_v59, %v2954_v16  ;;  %v2350_v26 = vadd.f32 %v2263_v36, %v1989_v53  ;;  %v1904_v6 = vpop.f32.mrf.mxu1  ;;  %v3078_v50 = vld [vmem:[%s5400_s2 + $0x88] sm:$0xff]  ;;  %v5069_v53 = vld [vmem:[%s4192_s6 + $0x60] sm:$0xff]  ;;  %v2508_v59 = vshrl.u32 %v5061_v58, 16 }
 0x21f   : > { %3184 = vperm.xlu2 %4102, %v3078_v50   ;;  %v1815_v51 = vrot.slane %v5069_v53, 2  ;;  %v3086_v50 = vld [vmem:[%s5400_s2 + $0xc8] sm:$0xff] }
 0x220   : > { %v3391_v63 = vadd.f32 %v3356_v52, %v3355_v3  ;;  %v2719_v27 = vadd.f32 %v4987_v55, %v2350_v26  ;;  %v2870_v43 = vpop.f32.mrf.mxu0  ;;  %v1990_v55 = vadd.f32 %v1904_v6, %v4555_v30  ;;  %v2781_v3 = vrot.slane %v4973_v47, 3  ;;  %v5080_v26 = vpop.f32.mrf.mxu3  ;;  %3224 = vperm.xlu1 %4101, %v3086_v50  }
 0x221   : > { %v1816_v30 = vsel %vm1793_vm6, %v1813_v13, %v1815_v51  ;;  %v2177_v6 = vsel %vm1793_vm6, %v2174_v21, %v2176_v15 }
 0x222   : > { %v2955_v16 = vadd.f32 %v2868_v19, %v2719_v27  ;;  %v3085_v19 = vld [vmem:[%s5400_s2 + $0xc0] sm:$0xff]  ;;  %v2782_v13 = vsel %vm2759_vm7, %v5428_v34, %v2781_v3 }
 0x223   : > { %3219 = vperm.xlu0 %4100, %v3085_v19   ;;  %v3081_v34 = vld [vmem:[%s5400_s2 + $0xa0] sm:$0xff] }
 0x224   : > { %v3279_v36 = vmul.f32 %v3110_v2, %v2955_v16  ;;  %v2513_v2 = vrot.slane %v2511_v1, 3 }
 0x225   : > { %v2265_v52 = vpop.f32.mrf.mxu2 }
 0x226   : > { %v3314_v18 = vadd.f32 %v3313_v32, %v3279_v36  ;;  %v3357_v8 = vmul.f32 %v3279_v36, %v2955_v16  ;;  %v2351_v27 = vadd.f32 %v2265_v52, %v1990_v55  ;;  %v1907_v41 = vpop.f32.mrf.mxu1  ;;  %v2510_v32 = vrot.slane %v2508_v59, 2  ;;  %v3115_v52 = vpop.permute.xlu1 %3114 }
 0x227   : > { %3199 = vperm.xlu2 %4102, %v3081_v34  }
 0x228   : > { %v3392_v55 = vadd.f32 %v3391_v63, %v3357_v8  ;;  %v2720_v36 = vadd.f32 %v5002_v48, %v2351_v27  ;;  %v2873_v19 = vpop.f32.mrf.mxu0  ;;  %v5104_v59 = vor.u32 %v2513_v2, %v2510_v32  ;;  %v1991_v48 = vadd.f32 %v1907_v41, %v4561_v60  ;;  %v5110_v27 = vpop.f32.mrf.mxu3  ;;  %v3089_v60 = vld [vmem:[%s5400_s2 + $0xe0] sm:$0xff] }
 0x229   : > { %3786 = vmatmul.msk.bf16.gmra.mxu1 %vm525_vm2, %v1816_v30  ;;  %3239 = vperm.xlu1 %4101, %v3089_v60   ;;  %v5120_v32 = vld [vmem:[%s4192_s6 + $0x80] sm:$0xff] }
 0x22a   : > { %3873 = vmatmul.msk.bf16.gmra.mxu2 %vm525_vm2, %v2177_v6  ;;  %v2956_v21 = vadd.f32 %v2870_v43, %v2720_v36  ;;  %v2515_v6 = vsel %vm2390_vm5, %v5046_v62, %v5104_v59  ;;  %v2178_v62 = vrot.slane %v5006_v20, 2 }
 0x22b   : > { %3911 = vmatmul.msk.bf16.gmra.mxu0 %vm525_vm2, %v2782_v13  ;;  %3234 = vperm.xlu0 %4100, %v3088_v7  }
 0x22c   : > { %v3984_v63 = vpack.c.bf16 %v2956_v21, %v2955_v16  ;;  %v3280_v1 = vmul.f32 %v3115_v52, %v2956_v21  ;;  %v3120_v16 = vpop.permute.xlu2 %3119  ;;  %3894 = vmatmul.msk.bf16.gmra.mxu3 %vm525_vm2, %v2515_v6  ;;  %v5128_v52 = vld [vmem:[%s4192_s6 + $0x68] sm:$0xff]  ;;  %v3092_v6 = vld [vmem:[%s5400_s2 + $0xf8] sm:$0xff] }
 0x22d   : > { %v2268_v8 = vpop.f32.mrf.mxu2 }
 0x22e   : > { %4069 = vst [vmem:[%s5043_s14 + $0x8] sm:$0xff] %v3984_v63   ;;  %v3315_v50 = vadd.f32 %v3314_v18, %v3280_v1  ;;  %v3358_v43 = vmul.f32 %v3280_v1, %v2956_v21  ;;  %v2352_v30 = vadd.f32 %v2268_v8, %v1991_v48  ;;  %v1909_v41 = vpop.f32.mrf.mxu1  ;;  %v1817_v21 = vrot.slane %v5128_v52, 2 }
 0x22f   : > { %v2517_v48 = vshrl.u32 %v5120_v32, 16  ;;  %v2783_v1 = vrot.slane %v5006_v20, 3 }
 0x230   : > { %v3393_v2 = vadd.f32 %v3392_v55, %v3358_v43  ;;  %v2721_v36 = vadd.f32 %v5022_v49, %v2352_v30  ;;  %v2875_v18 = vpop.f32.mrf.mxu0  ;;  %v2520_v55 = vshll.u32 %v5120_v32, 16  ;;  %v1992_v49 = vadd.f32 %v1909_v41, %v4571_v37  ;;  %v5139_v8 = vpop.f32.mrf.mxu3 }
 0x231   : > { %v1818_v37 = vsel %vm1793_vm6, %v1815_v51, %v1817_v21  ;;  %v2179_v41 = vsel %vm1793_vm6, %v2176_v15, %v2178_v62  ;;  %3254 = vperm.xlu1 %4101, %v3092_v6   ;;  %v2784_v53 = vsel %vm2759_vm7, %v2781_v3, %v2783_v1  ;;  %v3084_v51 = vld [vmem:[%s5400_s2 + $0xb8] sm:$0xff]  ;;  %v3095_v6 = vld [vmem:[%s5400_s2 + $0x110] sm:$0xff] }
 0x232   : > { %v2957_v13 = vadd.f32 %v2873_v19, %v2721_v36  ;;  %v3091_v19 = vld [vmem:[%s5400_s2 + $0xf0] sm:$0xff]  ;;  %3214 = vperm.xlu2 %4102, %v3084_v51   ;;  %v2180_v51 = vrot.slane %v5061_v58, 2 }
 0x233   : > { %3249 = vperm.xlu0 %4100, %v3091_v19  }
 0x234   : > { %v3281_v63 = vmul.f32 %v3120_v16, %v2957_v13  ;;  %v2522_v16 = vrot.slane %v2520_v55, 3  ;;  %v3125_v19 = vpop.permute.xlu2 %3124 }
 0x235   : > { %v2270_v7 = vpop.f32.mrf.mxu2 }
 0x236   : > { %v3316_v43 = vadd.f32 %v3315_v50, %v3281_v63  ;;  %v3359_v30 = vmul.f32 %v3281_v63, %v2957_v13  ;;  %v2353_v60 = vadd.f32 %v2270_v7, %v1992_v49  ;;  %v1912_v36 = vpop.f32.mrf.mxu1  ;;  %v2519_v50 = vrot.slane %v2517_v48, 2  ;;  %v3094_v48 = vld [vmem:[%s5400_s2 + $0x108] sm:$0xff] }
 0x237   : > { %v1993_v47 = vadd.f32 %v1912_v36, %v4577_v10  ;;  %v5182_v36 = vld [vmem:[%s4192_s6 + $0x88] sm:$0xff] }
 0x238   : > { %v3394_v34 = vadd.f32 %v3393_v2, %v3359_v30  ;;  %v2722_v49 = vadd.f32 %v5052_v54, %v2353_v60  ;;  %v2878_v63 = vpop.f32.mrf.mxu0  ;;  %v5166_v54 = vor.u32 %v2522_v16, %v2519_v50  ;;  %v5172_v7 = vpop.f32.mrf.mxu3 }
 0x239   : > { %3787 = vmatmul.msk.bf16.gmra.mxu1 %vm525_vm2, %v1818_v37  ;;  %3269 = vperm.xlu1 %4101, %v3095_v6   ;;  %v3130_v16 = vpop.permute.xlu0 %3129 }
 0x23a   : > { %3874 = vmatmul.msk.bf16.gmra.mxu2 %vm525_vm2, %v2179_v41  ;;  %v2958_v15 = vadd.f32 %v2875_v18, %v2722_v49 }
 0x23b   : > { %3912 = vmatmul.msk.bf16.gmra.mxu0 %vm525_vm2, %v2784_v53  ;;  %3264 = vperm.xlu0 %4100, %v3094_v48   ;;  %v5190_v53 = vld [vmem:[%s4192_s6 + $0x70] sm:$0xff] }
 0x23c   : > { %v3989_v3 = vpack.c.bf16 %v2958_v15, %v2957_v13  ;;  %v3282_v2 = vmul.f32 %v3125_v19, %v2958_v15  ;;  %v2524_v13 = vsel %vm2390_vm5, %v5104_v59, %v5166_v54  ;;  %v1819_v59 = vrot.slane %v5190_v53, 2  ;;  %v3096_v53 = vld [vmem:[%s5400_s2 + $0x118] sm:$0xff] }
 0x23d   : > { %v2273_v55 = vpop.f32.mrf.mxu2  ;;  %3895 = vmatmul.msk.bf16.gmra.mxu3 %vm525_vm2, %v2524_v13 }
 0x23e   : > { %4070 = vst [vmem:[%s5043_s14 + $0x10] sm:$0xff] %v3989_v3   ;;  %v3317_v30 = vadd.f32 %v3316_v43, %v3282_v2  ;;  %v3360_v18 = vmul.f32 %v3282_v2, %v2958_v15  ;;  %v2354_v60 = vadd.f32 %v2273_v55, %v1993_v47  ;;  %v1914_v10 = vpop.f32.mrf.mxu1  ;;  %v3087_v43 = vld [vmem:[%s5400_s2 + $0xd0] sm:$0xff]  ;;  %v2785_v47 = vrot.slane %v5061_v58, 3 }
 0x23f   : > { %3229 = vperm.xlu2 %4102, %v3087_v43   ;;  %v1994_v19 = vadd.f32 %v1914_v10, %v4587_v0  ;;  %v2181_v0 = vsel %vm1793_vm6, %v2178_v62, %v2180_v51  ;;  %v3135_v43 = vpop.permute.xlu1 %3134 }
 0x240   : > { %v3395_v37 = vadd.f32 %v3394_v34, %v3360_v18  ;;  %v2723_v41 = vadd.f32 %v5080_v26, %v2354_v60  ;;  %v2880_v50 = vpop.f32.mrf.mxu0  ;;  %v2526_v34 = vshrl.u32 %v5182_v36, 16  ;;  %v2529_v26 = vshll.u32 %v5182_v36, 16  ;;  %v5198_v2 = vpop.f32.mrf.mxu3 }
 0x241   : > { %v1820_v60 = vsel %vm1793_vm6, %v1817_v21, %v1819_v59  ;;  %v2786_v52 = vsel %vm2759_vm7, %v2783_v1, %v2785_v47  ;;  %v3090_v21 = vld [vmem:[%s5400_s2 + $0xe8] sm:$0xff] }
 0x242   : > { %v2959_v49 = vadd.f32 %v2878_v63, %v2723_v41  ;;  %v2528_v6 = vrot.slane %v2526_v34, 2  ;;  %v2531_v10 = vrot.slane %v2529_v26, 3 }
 0x244   : > { %v3283_v15 = vmul.f32 %v3130_v16, %v2959_v49  ;;  %v2532_v62 = vor.u32 %v2531_v10, %v2528_v6 }
 0x245   : > { %v2275_v3 = vpop.f32.mrf.mxu2 }
 0x246   : > { %v3318_v63 = vadd.f32 %v3317_v30, %v3283_v15  ;;  %v3361_v48 = vmul.f32 %v3283_v15, %v2959_v49  ;;  %v2355_v55 = vadd.f32 %v2275_v3, %v1994_v19  ;;  %v1917_v18 = vpop.f32.mrf.mxu1 }
 0x247   : > { %3244 = vperm.xlu2 %4102, %v3090_v21  }
 0x248   : > { %v3396_v13 = vadd.f32 %v3395_v37, %v3361_v48  ;;  %v2724_v30 = vadd.f32 %v5110_v27, %v2355_v55  ;;  %v2883_v41 = vpop.f32.mrf.mxu0  ;;  %v1995_v37 = vadd.f32 %v1917_v18, %v4593_v11  ;;  %v5223_v34 = vpop.f32.mrf.mxu3  ;;  %v2533_v48 = vsel %vm2390_vm5, %v5166_v54, %v2532_v62 }
 0x249   : > { %3788 = vmatmul.msk.bf16.gmra.mxu1 %vm525_vm2, %v1820_v60  ;;  %v3140_v18 = vpop.permute.xlu2 %3139  ;;  %v2182_v54 = vrot.slane %v5120_v32, 2 }
 0x24a   : > { %3875 = vmatmul.msk.bf16.gmra.mxu2 %vm525_vm2, %v2181_v0  ;;  %v2960_v27 = vadd.f32 %v2880_v50, %v2724_v30  ;;  %v5229_v50 = vld [vmem:[%s4192_s6 + $0x90] sm:$0xff] }
 0x24b   : > { %3913 = vmatmul.msk.bf16.gmra.mxu0 %vm525_vm2, %v2786_v52  ;;  %v2535_v10 = vshrl.u32 %v5229_v50, 16  ;;  %v2787_v52 = vrot.slane %v5120_v32, 3 }
 0x24c   : > { %v3994_v20 = vpack.c.bf16 %v2960_v27, %v2959_v49  ;;  %v3284_v16 = vmul.f32 %v3135_v43, %v2960_v27  ;;  %v3093_v49 = vld [vmem:[%s5400_s2 + $0x100] sm:$0xff] }
 0x24d   : > { %v2278_v1 = vpop.f32.mrf.mxu2  ;;  %3896 = vmatmul.msk.bf16.gmra.mxu3 %vm525_vm2, %v2533_v48 }
 0x24e   : > { %4071 = vst [vmem:[%s5043_s14 + $0x18] sm:$0xff] %v3994_v20   ;;  %v3319_v26 = vadd.f32 %v3318_v63, %v3284_v16  ;;  %v3362_v19 = vmul.f32 %v3284_v16, %v2960_v27  ;;  %v2356_v15 = vadd.f32 %v2278_v1, %v1995_v37  ;;  %v1919_v3 = vpop.f32.mrf.mxu1  ;;  %v5237_v63 = vld [vmem:[%s4192_s6 + $0x78] sm:$0xff]  ;;  %v2183_v1 = vsel %vm1793_vm6, %v2180_v51, %v2182_v54 }
 0x24f   : > { %3259 = vperm.xlu2 %4102, %v3093_v49   ;;  %v1821_v6 = vrot.slane %v5237_v63, 2 }
 0x250   : > { %v3397_v55 = vadd.f32 %v3396_v13, %v3362_v19  ;;  %v2725_v60 = vadd.f32 %v5139_v8, %v2356_v15  ;;  %v2885_v11 = vpop.f32.mrf.mxu0  ;;  %v2538_v8 = vshll.u32 %v5229_v50, 16  ;;  %v1996_v13 = vadd.f32 %v1919_v3, %v4603_v17  ;;  %v5245_v43 = vpop.f32.mrf.mxu3 }
 0x251   : > { %v1822_v16 = vsel %vm1793_vm6, %v1819_v59, %v1821_v6  ;;  %v2537_v19 = vrot.slane %v2535_v10, 2  ;;  %v3145_v59 = vpop.permute.xlu0 %3144 }
 0x252   : > { %v2961_v0 = vadd.f32 %v2883_v41, %v2725_v60  ;;  %v2540_v17 = vrot.slane %v2538_v8, 3 }
 0x254   : > { %v3285_v30 = vmul.f32 %v3140_v18, %v2961_v0  ;;  %v2541_v51 = vor.u32 %v2540_v17, %v2537_v19 }
 0x255   : > { %v2280_v21 = vpop.f32.mrf.mxu2 }
 0x256   : > { %v3320_v41 = vadd.f32 %v3319_v26, %v3285_v30  ;;  %v3363_v27 = vmul.f32 %v3285_v30, %v2961_v0  ;;  %v2357_v37 = vadd.f32 %v2280_v21, %v1996_v13  ;;  %v1922_v20 = vpop.f32.mrf.mxu1  ;;  %v2788_v26 = vsel %vm2759_vm7, %v2785_v47, %v2787_v52  ;;  %v5271_v30 = vld [vmem:[%s4192_s6 + $0x98] sm:$0xff] }
 0x257   : > { %3274 = vperm.xlu2 %4102, %v3096_v53   ;;  %v2542_v13 = vsel %vm2390_vm5, %v2532_v62, %v2541_v51  ;;  %v2547_v62 = vshll.u32 %v5271_v30, 16 }
 0x258   : > { %v3398_v15 = vadd.f32 %v3397_v55, %v3363_v27  ;;  %v2726_v3 = vadd.f32 %v5172_v7, %v2357_v37  ;;  %v2888_v48 = vpop.f32.mrf.mxu0  ;;  %v1997_v55 = vadd.f32 %v1922_v20, %v4609_v38  ;;  %v5266_v49 = vpop.f32.mrf.mxu3  ;;  %v5276_v37 = vld [vmem:[%s4192_s6 + $0x80] sm:$0xff] }
 0x259   : > { %3789 = vmatmul.msk.bf16.gmra.mxu1 %vm525_vm2, %v1822_v16  ;;  %v3150_v38 = vpop.permute.xlu1 %3149  ;;  %v1823_v20 = vrot.slane %v5276_v37, 2  ;;  %v2544_v16 = vshrl.u32 %v5271_v30, 16 }
 0x25a   : > { %3876 = vmatmul.msk.bf16.gmra.mxu2 %vm525_vm2, %v2183_v1  ;;  %v2962_v7 = vadd.f32 %v2885_v11, %v2726_v3 }
 0x25b   : > { %3914 = vmatmul.msk.bf16.gmra.mxu0 %vm525_vm2, %v2788_v26 }
 0x25c   : > { %v3999_v58 = vpack.c.bf16 %v2962_v7, %v2961_v0  ;;  %v3286_v60 = vmul.f32 %v3145_v59, %v2962_v7  ;;  %v1824_v59 = vsel %vm1793_vm6, %v1821_v6, %v1823_v20 }
 0x25d   : > { %v2283_v47 = vpop.f32.mrf.mxu2  ;;  %3897 = vmatmul.msk.bf16.gmra.mxu3 %vm525_vm2, %v2542_v13 }
 0x25e   : > { %4072 = vst [vmem:[%s5043_s14 + $0x20] sm:$0xff] %v3999_v58   ;;  %v3321_v18 = vadd.f32 %v3320_v41, %v3286_v60  ;;  %v3364_v63 = vmul.f32 %v3286_v60, %v2962_v7  ;;  %v2358_v10 = vadd.f32 %v2283_v47, %v1997_v55  ;;  %v1924_v8 = vpop.f32.mrf.mxu1  ;;  %v2184_v41 = vrot.slane %v5182_v36, 2 }
 0x25f   : > { %v1998_v1 = vadd.f32 %v1924_v8, %v4619_v31  ;;  %v2546_v55 = vrot.slane %v2544_v16, 2  ;;  %v2549_v58 = vrot.slane %v2547_v62, 3 }
 0x260   : > { %v3399_v11 = vadd.f32 %v3398_v15, %v3364_v63  ;;  %v2727_v21 = vadd.f32 %v5198_v2, %v2358_v10  ;;  %v2890_v27 = vpop.f32.mrf.mxu0  ;;  %v2789_v2 = vrot.slane %v5182_v36, 3  ;;  %v5284_v15 = vpop.f32.mrf.mxu3  ;;  %v2185_v7 = vsel %vm1793_vm6, %v2182_v54, %v2184_v41  ;;  %v2384_v63 = vld [vmem:[%s4192_s6 + $0xa0] sm:$0x7] }
 0x261   : > { %v3155_v10 = vpop.permute.xlu2 %3154  ;;  %v2550_v54 = vor.u32 %v2549_v58, %v2546_v55  ;;  %v2388_v8 = vunpack.c.l.b16 %v2384_v63  ;;  %v2791_v58 = vrot.slane %v5229_v50, 3 }
 0x262   : > { %v2963_v0 = vadd.f32 %v2888_v48, %v2727_v21 }
 0x263   : > { %v2551_v62 = vsel %vm2390_vm5, %v2541_v51, %v2550_v54 }
 0x264   : > { %v3287_v19 = vmul.f32 %v3150_v38, %v2963_v0 }
 0x265   : > { %v2285_v17 = vpop.f32.mrf.mxu2 }
 0x266   : > { %v3322_v3 = vadd.f32 %v3321_v18, %v3287_v19  ;;  %v3365_v48 = vmul.f32 %v3287_v19, %v2963_v0  ;;  %v2359_v26 = vadd.f32 %v2285_v17, %v1998_v1  ;;  %v1927_v53 = vpop.f32.mrf.mxu1  ;;  %v2790_v18 = vsel %vm2759_vm7, %v2787_v52, %v2789_v2 }
 0x268   : > { %v3400_v60 = vadd.f32 %v3399_v11, %v3365_v48  ;;  %v2728_v31 = vadd.f32 %v5223_v34, %v2359_v26  ;;  %v2893_v47 = vpop.f32.mrf.mxu0  ;;  %v1999_v34 = vadd.f32 %v1927_v53, %v4628_v35  ;;  %v5299_v32 = vpop.f32.mrf.mxu3  ;;  %v4121_v48 = vld [vmem:[%s4192_s6 + $0x88] sm:$0xff]  ;;  %v2186_v53 = vrot.slane %v5229_v50, 2 }
 0x269   : > { %3790 = vmatmul.msk.bf16.gmra.mxu1 %vm525_vm2, %v1824_v59  ;;  %v3160_v35 = vpop.permute.xlu0 %3159  ;;  %v1825_v26 = vrot.slane %v4121_v48, 2  ;;  %v2792_v50 = vsel %vm2759_vm7, %v2789_v2, %v2791_v58 }
 0x26a   : > { %3877 = vmatmul.msk.bf16.gmra.mxu2 %vm525_vm2, %v2185_v7  ;;  %v2964_v6 = vadd.f32 %v2890_v27, %v2728_v31  ;;  %v5303_v27 = vpack.c.b16 %v2388_v8, %v2388_v8  ;;  %v5429_v7 = vld [vmem:[#allocation10_spill] sm:$0xff] }
 0x26b   : > { %3915 = vmatmul.msk.bf16.gmra.mxu0 %vm525_vm2, %v2790_v18 }
 0x26c   : > { %v4004_v13 = vpack.c.bf16 %v2964_v6, %v2963_v0  ;;  %v3288_v11 = vmul.f32 %v3155_v10, %v2964_v6  ;;  %v2556_v59 = vshll.u32 %v5303_v27, 16  ;;  %v1826_v10 = vsel %vm1793_vm6, %v1823_v20, %v1825_v26 }
 0x26d   : > { %v2288_v21 = vpop.f32.mrf.mxu2  ;;  %3898 = vmatmul.msk.bf16.gmra.mxu3 %vm525_vm2, %v2551_v62 }
 0x26e   : > { %4073 = vst [vmem:[%s5043_s14 + $0x28] sm:$0xff] %v4004_v13   ;;  %v3323_v52 = vadd.f32 %v3322_v3, %v3288_v11  ;;  %v3366_v38 = vmul.f32 %v3288_v11, %v2964_v6  ;;  %v2360_v37 = vadd.f32 %v2288_v21, %v1999_v34  ;;  %v1929_v16 = vpop.f32.mrf.mxu1  ;;  %v2553_v3 = vshrl.u32 %v5303_v27, 16 }
 0x26f   : > { %v2000_v51 = vadd.f32 %v1929_v16, %v5429_v7  ;;  %v2187_v6 = vsel %vm1793_vm6, %v2184_v41, %v2186_v53  ;;  %v2558_v34 = vrot.slane %v2556_v59, 3  ;;  %v3170_v7 = vpop.permute.xlu2 %3169 }
 0x270   : > { %v3401_v1 = vadd.f32 %v3400_v60, %v3366_v38  ;;  %v2729_v19 = vadd.f32 %v5245_v43, %v2360_v37  ;;  %v2895_v17 = vpop.f32.mrf.mxu0  ;;  %v5313_v43 = vpop.f32.mrf.mxu3  ;;  %v2555_v8 = vrot.slane %v2553_v3, 2  ;;  %v5430_v37 = vld [vmem:[#allocation11_spill] sm:$0xff] }
 0x271   : > { %v3165_v38 = vpop.permute.xlu1 %3164 }
 0x272   : > { %v2965_v0 = vadd.f32 %v2893_v47, %v2729_v19  ;;  %v2559_v20 = vor.u32 %v2558_v34, %v2555_v8 }
 0x274   : > { %v3289_v55 = vmul.f32 %v3160_v35, %v2965_v0  ;;  %v2560_v35 = vsel %vm2390_vm5, %v2550_v54, %v2559_v20 }
 0x275   : > { %v2290_v60 = vpop.f32.mrf.mxu2 }
 0x276   : > { %v3324_v31 = vadd.f32 %v3323_v52, %v3289_v55  ;;  %v3367_v47 = vmul.f32 %v3289_v55, %v2965_v0  ;;  %v2361_v18 = vadd.f32 %v2290_v60, %v2000_v51  ;;  %v1932_v63 = vpop.f32.mrf.mxu1  ;;  %v4122_v51 = vld [vmem:[%s4192_s6 + $0x90] sm:$0xff]  ;;  %v2188_v60 = vrot.slane %v5271_v30, 2 }
 0x277   : > { %v2001_v16 = vadd.f32 %v1932_v63, %v5430_v37  ;;  %v1827_v55 = vrot.slane %v4122_v51, 2 }
 0x278   : > { %v3402_v13 = vadd.f32 %v3401_v1, %v3367_v47  ;;  %v2730_v11 = vadd.f32 %v5266_v49, %v2361_v18  ;;  %v2898_v21 = vpop.f32.mrf.mxu0  ;;  %v5325_v1 = vpop.f32.mrf.mxu3  ;;  %v2793_v18 = vrot.slane %v5271_v30, 3 }
 0x279   : > { %3791 = vmatmul.msk.bf16.gmra.mxu1 %vm525_vm2, %v1826_v10  ;;  %v1828_v34 = vsel %vm1793_vm6, %v1825_v26, %v1827_v55  ;;  %v3175_v30 = vpop.permute.xlu0 %3174 }
 0x27a   : > { %v2966_v52 = vadd.f32 %v2895_v17, %v2730_v11  ;;  %3878 = vmatmul.msk.bf16.gmra.mxu2 %vm525_vm2, %v2187_v6 }
 0x27b   : > { %3916 = vmatmul.msk.bf16.gmra.mxu0 %vm525_vm2, %v2792_v50 }
 0x27c   : > { %v4009_v41 = vpack.c.bf16 %v2966_v52, %v2965_v0  ;;  %v3290_v62 = vmul.f32 %v3165_v38, %v2966_v52  ;;  %v2059_v38 = vld [vmem:[%s4192_s6 + $0xa0] sm:$0x3] }
 0x27d   : > { %v2293_v49 = vpop.f32.mrf.mxu2  ;;  %3899 = vmatmul.msk.bf16.gmra.mxu3 %vm525_vm2, %v2560_v35  ;;  %v2135_v20 = vunpack.c.l.b16 %v2059_v38  ;;  %v3180_v35 = vpop.permute.xlu1 %3179 }
 0x27e   : > { %4074 = vst [vmem:[%s5043_s14 + $0x30] sm:$0xff] %v4009_v41   ;;  %v3325_v36 = vadd.f32 %v3324_v31, %v3290_v62  ;;  %v3368_v2 = vmul.f32 %v3290_v62, %v2966_v52  ;;  %v2362_v19 = vadd.f32 %v2293_v49, %v2001_v16  ;;  %v1934_v17 = vpop.f32.mrf.mxu1 }
 0x27f   : > { %v2002_v31 = vadd.f32 %v1934_v17, %v4684_v44  ;;  %v2794_v44 = vsel %vm2759_vm7, %v2791_v58, %v2793_v18 }
 0x280   : > { %v3403_v48 = vadd.f32 %v3402_v13, %v3368_v2  ;;  %v2731_v3 = vadd.f32 %v5284_v15, %v2362_v19  ;;  %v2900_v59 = vpop.f32.mrf.mxu0  ;;  %v5335_v54 = vpop.f32.mrf.mxu3  ;;  %v2189_v13 = vsel %vm1793_vm6, %v2186_v53, %v2188_v60 }
 0x282   : > { %v2967_v0 = vadd.f32 %v2898_v21, %v2731_v3  ;;  %v1829_v3 = vrot.slane %v4679_v12, 2 }
 0x284   : > { %v3291_v47 = vmul.f32 %v3170_v7, %v2967_v0 }
 0x285   : > { %v2295_v63 = vpop.f32.mrf.mxu2 }
 0x286   : > { %v3326_v10 = vadd.f32 %v3325_v36, %v3291_v47  ;;  %v3369_v15 = vmul.f32 %v3291_v47, %v2967_v0  ;;  %v2363_v6 = vadd.f32 %v2295_v63, %v2002_v31  ;;  %v1937_v8 = vpop.f32.mrf.mxu1  ;;  %v2154_v36 = vpack.c.b16 %v2135_v20, %v2135_v20 }
 0x287   : > { %v2003_v53 = vadd.f32 %v1937_v8, %v4698_v9 }
 0x288   : > { %v3404_v11 = vadd.f32 %v3403_v48, %v3369_v15  ;;  %v2732_v21 = vadd.f32 %v5299_v32, %v2363_v6  ;;  %v2903_v50 = vpop.f32.mrf.mxu0  ;;  %v2674_v16 = vpop.f32.mrf.mxu3  ;;  %v1830_v6 = vsel %vm1793_vm6, %v1827_v55, %v1829_v3 }
 0x289   : > { %3792 = vmatmul.msk.bf16.gmra.mxu1 %vm525_vm2, %v1828_v34 }
 0x28a   : > { %v2968_v52 = vadd.f32 %v2900_v59, %v2732_v21  ;;  %3879 = vmatmul.msk.bf16.gmra.mxu2 %vm525_vm2, %v2189_v13  ;;  %v2190_v59 = vrot.slane %v2154_v36, 2  ;;  %v3185_v13 = vpop.permute.xlu2 %3184 }
 0x28b   : > { %3917 = vmatmul.msk.bf16.gmra.mxu0 %vm525_vm2, %v2794_v44 }
 0x28c   : > { %v4014_v26 = vpack.c.bf16 %v2968_v52, %v2967_v0  ;;  %v3292_v41 = vmul.f32 %v3175_v30, %v2968_v52  ;;  %v2795_v0 = vrot.slane %v5303_v27, 3 }
 0x28d   : > { %v2298_v37 = vpop.f32.mrf.mxu2 }
 0x28e   : > { %4075 = vst [vmem:[%s5043_s14 + $0x38] sm:$0xff] %v4014_v26   ;;  %v3327_v32 = vadd.f32 %v3326_v10, %v3292_v41  ;;  %v3370_v62 = vmul.f32 %v3292_v41, %v2968_v52  ;;  %v2364_v58 = vadd.f32 %v2298_v37, %v2003_v53  ;;  %v1939_v49 = vpop.f32.mrf.mxu1  ;;  %v3190_v26 = vpop.permute.xlu0 %3189 }
 0x28f   : > { %v2004_v9 = vadd.f32 %v1939_v49, %v4714_v46  ;;  %v2796_v46 = vsel %vm2759_vm7, %v2793_v18, %v2795_v0 }
 0x290   : > { %v3405_v2 = vadd.f32 %v3404_v11, %v3370_v62  ;;  %v2733_v19 = vadd.f32 %v5313_v43, %v2364_v58  ;;  %v2905_v17 = vpop.f32.mrf.mxu0  ;;  %v2677_v31 = vpop.f32.mrf.mxu3  ;;  %v2191_v43 = vsel %vm1793_vm6, %v2188_v60, %v2190_v59 }
 0x292   : > { %v2969_v48 = vadd.f32 %v2903_v50, %v2733_v19 }
 0x294   : > { %v3293_v7 = vmul.f32 %v3180_v35, %v2969_v48 }
 0x295   : > { %v2300_v51 = vpop.f32.mrf.mxu2 }
 0x296   : > { %v3328_v47 = vadd.f32 %v3327_v32, %v3293_v7  ;;  %v3371_v63 = vmul.f32 %v3293_v7, %v2969_v48  ;;  %v2365_v10 = vadd.f32 %v2300_v51, %v2004_v9  ;;  %v1942_v15 = vpop.f32.mrf.mxu1 }
 0x297   : > { %v2005_v55 = vadd.f32 %v1942_v15, %v4734_v14 }
 0x298   : > { %v3406_v8 = vadd.f32 %v3405_v2, %v3371_v63  ;;  %v2734_v12 = vadd.f32 %v5325_v1, %v2365_v10  ;;  %v2908_v34 = vpop.f32.mrf.mxu0  ;;  %v2679_v60 = vpop.f32.mrf.mxu3 }
 0x299   : > { %3793 = vmatmul.msk.bf16.gmra.mxu1 %vm525_vm2, %v1830_v6 }
 0x29a   : > { %v2970_v11 = vadd.f32 %v2905_v17, %v2734_v12  ;;  %3880 = vmatmul.msk.bf16.gmra.mxu2 %vm525_vm2, %v2191_v43  ;;  %v3200_v43 = vpop.permute.xlu2 %3199 }
 0x29b   : > { %3918 = vmatmul.msk.bf16.gmra.mxu0 %vm525_vm2, %v2796_v46 }
 0x29c   : > { %v4019_v27 = vpack.c.bf16 %v2970_v11, %v2969_v48  ;;  %v3294_v21 = vmul.f32 %v3185_v13, %v2970_v11  ;;  %v3195_v48 = vpop.permute.xlu1 %3194 }
 0x29d   : > { %v2303_v50 = vpop.f32.mrf.mxu2 }
 0x29e   : > { %4076 = vst [vmem:[%s5043_s14 + $0x40] sm:$0xff] %v4019_v27   ;;  %v3329_v44 = vadd.f32 %v3328_v47, %v3294_v21  ;;  %v3372_v1 = vmul.f32 %v3294_v21, %v2970_v11  ;;  %v2366_v38 = vadd.f32 %v2303_v50, %v2005_v55  ;;  %v1944_v30 = vpop.f32.mrf.mxu1 }
 0x29f   : > { %v2006_v41 = vadd.f32 %v1944_v30, %v4751_v57 }
 0x2a0   : > { %v3407_v18 = vadd.f32 %v3406_v8, %v3372_v1  ;;  %v2735_v52 = vadd.f32 %v5335_v54, %v2366_v38  ;;  %v2910_v20 = vpop.f32.mrf.mxu0  ;;  %v2682_v14 = vpop.f32.mrf.mxu3 }
 0x2a2   : > { %v2971_v53 = vadd.f32 %v2908_v34, %v2735_v52 }
 0x2a4   : > { %v3295_v37 = vmul.f32 %v3190_v26, %v2971_v53 }
 0x2a5   : > { %v2305_v32 = vpop.f32.mrf.mxu2 }
 0x2a6   : > { %v3330_v62 = vadd.f32 %v3329_v44, %v3295_v37  ;;  %v3373_v58 = vmul.f32 %v3295_v37, %v2971_v53  ;;  %v2367_v49 = vadd.f32 %v2305_v32, %v2006_v41  ;;  %v1947_v36 = vpop.f32.mrf.mxu1  ;;  %v3205_v44 = vpop.permute.xlu0 %3204 }
 0x2a7   : > { %v2007_v54 = vadd.f32 %v1947_v36, %v4764_v29  ;;  %v3210_v32 = vpop.permute.xlu1 %3209 }
 0x2a8   : > { %v3408_v2 = vadd.f32 %v3407_v18, %v3373_v58  ;;  %v2736_v19 = vadd.f32 %v2674_v16, %v2367_v49  ;;  %v2913_v17 = vpop.f32.mrf.mxu0  ;;  %v2684_v47 = vpop.f32.mrf.mxu3 }
 0x2aa   : > { %v2972_v35 = vadd.f32 %v2910_v20, %v2736_v19 }
 0x2ac   : > { %v4024_v3 = vpack.c.bf16 %v2972_v35, %v2971_v53  ;;  %v3296_v59 = vmul.f32 %v3195_v48, %v2972_v35 }
 0x2ad   : > { %v2308_v9 = vpop.f32.mrf.mxu2 }
 0x2ae   : > { %4077 = vst [vmem:[%s5043_s14 + $0x48] sm:$0xff] %v4024_v3   ;;  %v3331_v57 = vadd.f32 %v3330_v62, %v3296_v59  ;;  %v3374_v7 = vmul.f32 %v3296_v59, %v2972_v35  ;;  %v2368_v0 = vadd.f32 %v2308_v9, %v2007_v54  ;;  %v1949_v51 = vpop.f32.mrf.mxu1  ;;  %v3215_v54 = vpop.permute.xlu2 %3214 }
 0x2af   : > { %v2008_v8 = vadd.f32 %v1949_v51, %v4781_v24 }
 0x2b0   : > { %v3409_v63 = vadd.f32 %v3408_v2, %v3374_v7  ;;  %v2737_v10 = vadd.f32 %v2677_v31, %v2368_v0  ;;  %v2915_v15 = vpop.f32.mrf.mxu0  ;;  %v2687_v21 = vpop.f32.mrf.mxu3 }
 0x2b2   : > { %v2973_v6 = vadd.f32 %v2913_v17, %v2737_v10 }
 0x2b4   : > { %v3297_v16 = vmul.f32 %v3200_v43, %v2973_v6 }
 0x2b5   : > { %v2310_v12 = vpop.f32.mrf.mxu2 }
 0x2b6   : > { %v3332_v34 = vadd.f32 %v3331_v57, %v3297_v16  ;;  %v3375_v29 = vmul.f32 %v3297_v16, %v2973_v6  ;;  %v2369_v46 = vadd.f32 %v2310_v12, %v2008_v8  ;;  %v1952_v13 = vpop.f32.mrf.mxu1  ;;  %v3220_v16 = vpop.permute.xlu0 %3219 }
 0x2b7   : > { %v2009_v38 = vadd.f32 %v1952_v13, %v4790_v61 }
 0x2b8   : > { %v3410_v11 = vadd.f32 %v3409_v63, %v3375_v29  ;;  %v2738_v27 = vadd.f32 %v2679_v60, %v2369_v46  ;;  %v2918_v55 = vpop.f32.mrf.mxu0  ;;  %v2689_v60 = vpop.f32.mrf.mxu3 }
 0x2ba   : > { %v2974_v50 = vadd.f32 %v2915_v15, %v2738_v27 }
 0x2bc   : > { %v4029_v1 = vpack.c.bf16 %v2974_v50, %v2973_v6  ;;  %v3298_v31 = vmul.f32 %v3205_v44, %v2974_v50  ;;  %v3225_v44 = vpop.permute.xlu1 %3224 }
 0x2bd   : > { %v2313_v30 = vpop.f32.mrf.mxu2 }
 0x2be   : > { %4078 = vst [vmem:[%s5043_s14 + $0x50] sm:$0xff] %v4029_v1   ;;  %v3333_v18 = vadd.f32 %v3332_v34, %v3298_v31  ;;  %v3376_v24 = vmul.f32 %v3298_v31, %v2974_v50  ;;  %v2370_v52 = vadd.f32 %v2313_v30, %v2009_v38  ;;  %v1954_v20 = vpop.f32.mrf.mxu1 }
 0x2bf   : > { %v2010_v58 = vadd.f32 %v1954_v20, %v4803_v25 }
 0x2c0   : > { %v3411_v26 = vadd.f32 %v3410_v11, %v3376_v24  ;;  %v2739_v53 = vadd.f32 %v2682_v14, %v2370_v52  ;;  %v2920_v41 = vpop.f32.mrf.mxu0  ;;  %v2692_v7 = vpop.f32.mrf.mxu3 }
 0x2c2   : > { %v2975_v37 = vadd.f32 %v2918_v55, %v2739_v53 }
 0x2c4   : > { %v3299_v62 = vmul.f32 %v3210_v32, %v2975_v37 }
 0x2c5   : > { %v2315_v49 = vpop.f32.mrf.mxu2 }
 0x2c6   : > { %v3334_v36 = vadd.f32 %v3333_v18, %v3299_v62  ;;  %v3377_v2 = vmul.f32 %v3299_v62, %v2975_v37  ;;  %v2371_v61 = vadd.f32 %v2315_v49, %v2010_v58  ;;  %v1957_v19 = vpop.f32.mrf.mxu1 }
 0x2c7   : > { %v2011_v9 = vadd.f32 %v1957_v19, %v4817_v56 }
 0x2c8   : > { %v3412_v17 = vadd.f32 %v3411_v26, %v3377_v2  ;;  %v2740_v35 = vadd.f32 %v2684_v47, %v2371_v61  ;;  %v2923_v48 = vpop.f32.mrf.mxu0  ;;  %v2694_v13 = vpop.f32.mrf.mxu3 }
 0x2ca   : > { %v2976_v3 = vadd.f32 %v2920_v41, %v2740_v35  ;;  %v3235_v35 = vpop.permute.xlu0 %3234 }
 0x2cc   : > { %v4034_v59 = vpack.c.bf16 %v2976_v3, %v2975_v37  ;;  %v3300_v14 = vmul.f32 %v3215_v54, %v2976_v3  ;;  %v3230_v37 = vpop.permute.xlu2 %3229 }
 0x2cd   : > { %v2318_v57 = vpop.f32.mrf.mxu2 }
 0x2ce   : > { %4079 = vst [vmem:[%s5043_s14 + $0x58] sm:$0xff] %v4034_v59   ;;  %v3335_v0 = vadd.f32 %v3334_v36, %v3300_v14  ;;  %v3378_v25 = vmul.f32 %v3300_v14, %v2976_v3  ;;  %v2372_v51 = vadd.f32 %v2318_v57, %v2011_v9  ;;  %v1959_v63 = vpop.f32.mrf.mxu1 }
 0x2cf   : > { %v2012_v8 = vadd.f32 %v1959_v63, %v4838_v23 }
 0x2d0   : > { %v3413_v10 = vadd.f32 %v3412_v17, %v3378_v25  ;;  %v2741_v15 = vadd.f32 %v2687_v21, %v2372_v51  ;;  %v2925_v6 = vpop.f32.mrf.mxu0  ;;  %v2697_v53 = vpop.f32.mrf.mxu3 }
 0x2d2   : > { %v2977_v43 = vadd.f32 %v2923_v48, %v2741_v15 }
 0x2d4   : > { %v3301_v47 = vmul.f32 %v3220_v16, %v2977_v43 }
 0x2d5   : > { %v2320_v12 = vpop.f32.mrf.mxu2 }
 0x2d6   : > { %v3336_v34 = vadd.f32 %v3335_v0, %v3301_v47  ;;  %v3379_v29 = vmul.f32 %v3301_v47, %v2977_v43  ;;  %v2373_v56 = vadd.f32 %v2320_v12, %v2012_v8  ;;  %v1962_v46 = vpop.f32.mrf.mxu1 }
 0x2d7   : > { %v2013_v31 = vadd.f32 %v1962_v46, %v4852_v28 }
 0x2d8   : > { %v3414_v11 = vadd.f32 %v3413_v10, %v3379_v29  ;;  %v2742_v27 = vadd.f32 %v2689_v60, %v2373_v56  ;;  %v2928_v55 = vpop.f32.mrf.mxu0  ;;  %v2699_v48 = vpop.f32.mrf.mxu3 }
 0x2d9   : > { %v3240_v10 = vpop.permute.xlu1 %3239 }
 0x2da   : > { %v2978_v50 = vadd.f32 %v2925_v6, %v2742_v27 }
 0x2dc   : > { %v4039_v1 = vpack.c.bf16 %v2978_v50, %v2977_v43  ;;  %v3302_v21 = vmul.f32 %v3225_v44, %v2978_v50 }
 0x2dd   : > { %v2323_v38 = vpop.f32.mrf.mxu2 }
 0x2de   : > { %4080 = vst [vmem:[%s5043_s14 + $0x60] sm:$0xff] %v4039_v1   ;;  %v3337_v30 = vadd.f32 %v3336_v34, %v3302_v21  ;;  %v3380_v23 = vmul.f32 %v3302_v21, %v2978_v50  ;;  %v2374_v18 = vadd.f32 %v2323_v38, %v2013_v31  ;;  %v1964_v24 = vpop.f32.mrf.mxu1 }
 0x2df   : > { %v2014_v60 = vadd.f32 %v1964_v24, %v4869_v4  ;;  %v3250_v24 = vpop.permute.xlu0 %3249 }
 0x2e0   : > { %v3415_v52 = vadd.f32 %v3414_v11, %v3380_v23  ;;  %v2743_v20 = vadd.f32 %v2692_v7, %v2374_v18  ;;  %v2930_v26 = vpop.f32.mrf.mxu0  ;;  %v2702_v16 = vpop.f32.mrf.mxu3 }
 0x2e2   : > { %v2979_v41 = vadd.f32 %v2928_v55, %v2743_v20 }
 0x2e4   : > { %v3303_v32 = vmul.f32 %v3230_v37, %v2979_v41 }
 0x2e5   : > { %v2325_v62 = vpop.f32.mrf.mxu2 }
 0x2e6   : > { %v3338_v58 = vadd.f32 %v3337_v30, %v3303_v32  ;;  %v3381_v49 = vmul.f32 %v3303_v32, %v2979_v41  ;;  %v2375_v28 = vadd.f32 %v2325_v62, %v2014_v60  ;;  %v1967_v36 = vpop.f32.mrf.mxu1 }
 0x2e7   : > { %v2015_v59 = vadd.f32 %v1967_v36, %v4884_v45 }
 0x2e8   : > { %v3416_v2 = vadd.f32 %v3415_v52, %v3381_v49  ;;  %v2744_v61 = vadd.f32 %v2694_v13, %v2375_v28  ;;  %v2933_v19 = vpop.f32.mrf.mxu0  ;;  %v3245_v13 = vpop.permute.xlu2 %3244 }
 0x2e9   : > { %v2704_v31 = vpop.f32.mrf.mxu3  ;;  %v3255_v49 = vpop.permute.xlu1 %3254 }
 0x2ea   : > { %v2980_v17 = vadd.f32 %v2930_v26, %v2744_v61 }
 0x2ec   : > { %v4044_v3 = vpack.c.bf16 %v2980_v17, %v2979_v41  ;;  %v3304_v54 = vmul.f32 %v3235_v35, %v2980_v17 }
 0x2ed   : > { %v2328_v14 = vpop.f32.mrf.mxu2 }
 0x2ee   : > { %4081 = vst [vmem:[%s5043_s14 + $0x68] sm:$0xff] %v4044_v3   ;;  %v3339_v9 = vadd.f32 %v3338_v58, %v3304_v54  ;;  %v3382_v4 = vmul.f32 %v3304_v54, %v2980_v17  ;;  %v2376_v57 = vadd.f32 %v2328_v14, %v2015_v59  ;;  %v1969_v7 = vpop.f32.mrf.mxu1 }
 0x2ef   : > { %v2016_v6 = vadd.f32 %v1969_v7, %v4901_v39 }
 0x2f0   : > { %v3417_v0 = vadd.f32 %v3416_v2, %v3382_v4  ;;  %v2745_v25 = vadd.f32 %v2697_v53, %v2376_v57  ;;  %v2935_v51 = vpop.f32.mrf.mxu0  ;;  %v3260_v14 = vpop.permute.xlu2 %3259 }
 0x2f1   : > { %v2707_v62 = vpop.f32.mrf.mxu3 }
 0x2f2   : > { %v2981_v63 = vadd.f32 %v2933_v19, %v2745_v25 }
 0x2f4   : > { %v3305_v15 = vmul.f32 %v3240_v10, %v2981_v63 }
 0x2f5   : > { %v2330_v43 = vpop.f32.mrf.mxu2 }
 0x2f6   : > { %v3340_v47 = vadd.f32 %v3339_v9, %v3305_v15  ;;  %v3383_v8 = vmul.f32 %v3305_v15, %v2981_v63  ;;  %v2377_v45 = vadd.f32 %v2330_v43, %v2016_v6  ;;  %v1972_v12 = vpop.f32.mrf.mxu1  ;;  %v3265_v43 = vpop.permute.xlu0 %3264 }
 0x2f7   : > { %v2017_v55 = vadd.f32 %v1972_v12, %v4915_v42 }
 0x2f8   : > { %v3418_v34 = vadd.f32 %v3417_v0, %v3383_v8  ;;  %v2746_v29 = vadd.f32 %v2699_v48, %v2377_v45  ;;  %v2938_v56 = vpop.f32.mrf.mxu0 }
 0x2f9   : > { %v2709_v9 = vpop.f32.mrf.mxu3 }
 0x2fa   : > { %v2982_v46 = vadd.f32 %v2935_v51, %v2746_v29 }
 0x2fc   : > { %v4049_v11 = vpack.c.bf16 %v2982_v46, %v2981_v63  ;;  %v3306_v27 = vmul.f32 %v3245_v13, %v2982_v46 }
 0x2fd   : > { %v2333_v50 = vpop.f32.mrf.mxu2 }
 0x2fe   : > { %4082 = vst [vmem:[%s5043_s14 + $0x70] sm:$0xff] %v4049_v11   ;;  %v3341_v44 = vadd.f32 %v3340_v47, %v3306_v27  ;;  %v3384_v39 = vmul.f32 %v3306_v27, %v2982_v46  ;;  %v2378_v1 = vadd.f32 %v2333_v50, %v2017_v55  ;;  %v1974_v21 = vpop.f32.mrf.mxu1  ;;  %v3270_v55 = vpop.permute.xlu1 %3269 }
 0x2ff   : > { %v2018_v20 = vadd.f32 %v1974_v21, %v4932_v5 }
 0x300   : > { %v3419_v38 = vadd.f32 %v3418_v34, %v3384_v39  ;;  %v2747_v30 = vadd.f32 %v2702_v16, %v2378_v1  ;;  %v2940_v23 = vpop.f32.mrf.mxu0 }
 0x301   : > { %v2712_v45 = vpop.f32.mrf.mxu3 }
 0x302   : > { %v2983_v18 = vadd.f32 %v2938_v56, %v2747_v30 }
 0x304   : > { %v3307_v52 = vmul.f32 %v3250_v24, %v2983_v18 }
 0x305   : > { %v2335_v26 = vpop.f32.mrf.mxu2 }
 0x306   : > { %v3342_v53 = vadd.f32 %v3341_v44, %v3307_v52  ;;  %v3385_v41 = vmul.f32 %v3307_v52, %v2983_v18  ;;  %v2379_v42 = vadd.f32 %v2335_v26, %v2018_v20  ;;  %v1977_v37 = vpop.f32.mrf.mxu1  ;;  %v5431_v44 = vld [vmem:[#allocation8_spill] sm:$0xff]  ;;  %v3275_v52 = vpop.permute.xlu2 %3274 }
 0x307   : > { %v2019_v61 = vadd.f32 %v1977_v37, %v4946_v22 }
 0x308   : > { %v3420_v32 = vadd.f32 %v3419_v38, %v3385_v41  ;;  %v2748_v60 = vadd.f32 %v2704_v31, %v2379_v42  ;;  %v2943_v28 = vpop.f32.mrf.mxu0 }
 0x309   : > { %v2714_v38 = vpop.f32.mrf.mxu3 }
 0x30a   : > { %v2984_v58 = vadd.f32 %v2940_v23, %v2748_v60 }
 0x30c   : > { %v4054_v36 = vpack.c.bf16 %v2984_v58, %v2983_v18  ;;  %v3308_v2 = vmul.f32 %v3255_v49, %v2984_v58 }
 0x30d   : > { %v2338_v19 = vpop.f32.mrf.mxu2 }
 0x30e   : > { %4083 = vst [vmem:[%s5043_s14 + $0x78] sm:$0xff] %v4054_v36   ;;  %v3343_v17 = vadd.f32 %v3342_v53, %v3308_v2  ;;  %v3386_v5 = vmul.f32 %v3308_v2, %v2984_v58  ;;  %v2380_v35 = vadd.f32 %v2338_v19, %v2019_v61  ;;  %v1979_v48 = vpop.f32.mrf.mxu1 }
 0x30f   : > { %v2020_v57 = vadd.f32 %v1979_v48, %v4965_v33 }
 0x310   : > { %v3421_v3 = vadd.f32 %v3420_v32, %v3386_v5  ;;  %v2749_v54 = vadd.f32 %v2707_v62, %v2380_v35  ;;  %v2945_v7 = vpop.f32.mrf.mxu0 }
 0x312   : > { %v2985_v59 = vadd.f32 %v2943_v28, %v2749_v54 }
 0x314   : > { %v3309_v4 = vmul.f32 %v3260_v14, %v2985_v59 }
 0x315   : > { %v2340_v0 = vpop.f32.mrf.mxu2 }
 0x316   : > { %v3344_v25 = vadd.f32 %v3343_v17, %v3309_v4  ;;  %v3387_v51 = vmul.f32 %v3309_v4, %v2985_v59  ;;  %v2381_v22 = vadd.f32 %v2340_v0, %v2020_v57  ;;  %v1982_v63 = vpop.f32.mrf.mxu1 }
 0x317   : > { %v2021_v8 = vadd.f32 %v1982_v63, %v4979_v40 }
 0x318   : > { %v3422_v10 = vadd.f32 %v3421_v3, %v3387_v51  ;;  %v2750_v15 = vadd.f32 %v2709_v9, %v2381_v22  ;;  %v2948_v56 = vpop.f32.mrf.mxu0 }
 0x31a   : > { %v2986_v6 = vadd.f32 %v2945_v7, %v2750_v15 }
 0x31c   : > { %v4059_v16 = vpack.c.bf16 %v2986_v6, %v2985_v59  ;;  %v3310_v47 = vmul.f32 %v3265_v43, %v2986_v6 }
 0x31d   : > { %v2343_v12 = vpop.f32.mrf.mxu2 }
 0x31e   : > { %4084 = vst [vmem:[%s5043_s14 + $0x80] sm:$0xff] %v4059_v16   ;;  %v3345_v34 = vadd.f32 %v3344_v25, %v3310_v47  ;;  %v3388_v33 = vmul.f32 %v3310_v47, %v2986_v6  ;;  %v2382_v29 = vadd.f32 %v2343_v12, %v2021_v8  ;;  %v1984_v11 = vpop.f32.mrf.mxu1 }
 0x31f   : > { %v2022_v39 = vadd.f32 %v1984_v11, %v5431_v44 }
 0x320   : > { %v3423_v46 = vadd.f32 %v3422_v10, %v3388_v33  ;;  %v2751_v13 = vadd.f32 %v2712_v45, %v2382_v29  ;;  %v2950_v18 = vpop.f32.mrf.mxu0 }
 0x322   : > { %v2987_v27 = vadd.f32 %v2948_v56, %v2751_v13 }
 0x324   : > { %v3311_v50 = vmul.f32 %v3270_v55, %v2987_v27 }
 0x325   : > { %v2345_v1 = vpop.f32.mrf.mxu2 }
 0x326   : > { %v3346_v21 = vadd.f32 %v3345_v34, %v3311_v50  ;;  %v3389_v31 = vmul.f32 %v3311_v50, %v2987_v27  ;;  %v2383_v40 = vadd.f32 %v2345_v1, %v2022_v39 }
 0x328   : > { %v3424_v30 = vadd.f32 %v3423_v46, %v3389_v31  ;;  %v2752_v23 = vadd.f32 %v2714_v38, %v2383_v40 }
 0x32a   : > { %v2988_v24 = vadd.f32 %v2950_v18, %v2752_v23 }
 0x32c   : > { %v4064_v20 = vpack.c.bf16 %v2988_v24, %v2987_v27  ;;  %v3312_v26 = vmul.f32 %v3275_v52, %v2988_v24 }
 0x32e   : > { %4085 = vst [vmem:[%s5043_s14 + $0x88] sm:$0xff] %v4064_v20   ;;  %v3347_v53 = vadd.f32 %v3346_v21, %v3312_v26  ;;  %v3390_v41 = vmul.f32 %v3312_v26, %v2988_v24 }
 0x330   : > { %v3348_v42 = vrot.slane %v3347_v53, 4  ;;  %v3425_v37 = vadd.f32 %v3424_v30, %v3390_v41 }
 0x332   : > { %v3349_v32 = vadd.f32 %v3348_v42, %v3347_v53  ;;  %v3426_v60 = vrot.slane %v3425_v37, 4 }
 0x334   : > { %v3350_v62 = vrot.slane %v3349_v32, 2  ;;  %v3427_v58 = vadd.f32 %v3426_v60, %v3425_v37 }
 0x336   : > { %v3351_v49 = vadd.f32 %v3350_v62, %v3349_v32  ;;  %v3428_v28 = vrot.slane %v3427_v58, 2 }
 0x338   : > { %v3352_v36 = vrot.slane %v3351_v49, 1  ;;  %v3429_v2 = vadd.f32 %v3428_v28, %v3427_v58 }
 0x33a   : > { %v3353_v61 = vadd.f32 %v3352_v36, %v3351_v49  ;;  %v3430_v19 = vrot.slane %v3429_v2, 1 }
 0x33c   : > { %3354 = vst [vmem:[%s238_s7] sm:$0x1] %v3353_v61  ;;  %v3431_v17 = vadd.f32 %v3430_v19, %v3429_v2 }
 0x33e   : > { %3432 = vst [vmem:[%s241_s9] sm:$0x1] %v3431_v17 }
 0x33f PF: > { %s16_s18 = sadd.s32 1, %s4129_s18  }
 0x340   : > { %p13_p4 = scmp.ge.s32.totalorder %s16_s18, 4  }
 0x342   :  { %15 = sbr.rel (!%p13_p4) target bundleno = 1 (0x1), region = 94 }

</bundles_post_ra>
